<compile_context>
chip_gen: v7x
topology: tpu7x:2x2x1
jax: 0.10.0
libtpu: 0.0.40
codegen_flags: <defaults>
</compile_context>

<pallas_src>
import jax
import jax.numpy as jnp
import numpy as np
from jax.experimental import pallas as pl
from jax.experimental.pallas import tpu as pltpu

C_IN, C_OUT, K = 3, 2, 5
PAD_LO, PAD_HI = 2, 3     # top/left, bottom/right pad of the equivalent correlation
LANE_W = 128              # one lane tile; all packed planes must fit inside it


def convt_sigmoid_kernel(wvec_ref, b_ref, x_ref, o_ref, xpack_ref):
    # wvec_ref:  (C_OUT*K*K, 128) f32 VMEM  — per-(co,u,v) lane-packed weight rows
    # b_ref:     (C_OUT,)         f32 SMEM  — bias scalars
    # x_ref:     (N, C_IN, H, W)      VMEM  — whole batch, raw input
    # o_ref:     (N, C_OUT, H+1, W+1) VMEM
    # xpack_ref: (H+K, 128+K-1)   f32 VMEM scratch — lane-packed, zero-padded planes
    n_batch, c_in, h_in, w_in = x_ref.shape
    _, c_out, h_out, w_out = o_ref.shape
    h_pad, lane_src = xpack_ref.shape
    seg = w_in + K                      # per-plane segment width (= padded plane width)
    lane_w = lane_src - (K - 1)         # = 128

    # ---- pack + zero-pad all (n, ci) input planes along the lane axis (done once) ----
    # Segment s = n*C_IN + ci occupies lanes [s*seg, (s+1)*seg); plane data at (+2, +2).
    xpack_ref[...] = jnp.zeros_like(xpack_ref)
    for n in range(n_batch):
        for ci in range(c_in):
            off = (n * c_in + ci) * seg + PAD_LO
            xpack_ref[PAD_LO:PAD_LO + h_in, off:off + w_in] = (
                x_ref[n, ci, :, :].astype(jnp.float32))
    xp = xpack_ref[...]                 # single VMEM load; everything below is on vregs

    # ---- packed shift-and-FMA: one vector op covers every (n, ci) plane at once ----
    # out[co][y, s*seg + x] += xp[y+u, s*seg + x + v] * w[co, ci(s), u, v]
    # (x + v <= w_in + K - 2 < seg, so windows never bleed across segment boundaries
    #  for the lanes that are read back below.)
    acc = [jnp.zeros((h_out, lane_w), jnp.float32) for _ in range(c_out)]
    for u in range(K):
        for v in range(K):
            x_uv = xp[u:u + h_out, v:v + lane_w]            # (h_out, 128) window
            for co in range(c_out):
                w_row = wvec_ref[(co * K + u) * K + v][None, :]   # (1, 128)
                acc[co] = acc[co] + x_uv * w_row

    # ---- unpack segments: reduce over ci, add bias, sigmoid (tanh form -> EUP), store ----
    for n in range(n_batch):
        for co in range(c_out):
            s0 = n * c_in
            tot = acc[co][:, s0 * seg:s0 * seg + w_out]
            for ci in range(1, c_in):
                s = s0 + ci
                tot = tot + acc[co][:, s * seg:s * seg + w_out]
            tot = tot + b_ref[co]
            # sigmoid(x) = 0.5*(tanh(x/2)+1): transcendental on EUP, no VALU divide.
            o_ref[n, co, :, :] = (0.5 * (jnp.tanh(0.5 * tot) + 1.0)).astype(o_ref.dtype)


def prepare_params(weight, bias, w_in):
    """One-time (parameter-init) preprocessing of the ConvTranspose2d parameters.

    weight: (C_IN, C_OUT, K, K) — PyTorch ConvTranspose2d layout.
    Returns (lane-packed weight table (C_OUT*K*K, 128) f32, bias f32).
    """
    seg = w_in + K
    n_seg = LANE_W // seg
    # Spatially flip and swap to [co, ci, u, v]: convT(stride=1) == correlation with
    # the flipped kernel.
    wf = np.asarray(jnp.transpose(jnp.flip(weight, axis=(-1, -2)), (1, 0, 2, 3)),
                    dtype=np.float32)
    tbl = np.zeros((C_OUT * K * K, LANE_W), np.float32)
    for co in range(C_OUT):
        for u in range(K):
            for v in range(K):
                row = (co * K + u) * K + v
                for s in range(n_seg):
                    tbl[row, s * seg:(s + 1) * seg] = wf[co, s % C_IN, u, v]
    return jnp.asarray(tbl), jnp.asarray(bias, dtype=jnp.float32)


def conv_transpose_sigmoid(x, w_lane, bias_f32):
    """x: (N, C_IN, H, W) f32; w_lane/bias_f32 from prepare_params()."""
    n_batch, c, h_in, w_in = x.shape
    assert c == C_IN
    seg = w_in + K
    assert n_batch * C_IN * seg <= LANE_W, "all (n, ci) planes must fit one lane tile"
    h_out, w_out = h_in + 1, w_in + 1

    return pl.pallas_call(
        convt_sigmoid_kernel,
        out_shape=jax.ShapeDtypeStruct((n_batch, C_OUT, h_out, w_out), x.dtype),
        in_specs=[
            pl.BlockSpec(memory_space=pltpu.MemorySpace.VMEM),   # lane-packed weights
            pl.BlockSpec(memory_space=pltpu.MemorySpace.SMEM),   # bias scalars
            pl.BlockSpec(memory_space=pltpu.MemorySpace.VMEM),   # whole input batch
        ],
        out_specs=pl.BlockSpec(memory_space=pltpu.MemorySpace.VMEM),
        scratch_shapes=[pltpu.VMEM((h_in + K, LANE_W + K - 1), jnp.float32)],
    )(w_lane, bias_f32, x)


def reference(x, weight, bias):
    """Pure-JAX reference via XLA conv (same math, independent lowering path)."""
    x_pad = jnp.pad(x, ((0, 0), (0, 0), (PAD_LO, PAD_HI), (PAD_LO, PAD_HI)))
    w = jnp.transpose(jnp.flip(weight, axis=(-1, -2)), (1, 0, 2, 3))  # OIHW
    out = jax.lax.conv_general_dilated(
        x_pad, w, window_strides=(1, 1), padding="VALID",
        dimension_numbers=("NCHW", "OIHW", "NCHW"))
    return jax.nn.sigmoid(out + bias[None, :, None, None])


if __name__ == "__main__":
    key = jax.random.PRNGKey(0)
    kx, kw, kb = jax.random.split(key, 3)

    N, H, W = 2, 16, 16
    x = jax.random.normal(kx, (N, C_IN, H, W), dtype=jnp.float32)

    # Deterministic PyTorch-style uniform init for ConvTranspose2d params.
    fan = C_IN * K * K
    bound = 1.0 / (fan ** 0.5)
    weight = jax.random.uniform(kw, (C_IN, C_OUT, K, K), jnp.float32, -bound, bound)
    bias = jax.random.uniform(kb, (C_OUT,), jnp.float32, -bound, bound)

    # Parameter preprocessing happens once, at "init" time (hoisted out of forward).
    w_lane, bias_f32 = prepare_params(weight, bias, W)

    y = conv_transpose_sigmoid(x, w_lane, bias_f32)
    y = jax.block_until_ready(y)

    y_ref = reference(x, weight, bias)
    assert y.shape == (N, C_OUT, H + 1, W + 1)
    assert jnp.allclose(y, y_ref, atol=5e-5, rtol=5e-5)

    print("KERNEL_OK")
</pallas_src>

<mosaic_0001>
module attributes {stable_mosaic.version = 11 : i64} {
  func.func @convt_sigmoid_kernel(%arg0: memref<50x128xf32, #tpu.memory_space<vmem>>, %arg1: memref<2xf32, #tpu.memory_space<smem>>, %arg2: memref<2x3x16x16xf32, #tpu.memory_space<vmem>>, %arg3: memref<2x2x17x17xf32, #tpu.memory_space<vmem>>, %arg4: memref<21x132xf32, #tpu.memory_space<vmem>>) attributes {dimension_semantics = [], scalar_prefetch = 0 : i64, scratch_operands = 1 : i64, tpu.core_type = #tpu.core_type<tc>} {
    %cst = arith.constant 0.000000e+00 : f32
    %0 = vector.broadcast %cst : f32 to vector<21x132xf32>
    %c0 = arith.constant 0 : index
    %c0_0 = arith.constant 0 : index
    %1 = vector.load %arg4[%c0, %c0_0] : memref<21x132xf32, #tpu.memory_space<vmem>>, vector<21x132xf32>
    tpu.vector_store %arg4[%c0, %c0_0], %0 {strides = array<i32>} : memref<21x132xf32, #tpu.memory_space<vmem>>, vector<21x132xf32>,
    %c0_1 = arith.constant 0 : index
    %c0_2 = arith.constant 0 : index
    %c0_3 = arith.constant 0 : index
    %c0_4 = arith.constant 0 : index
    %2 = vector.load %arg2[%c0_1, %c0_2, %c0_3, %c0_4] : memref<2x3x16x16xf32, #tpu.memory_space<vmem>>, vector<1x1x16x16xf32>
    %3 = vector.shape_cast %2 : vector<1x1x16x16xf32> to vector<16x16xf32>
    %c2 = arith.constant 2 : index
    %c2_5 = arith.constant 2 : index
    %4 = vector.load %arg4[%c2, %c2_5] : memref<21x132xf32, #tpu.memory_space<vmem>>, vector<16x16xf32>
    tpu.vector_store %arg4[%c2, %c2_5], %3 {strides = array<i32>} : memref<21x132xf32, #tpu.memory_space<vmem>>, vector<16x16xf32>,
    %c0_6 = arith.constant 0 : index
    %c1 = arith.constant 1 : index
    %c0_7 = arith.constant 0 : index
    %c0_8 = arith.constant 0 : index
    %5 = vector.load %arg2[%c0_6, %c1, %c0_7, %c0_8] : memref<2x3x16x16xf32, #tpu.memory_space<vmem>>, vector<1x1x16x16xf32>
    %6 = vector.shape_cast %5 : vector<1x1x16x16xf32> to vector<16x16xf32>
    %c2_9 = arith.constant 2 : index
    %c23 = arith.constant 23 : index
    %7 = vector.load %arg4[%c2_9, %c23] : memref<21x132xf32, #tpu.memory_space<vmem>>, vector<16x16xf32>
    tpu.vector_store %arg4[%c2_9, %c23], %6 {strides = array<i32>} : memref<21x132xf32, #tpu.memory_space<vmem>>, vector<16x16xf32>,
    %c0_10 = arith.constant 0 : index
    %c2_11 = arith.constant 2 : index
    %c0_12 = arith.constant 0 : index
    %c0_13 = arith.constant 0 : index
    %8 = vector.load %arg2[%c0_10, %c2_11, %c0_12, %c0_13] : memref<2x3x16x16xf32, #tpu.memory_space<vmem>>, vector<1x1x16x16xf32>
    %9 = vector.shape_cast %8 : vector<1x1x16x16xf32> to vector<16x16xf32>
    %c2_14 = arith.constant 2 : index
    %c44 = arith.constant 44 : index
    %10 = vector.load %arg4[%c2_14, %c44] : memref<21x132xf32, #tpu.memory_space<vmem>>, vector<16x16xf32>
    tpu.vector_store %arg4[%c2_14, %c44], %9 {strides = array<i32>} : memref<21x132xf32, #tpu.memory_space<vmem>>, vector<16x16xf32>,
    %c1_15 = arith.constant 1 : index
    %c0_16 = arith.constant 0 : index
    %c0_17 = arith.constant 0 : index
    %c0_18 = arith.constant 0 : index
    %11 = vector.load %arg2[%c1_15, %c0_16, %c0_17, %c0_18] : memref<2x3x16x16xf32, #tpu.memory_space<vmem>>, vector<1x1x16x16xf32>
    %12 = vector.shape_cast %11 : vector<1x1x16x16xf32> to vector<16x16xf32>
    %c2_19 = arith.constant 2 : index
    %c65 = arith.constant 65 : index
    %13 = vector.load %arg4[%c2_19, %c65] : memref<21x132xf32, #tpu.memory_space<vmem>>, vector<16x16xf32>
    tpu.vector_store %arg4[%c2_19, %c65], %12 {strides = array<i32>} : memref<21x132xf32, #tpu.memory_space<vmem>>, vector<16x16xf32>,
    %c1_20 = arith.constant 1 : index
    %c1_21 = arith.constant 1 : index
    %c0_22 = arith.constant 0 : index
    %c0_23 = arith.constant 0 : index
    %14 = vector.load %arg2[%c1_20, %c1_21, %c0_22, %c0_23] : memref<2x3x16x16xf32, #tpu.memory_space<vmem>>, vector<1x1x16x16xf32>
    %15 = vector.shape_cast %14 : vector<1x1x16x16xf32> to vector<16x16xf32>
    %c2_24 = arith.constant 2 : index
    %c86 = arith.constant 86 : index
    %16 = vector.load %arg4[%c2_24, %c86] : memref<21x132xf32, #tpu.memory_space<vmem>>, vector<16x16xf32>
    tpu.vector_store %arg4[%c2_24, %c86], %15 {strides = array<i32>} : memref<21x132xf32, #tpu.memory_space<vmem>>, vector<16x16xf32>,
    %c1_25 = arith.constant 1 : index
    %c2_26 = arith.constant 2 : index
    %c0_27 = arith.constant 0 : index
    %c0_28 = arith.constant 0 : index
    %17 = vector.load %arg2[%c1_25, %c2_26, %c0_27, %c0_28] : memref<2x3x16x16xf32, #tpu.memory_space<vmem>>, vector<1x1x16x16xf32>
    %18 = vector.shape_cast %17 : vector<1x1x16x16xf32> to vector<16x16xf32>
    %c2_29 = arith.constant 2 : index
    %c107 = arith.constant 107 : index
    %19 = vector.load %arg4[%c2_29, %c107] : memref<21x132xf32, #tpu.memory_space<vmem>>, vector<16x16xf32>
    tpu.vector_store %arg4[%c2_29, %c107], %18 {strides = array<i32>} : memref<21x132xf32, #tpu.memory_space<vmem>>, vector<16x16xf32>,
    %c0_30 = arith.constant 0 : index
    %c0_31 = arith.constant 0 : index
    %20 = vector.load %arg4[%c0_30, %c0_31] : memref<21x132xf32, #tpu.memory_space<vmem>>, vector<21x132xf32>
    %cst_32 = arith.constant 0.000000e+00 : f32
    %21 = vector.broadcast %cst_32 : f32 to vector<17x128xf32>
    %cst_33 = arith.constant 0.000000e+00 : f32
    %22 = vector.broadcast %cst_33 : f32 to vector<17x128xf32>
    %23 = vector.extract_strided_slice %20 {offsets = [0, 0], sizes = [17, 128], strides = [1, 1]} : vector<21x132xf32> to vector<17x128xf32>
    %c0_34 = arith.constant 0 : index
    %c0_35 = arith.constant 0 : index
    %24 = vector.load %arg0[%c0_34, %c0_35] : memref<50x128xf32, #tpu.memory_space<vmem>>, vector<1x128xf32>
    %25 = vector.shape_cast %24 : vector<1x128xf32> to vector<128xf32>
    %26 = vector.shape_cast %25 : vector<128xf32> to vector<1x128xf32>
    %27 = vector.broadcast %26 : vector<1x128xf32> to vector<17x128xf32>
    %28 = arith.mulf %23, %27 : vector<17x128xf32>
    %29 = arith.addf %21, %28 : vector<17x128xf32>
    %c25 = arith.constant 25 : index
    %c0_36 = arith.constant 0 : index
    %30 = vector.load %arg0[%c25, %c0_36] : memref<50x128xf32, #tpu.memory_space<vmem>>, vector<1x128xf32>
    %31 = vector.shape_cast %30 : vector<1x128xf32> to vector<128xf32>
    %32 = vector.shape_cast %31 : vector<128xf32> to vector<1x128xf32>
    %33 = vector.broadcast %32 : vector<1x128xf32> to vector<17x128xf32>
    %34 = arith.mulf %23, %33 : vector<17x128xf32>
    %35 = arith.addf %22, %34 : vector<17x128xf32>
    %36 = vector.extract_strided_slice %20 {offsets = [0, 1], sizes = [17, 128], strides = [1, 1]} : vector<21x132xf32> to vector<17x128xf32>
    %c1_37 = arith.constant 1 : index
    %c0_38 = arith.constant 0 : index
    %37 = vector.load %arg0[%c1_37, %c0_38] : memref<50x128xf32, #tpu.memory_space<vmem>>, vector<1x128xf32>
    %38 = vector.shape_cast %37 : vector<1x128xf32> to vector<128xf32>
    %39 = vector.shape_cast %38 : vector<128xf32> to vector<1x128xf32>
    %40 = vector.broadcast %39 : vector<1x128xf32> to vector<17x128xf32>
    %41 = arith.mulf %36, %40 : vector<17x128xf32>
    %42 = arith.addf %29, %41 : vector<17x128xf32>
    %c26 = arith.constant 26 : index
    %c0_39 = arith.constant 0 : index
    %43 = vector.load %arg0[%c26, %c0_39] : memref<50x128xf32, #tpu.memory_space<vmem>>, vector<1x128xf32>
    %44 = vector.shape_cast %43 : vector<1x128xf32> to vector<128xf32>
    %45 = vector.shape_cast %44 : vector<128xf32> to vector<1x128xf32>
    %46 = vector.broadcast %45 : vector<1x128xf32> to vector<17x128xf32>
    %47 = arith.mulf %36, %46 : vector<17x128xf32>
    %48 = arith.addf %35, %47 : vector<17x128xf32>
    %49 = vector.extract_strided_slice %20 {offsets = [0, 2], sizes = [17, 128], strides = [1, 1]} : vector<21x132xf32> to vector<17x128xf32>
    %c2_40 = arith.constant 2 : index
    %c0_41 = arith.constant 0 : index
    %50 = vector.load %arg0[%c2_40, %c0_41] : memref<50x128xf32, #tpu.memory_space<vmem>>, vector<1x128xf32>
    %51 = vector.shape_cast %50 : vector<1x128xf32> to vector<128xf32>
    %52 = vector.shape_cast %51 : vector<128xf32> to vector<1x128xf32>
    %53 = vector.broadcast %52 : vector<1x128xf32> to vector<17x128xf32>
    %54 = arith.mulf %49, %53 : vector<17x128xf32>
    %55 = arith.addf %42, %54 : vector<17x128xf32>
    %c27 = arith.constant 27 : index
    %c0_42 = arith.constant 0 : index
    %56 = vector.load %arg0[%c27, %c0_42] : memref<50x128xf32, #tpu.memory_space<vmem>>, vector<1x128xf32>
    %57 = vector.shape_cast %56 : vector<1x128xf32> to vector<128xf32>
    %58 = vector.shape_cast %57 : vector<128xf32> to vector<1x128xf32>
    %59 = vector.broadcast %58 : vector<1x128xf32> to vector<17x128xf32>
    %60 = arith.mulf %49, %59 : vector<17x128xf32>
    %61 = arith.addf %48, %60 : vector<17x128xf32>
    %62 = vector.extract_strided_slice %20 {offsets = [0, 3], sizes = [17, 128], strides = [1, 1]} : vector<21x132xf32> to vector<17x128xf32>
    %c3 = arith.constant 3 : index
    %c0_43 = arith.constant 0 : index
    %63 = vector.load %arg0[%c3, %c0_43] : memref<50x128xf32, #tpu.memory_space<vmem>>, vector<1x128xf32>
    %64 = vector.shape_cast %63 : vector<1x128xf32> to vector<128xf32>
    %65 = vector.shape_cast %64 : vector<128xf32> to vector<1x128xf32>
    %66 = vector.broadcast %65 : vector<1x128xf32> to vector<17x128xf32>
    %67 = arith.mulf %62, %66 : vector<17x128xf32>
    %68 = arith.addf %55, %67 : vector<17x128xf32>
    %c28 = arith.constant 28 : index
    %c0_44 = arith.constant 0 : index
    %69 = vector.load %arg0[%c28, %c0_44] : memref<50x128xf32, #tpu.memory_space<vmem>>, vector<1x128xf32>
    %70 = vector.shape_cast %69 : vector<1x128xf32> to vector<128xf32>
    %71 = vector.shape_cast %70 : vector<128xf32> to vector<1x128xf32>
    %72 = vector.broadcast %71 : vector<1x128xf32> to vector<17x128xf32>
    %73 = arith.mulf %62, %72 : vector<17x128xf32>
    %74 = arith.addf %61, %73 : vector<17x128xf32>
    %75 = vector.extract_strided_slice %20 {offsets = [0, 4], sizes = [17, 128], strides = [1, 1]} : vector<21x132xf32> to vector<17x128xf32>
    %c4 = arith.constant 4 : index
    %c0_45 = arith.constant 0 : index
    %76 = vector.load %arg0[%c4, %c0_45] : memref<50x128xf32, #tpu.memory_space<vmem>>, vector<1x128xf32>
    %77 = vector.shape_cast %76 : vector<1x128xf32> to vector<128xf32>
    %78 = vector.shape_cast %77 : vector<128xf32> to vector<1x128xf32>
    %79 = vector.broadcast %78 : vector<1x128xf32> to vector<17x128xf32>
    %80 = arith.mulf %75, %79 : vector<17x128xf32>
    %81 = arith.addf %68, %80 : vector<17x128xf32>
    %c29 = arith.constant 29 : index
    %c0_46 = arith.constant 0 : index
    %82 = vector.load %arg0[%c29, %c0_46] : memref<50x128xf32, #tpu.memory_space<vmem>>, vector<1x128xf32>
    %83 = vector.shape_cast %82 : vector<1x128xf32> to vector<128xf32>
    %84 = vector.shape_cast %83 : vector<128xf32> to vector<1x128xf32>
    %85 = vector.broadcast %84 : vector<1x128xf32> to vector<17x128xf32>
    %86 = arith.mulf %75, %85 : vector<17x128xf32>
    %87 = arith.addf %74, %86 : vector<17x128xf32>
    %88 = vector.extract_strided_slice %20 {offsets = [1, 0], sizes = [17, 128], strides = [1, 1]} : vector<21x132xf32> to vector<17x128xf32>
    %c5 = arith.constant 5 : index
    %c0_47 = arith.constant 0 : index
    %89 = vector.load %arg0[%c5, %c0_47] : memref<50x128xf32, #tpu.memory_space<vmem>>, vector<1x128xf32>
    %90 = vector.shape_cast %89 : vector<1x128xf32> to vector<128xf32>
    %91 = vector.shape_cast %90 : vector<128xf32> to vector<1x128xf32>
    %92 = vector.broadcast %91 : vector<1x128xf32> to vector<17x128xf32>
    %93 = arith.mulf %88, %92 : vector<17x128xf32>
    %94 = arith.addf %81, %93 : vector<17x128xf32>
    %c30 = arith.constant 30 : index
    %c0_48 = arith.constant 0 : index
    %95 = vector.load %arg0[%c30, %c0_48] : memref<50x128xf32, #tpu.memory_space<vmem>>, vector<1x128xf32>
    %96 = vector.shape_cast %95 : vector<1x128xf32> to vector<128xf32>
    %97 = vector.shape_cast %96 : vector<128xf32> to vector<1x128xf32>
    %98 = vector.broadcast %97 : vector<1x128xf32> to vector<17x128xf32>
    %99 = arith.mulf %88, %98 : vector<17x128xf32>
    %100 = arith.addf %87, %99 : vector<17x128xf32>
    %101 = vector.extract_strided_slice %20 {offsets = [1, 1], sizes = [17, 128], strides = [1, 1]} : vector<21x132xf32> to vector<17x128xf32>
    %c6 = arith.constant 6 : index
    %c0_49 = arith.constant 0 : index
    %102 = vector.load %arg0[%c6, %c0_49] : memref<50x128xf32, #tpu.memory_space<vmem>>, vector<1x128xf32>
    %103 = vector.shape_cast %102 : vector<1x128xf32> to vector<128xf32>
    %104 = vector.shape_cast %103 : vector<128xf32> to vector<1x128xf32>
    %105 = vector.broadcast %104 : vector<1x128xf32> to vector<17x128xf32>
    %106 = arith.mulf %101, %105 : vector<17x128xf32>
    %107 = arith.addf %94, %106 : vector<17x128xf32>
    %c31 = arith.constant 31 : index
    %c0_50 = arith.constant 0 : index
    %108 = vector.load %arg0[%c31, %c0_50] : memref<50x128xf32, #tpu.memory_space<vmem>>, vector<1x128xf32>
    %109 = vector.shape_cast %108 : vector<1x128xf32> to vector<128xf32>
    %110 = vector.shape_cast %109 : vector<128xf32> to vector<1x128xf32>
    %111 = vector.broadcast %110 : vector<1x128xf32> to vector<17x128xf32>
    %112 = arith.mulf %101, %111 : vector<17x128xf32>
    %113 = arith.addf %100, %112 : vector<17x128xf32>
    %114 = vector.extract_strided_slice %20 {offsets = [1, 2], sizes = [17, 128], strides = [1, 1]} : vector<21x132xf32> to vector<17x128xf32>
    %c7 = arith.constant 7 : index
    %c0_51 = arith.constant 0 : index
    %115 = vector.load %arg0[%c7, %c0_51] : memref<50x128xf32, #tpu.memory_space<vmem>>, vector<1x128xf32>
    %116 = vector.shape_cast %115 : vector<1x128xf32> to vector<128xf32>
    %117 = vector.shape_cast %116 : vector<128xf32> to vector<1x128xf32>
    %118 = vector.broadcast %117 : vector<1x128xf32> to vector<17x128xf32>
    %119 = arith.mulf %114, %118 : vector<17x128xf32>
    %120 = arith.addf %107, %119 : vector<17x128xf32>
    %c32 = arith.constant 32 : index
    %c0_52 = arith.constant 0 : index
    %121 = vector.load %arg0[%c32, %c0_52] : memref<50x128xf32, #tpu.memory_space<vmem>>, vector<1x128xf32>
    %122 = vector.shape_cast %121 : vector<1x128xf32> to vector<128xf32>
    %123 = vector.shape_cast %122 : vector<128xf32> to vector<1x128xf32>
    %124 = vector.broadcast %123 : vector<1x128xf32> to vector<17x128xf32>
    %125 = arith.mulf %114, %124 : vector<17x128xf32>
    %126 = arith.addf %113, %125 : vector<17x128xf32>
    %127 = vector.extract_strided_slice %20 {offsets = [1, 3], sizes = [17, 128], strides = [1, 1]} : vector<21x132xf32> to vector<17x128xf32>
    %c8 = arith.constant 8 : index
    %c0_53 = arith.constant 0 : index
    %128 = vector.load %arg0[%c8, %c0_53] : memref<50x128xf32, #tpu.memory_space<vmem>>, vector<1x128xf32>
    %129 = vector.shape_cast %128 : vector<1x128xf32> to vector<128xf32>
    %130 = vector.shape_cast %129 : vector<128xf32> to vector<1x128xf32>
    %131 = vector.broadcast %130 : vector<1x128xf32> to vector<17x128xf32>
    %132 = arith.mulf %127, %131 : vector<17x128xf32>
    %133 = arith.addf %120, %132 : vector<17x128xf32>
    %c33 = arith.constant 33 : index
    %c0_54 = arith.constant 0 : index
    %134 = vector.load %arg0[%c33, %c0_54] : memref<50x128xf32, #tpu.memory_space<vmem>>, vector<1x128xf32>
    %135 = vector.shape_cast %134 : vector<1x128xf32> to vector<128xf32>
    %136 = vector.shape_cast %135 : vector<128xf32> to vector<1x128xf32>
    %137 = vector.broadcast %136 : vector<1x128xf32> to vector<17x128xf32>
    %138 = arith.mulf %127, %137 : vector<17x128xf32>
    %139 = arith.addf %126, %138 : vector<17x128xf32>
    %140 = vector.extract_strided_slice %20 {offsets = [1, 4], sizes = [17, 128], strides = [1, 1]} : vector<21x132xf32> to vector<17x128xf32>
    %c9 = arith.constant 9 : index
    %c0_55 = arith.constant 0 : index
    %141 = vector.load %arg0[%c9, %c0_55] : memref<50x128xf32, #tpu.memory_space<vmem>>, vector<1x128xf32>
    %142 = vector.shape_cast %141 : vector<1x128xf32> to vector<128xf32>
    %143 = vector.shape_cast %142 : vector<128xf32> to vector<1x128xf32>
    %144 = vector.broadcast %143 : vector<1x128xf32> to vector<17x128xf32>
    %145 = arith.mulf %140, %144 : vector<17x128xf32>
    %146 = arith.addf %133, %145 : vector<17x128xf32>
    %c34 = arith.constant 34 : index
    %c0_56 = arith.constant 0 : index
    %147 = vector.load %arg0[%c34, %c0_56] : memref<50x128xf32, #tpu.memory_space<vmem>>, vector<1x128xf32>
    %148 = vector.shape_cast %147 : vector<1x128xf32> to vector<128xf32>
    %149 = vector.shape_cast %148 : vector<128xf32> to vector<1x128xf32>
    %150 = vector.broadcast %149 : vector<1x128xf32> to vector<17x128xf32>
    %151 = arith.mulf %140, %150 : vector<17x128xf32>
    %152 = arith.addf %139, %151 : vector<17x128xf32>
    %153 = vector.extract_strided_slice %20 {offsets = [2, 0], sizes = [17, 128], strides = [1, 1]} : vector<21x132xf32> to vector<17x128xf32>
    %c10 = arith.constant 10 : index
    %c0_57 = arith.constant 0 : index
    %154 = vector.load %arg0[%c10, %c0_57] : memref<50x128xf32, #tpu.memory_space<vmem>>, vector<1x128xf32>
    %155 = vector.shape_cast %154 : vector<1x128xf32> to vector<128xf32>
    %156 = vector.shape_cast %155 : vector<128xf32> to vector<1x128xf32>
    %157 = vector.broadcast %156 : vector<1x128xf32> to vector<17x128xf32>
    %158 = arith.mulf %153, %157 : vector<17x128xf32>
    %159 = arith.addf %146, %158 : vector<17x128xf32>
    %c35 = arith.constant 35 : index
    %c0_58 = arith.constant 0 : index
    %160 = vector.load %arg0[%c35, %c0_58] : memref<50x128xf32, #tpu.memory_space<vmem>>, vector<1x128xf32>
    %161 = vector.shape_cast %160 : vector<1x128xf32> to vector<128xf32>
    %162 = vector.shape_cast %161 : vector<128xf32> to vector<1x128xf32>
    %163 = vector.broadcast %162 : vector<1x128xf32> to vector<17x128xf32>
    %164 = arith.mulf %153, %163 : vector<17x128xf32>
    %165 = arith.addf %152, %164 : vector<17x128xf32>
    %166 = vector.extract_strided_slice %20 {offsets = [2, 1], sizes = [17, 128], strides = [1, 1]} : vector<21x132xf32> to vector<17x128xf32>
    %c11 = arith.constant 11 : index
    %c0_59 = arith.constant 0 : index
    %167 = vector.load %arg0[%c11, %c0_59] : memref<50x128xf32, #tpu.memory_space<vmem>>, vector<1x128xf32>
    %168 = vector.shape_cast %167 : vector<1x128xf32> to vector<128xf32>
    %169 = vector.shape_cast %168 : vector<128xf32> to vector<1x128xf32>
    %170 = vector.broadcast %169 : vector<1x128xf32> to vector<17x128xf32>
    %171 = arith.mulf %166, %170 : vector<17x128xf32>
    %172 = arith.addf %159, %171 : vector<17x128xf32>
    %c36 = arith.constant 36 : index
    %c0_60 = arith.constant 0 : index
    %173 = vector.load %arg0[%c36, %c0_60] : memref<50x128xf32, #tpu.memory_space<vmem>>, vector<1x128xf32>
    %174 = vector.shape_cast %173 : vector<1x128xf32> to vector<128xf32>
    %175 = vector.shape_cast %174 : vector<128xf32> to vector<1x128xf32>
    %176 = vector.broadcast %175 : vector<1x128xf32> to vector<17x128xf32>
    %177 = arith.mulf %166, %176 : vector<17x128xf32>
    %178 = arith.addf %165, %177 : vector<17x128xf32>
    %179 = vector.extract_strided_slice %20 {offsets = [2, 2], sizes = [17, 128], strides = [1, 1]} : vector<21x132xf32> to vector<17x128xf32>
    %c12 = arith.constant 12 : index
    %c0_61 = arith.constant 0 : index
    %180 = vector.load %arg0[%c12, %c0_61] : memref<50x128xf32, #tpu.memory_space<vmem>>, vector<1x128xf32>
    %181 = vector.shape_cast %180 : vector<1x128xf32> to vector<128xf32>
    %182 = vector.shape_cast %181 : vector<128xf32> to vector<1x128xf32>
    %183 = vector.broadcast %182 : vector<1x128xf32> to vector<17x128xf32>
    %184 = arith.mulf %179, %183 : vector<17x128xf32>
    %185 = arith.addf %172, %184 : vector<17x128xf32>
    %c37 = arith.constant 37 : index
    %c0_62 = arith.constant 0 : index
    %186 = vector.load %arg0[%c37, %c0_62] : memref<50x128xf32, #tpu.memory_space<vmem>>, vector<1x128xf32>
    %187 = vector.shape_cast %186 : vector<1x128xf32> to vector<128xf32>
    %188 = vector.shape_cast %187 : vector<128xf32> to vector<1x128xf32>
    %189 = vector.broadcast %188 : vector<1x128xf32> to vector<17x128xf32>
    %190 = arith.mulf %179, %189 : vector<17x128xf32>
    %191 = arith.addf %178, %190 : vector<17x128xf32>
    %192 = vector.extract_strided_slice %20 {offsets = [2, 3], sizes = [17, 128], strides = [1, 1]} : vector<21x132xf32> to vector<17x128xf32>
    %c13 = arith.constant 13 : index
    %c0_63 = arith.constant 0 : index
    %193 = vector.load %arg0[%c13, %c0_63] : memref<50x128xf32, #tpu.memory_space<vmem>>, vector<1x128xf32>
    %194 = vector.shape_cast %193 : vector<1x128xf32> to vector<128xf32>
    %195 = vector.shape_cast %194 : vector<128xf32> to vector<1x128xf32>
    %196 = vector.broadcast %195 : vector<1x128xf32> to vector<17x128xf32>
    %197 = arith.mulf %192, %196 : vector<17x128xf32>
    %198 = arith.addf %185, %197 : vector<17x128xf32>
    %c38 = arith.constant 38 : index
    %c0_64 = arith.constant 0 : index
    %199 = vector.load %arg0[%c38, %c0_64] : memref<50x128xf32, #tpu.memory_space<vmem>>, vector<1x128xf32>
    %200 = vector.shape_cast %199 : vector<1x128xf32> to vector<128xf32>
    %201 = vector.shape_cast %200 : vector<128xf32> to vector<1x128xf32>
    %202 = vector.broadcast %201 : vector<1x128xf32> to vector<17x128xf32>
    %203 = arith.mulf %192, %202 : vector<17x128xf32>
    %204 = arith.addf %191, %203 : vector<17x128xf32>
    %205 = vector.extract_strided_slice %20 {offsets = [2, 4], sizes = [17, 128], strides = [1, 1]} : vector<21x132xf32> to vector<17x128xf32>
    %c14 = arith.constant 14 : index
    %c0_65 = arith.constant 0 : index
    %206 = vector.load %arg0[%c14, %c0_65] : memref<50x128xf32, #tpu.memory_space<vmem>>, vector<1x128xf32>
    %207 = vector.shape_cast %206 : vector<1x128xf32> to vector<128xf32>
    %208 = vector.shape_cast %207 : vector<128xf32> to vector<1x128xf32>
    %209 = vector.broadcast %208 : vector<1x128xf32> to vector<17x128xf32>
    %210 = arith.mulf %205, %209 : vector<17x128xf32>
    %211 = arith.addf %198, %210 : vector<17x128xf32>
    %c39 = arith.constant 39 : index
    %c0_66 = arith.constant 0 : index
    %212 = vector.load %arg0[%c39, %c0_66] : memref<50x128xf32, #tpu.memory_space<vmem>>, vector<1x128xf32>
    %213 = vector.shape_cast %212 : vector<1x128xf32> to vector<128xf32>
    %214 = vector.shape_cast %213 : vector<128xf32> to vector<1x128xf32>
    %215 = vector.broadcast %214 : vector<1x128xf32> to vector<17x128xf32>
    %216 = arith.mulf %205, %215 : vector<17x128xf32>
    %217 = arith.addf %204, %216 : vector<17x128xf32>
    %218 = vector.extract_strided_slice %20 {offsets = [3, 0], sizes = [17, 128], strides = [1, 1]} : vector<21x132xf32> to vector<17x128xf32>
    %c15 = arith.constant 15 : index
    %c0_67 = arith.constant 0 : index
    %219 = vector.load %arg0[%c15, %c0_67] : memref<50x128xf32, #tpu.memory_space<vmem>>, vector<1x128xf32>
    %220 = vector.shape_cast %219 : vector<1x128xf32> to vector<128xf32>
    %221 = vector.shape_cast %220 : vector<128xf32> to vector<1x128xf32>
    %222 = vector.broadcast %221 : vector<1x128xf32> to vector<17x128xf32>
    %223 = arith.mulf %218, %222 : vector<17x128xf32>
    %224 = arith.addf %211, %223 : vector<17x128xf32>
    %c40 = arith.constant 40 : index
    %c0_68 = arith.constant 0 : index
    %225 = vector.load %arg0[%c40, %c0_68] : memref<50x128xf32, #tpu.memory_space<vmem>>, vector<1x128xf32>
    %226 = vector.shape_cast %225 : vector<1x128xf32> to vector<128xf32>
    %227 = vector.shape_cast %226 : vector<128xf32> to vector<1x128xf32>
    %228 = vector.broadcast %227 : vector<1x128xf32> to vector<17x128xf32>
    %229 = arith.mulf %218, %228 : vector<17x128xf32>
    %230 = arith.addf %217, %229 : vector<17x128xf32>
    %231 = vector.extract_strided_slice %20 {offsets = [3, 1], sizes = [17, 128], strides = [1, 1]} : vector<21x132xf32> to vector<17x128xf32>
    %c16 = arith.constant 16 : index
    %c0_69 = arith.constant 0 : index
    %232 = vector.load %arg0[%c16, %c0_69] : memref<50x128xf32, #tpu.memory_space<vmem>>, vector<1x128xf32>
    %233 = vector.shape_cast %232 : vector<1x128xf32> to vector<128xf32>
    %234 = vector.shape_cast %233 : vector<128xf32> to vector<1x128xf32>
    %235 = vector.broadcast %234 : vector<1x128xf32> to vector<17x128xf32>
    %236 = arith.mulf %231, %235 : vector<17x128xf32>
    %237 = arith.addf %224, %236 : vector<17x128xf32>
    %c41 = arith.constant 41 : index
    %c0_70 = arith.constant 0 : index
    %238 = vector.load %arg0[%c41, %c0_70] : memref<50x128xf32, #tpu.memory_space<vmem>>, vector<1x128xf32>
    %239 = vector.shape_cast %238 : vector<1x128xf32> to vector<128xf32>
    %240 = vector.shape_cast %239 : vector<128xf32> to vector<1x128xf32>
    %241 = vector.broadcast %240 : vector<1x128xf32> to vector<17x128xf32>
    %242 = arith.mulf %231, %241 : vector<17x128xf32>
    %243 = arith.addf %230, %242 : vector<17x128xf32>
    %244 = vector.extract_strided_slice %20 {offsets = [3, 2], sizes = [17, 128], strides = [1, 1]} : vector<21x132xf32> to vector<17x128xf32>
    %c17 = arith.constant 17 : index
    %c0_71 = arith.constant 0 : index
    %245 = vector.load %arg0[%c17, %c0_71] : memref<50x128xf32, #tpu.memory_space<vmem>>, vector<1x128xf32>
    %246 = vector.shape_cast %245 : vector<1x128xf32> to vector<128xf32>
    %247 = vector.shape_cast %246 : vector<128xf32> to vector<1x128xf32>
    %248 = vector.broadcast %247 : vector<1x128xf32> to vector<17x128xf32>
    %249 = arith.mulf %244, %248 : vector<17x128xf32>
    %250 = arith.addf %237, %249 : vector<17x128xf32>
    %c42 = arith.constant 42 : index
    %c0_72 = arith.constant 0 : index
    %251 = vector.load %arg0[%c42, %c0_72] : memref<50x128xf32, #tpu.memory_space<vmem>>, vector<1x128xf32>
    %252 = vector.shape_cast %251 : vector<1x128xf32> to vector<128xf32>
    %253 = vector.shape_cast %252 : vector<128xf32> to vector<1x128xf32>
    %254 = vector.broadcast %253 : vector<1x128xf32> to vector<17x128xf32>
    %255 = arith.mulf %244, %254 : vector<17x128xf32>
    %256 = arith.addf %243, %255 : vector<17x128xf32>
    %257 = vector.extract_strided_slice %20 {offsets = [3, 3], sizes = [17, 128], strides = [1, 1]} : vector<21x132xf32> to vector<17x128xf32>
    %c18 = arith.constant 18 : index
    %c0_73 = arith.constant 0 : index
    %258 = vector.load %arg0[%c18, %c0_73] : memref<50x128xf32, #tpu.memory_space<vmem>>, vector<1x128xf32>
    %259 = vector.shape_cast %258 : vector<1x128xf32> to vector<128xf32>
    %260 = vector.shape_cast %259 : vector<128xf32> to vector<1x128xf32>
    %261 = vector.broadcast %260 : vector<1x128xf32> to vector<17x128xf32>
    %262 = arith.mulf %257, %261 : vector<17x128xf32>
    %263 = arith.addf %250, %262 : vector<17x128xf32>
    %c43 = arith.constant 43 : index
    %c0_74 = arith.constant 0 : index
    %264 = vector.load %arg0[%c43, %c0_74] : memref<50x128xf32, #tpu.memory_space<vmem>>, vector<1x128xf32>
    %265 = vector.shape_cast %264 : vector<1x128xf32> to vector<128xf32>
    %266 = vector.shape_cast %265 : vector<128xf32> to vector<1x128xf32>
    %267 = vector.broadcast %266 : vector<1x128xf32> to vector<17x128xf32>
    %268 = arith.mulf %257, %267 : vector<17x128xf32>
    %269 = arith.addf %256, %268 : vector<17x128xf32>
    %270 = vector.extract_strided_slice %20 {offsets = [3, 4], sizes = [17, 128], strides = [1, 1]} : vector<21x132xf32> to vector<17x128xf32>
    %c19 = arith.constant 19 : index
    %c0_75 = arith.constant 0 : index
    %271 = vector.load %arg0[%c19, %c0_75] : memref<50x128xf32, #tpu.memory_space<vmem>>, vector<1x128xf32>
    %272 = vector.shape_cast %271 : vector<1x128xf32> to vector<128xf32>
    %273 = vector.shape_cast %272 : vector<128xf32> to vector<1x128xf32>
    %274 = vector.broadcast %273 : vector<1x128xf32> to vector<17x128xf32>
    %275 = arith.mulf %270, %274 : vector<17x128xf32>
    %276 = arith.addf %263, %275 : vector<17x128xf32>
    %c44_76 = arith.constant 44 : index
    %c0_77 = arith.constant 0 : index
    %277 = vector.load %arg0[%c44_76, %c0_77] : memref<50x128xf32, #tpu.memory_space<vmem>>, vector<1x128xf32>
    %278 = vector.shape_cast %277 : vector<1x128xf32> to vector<128xf32>
    %279 = vector.shape_cast %278 : vector<128xf32> to vector<1x128xf32>
    %280 = vector.broadcast %279 : vector<1x128xf32> to vector<17x128xf32>
    %281 = arith.mulf %270, %280 : vector<17x128xf32>
    %282 = arith.addf %269, %281 : vector<17x128xf32>
    %283 = vector.extract_strided_slice %20 {offsets = [4, 0], sizes = [17, 128], strides = [1, 1]} : vector<21x132xf32> to vector<17x128xf32>
    %c20 = arith.constant 20 : index
    %c0_78 = arith.constant 0 : index
    %284 = vector.load %arg0[%c20, %c0_78] : memref<50x128xf32, #tpu.memory_space<vmem>>, vector<1x128xf32>
    %285 = vector.shape_cast %284 : vector<1x128xf32> to vector<128xf32>
    %286 = vector.shape_cast %285 : vector<128xf32> to vector<1x128xf32>
    %287 = vector.broadcast %286 : vector<1x128xf32> to vector<17x128xf32>
    %288 = arith.mulf %283, %287 : vector<17x128xf32>
    %289 = arith.addf %276, %288 : vector<17x128xf32>
    %c45 = arith.constant 45 : index
    %c0_79 = arith.constant 0 : index
    %290 = vector.load %arg0[%c45, %c0_79] : memref<50x128xf32, #tpu.memory_space<vmem>>, vector<1x128xf32>
    %291 = vector.shape_cast %290 : vector<1x128xf32> to vector<128xf32>
    %292 = vector.shape_cast %291 : vector<128xf32> to vector<1x128xf32>
    %293 = vector.broadcast %292 : vector<1x128xf32> to vector<17x128xf32>
    %294 = arith.mulf %283, %293 : vector<17x128xf32>
    %295 = arith.addf %282, %294 : vector<17x128xf32>
    %296 = vector.extract_strided_slice %20 {offsets = [4, 1], sizes = [17, 128], strides = [1, 1]} : vector<21x132xf32> to vector<17x128xf32>
    %c21 = arith.constant 21 : index
    %c0_80 = arith.constant 0 : index
    %297 = vector.load %arg0[%c21, %c0_80] : memref<50x128xf32, #tpu.memory_space<vmem>>, vector<1x128xf32>
    %298 = vector.shape_cast %297 : vector<1x128xf32> to vector<128xf32>
    %299 = vector.shape_cast %298 : vector<128xf32> to vector<1x128xf32>
    %300 = vector.broadcast %299 : vector<1x128xf32> to vector<17x128xf32>
    %301 = arith.mulf %296, %300 : vector<17x128xf32>
    %302 = arith.addf %289, %301 : vector<17x128xf32>
    %c46 = arith.constant 46 : index
    %c0_81 = arith.constant 0 : index
    %303 = vector.load %arg0[%c46, %c0_81] : memref<50x128xf32, #tpu.memory_space<vmem>>, vector<1x128xf32>
    %304 = vector.shape_cast %303 : vector<1x128xf32> to vector<128xf32>
    %305 = vector.shape_cast %304 : vector<128xf32> to vector<1x128xf32>
    %306 = vector.broadcast %305 : vector<1x128xf32> to vector<17x128xf32>
    %307 = arith.mulf %296, %306 : vector<17x128xf32>
    %308 = arith.addf %295, %307 : vector<17x128xf32>
    %309 = vector.extract_strided_slice %20 {offsets = [4, 2], sizes = [17, 128], strides = [1, 1]} : vector<21x132xf32> to vector<17x128xf32>
    %c22 = arith.constant 22 : index
    %c0_82 = arith.constant 0 : index
    %310 = vector.load %arg0[%c22, %c0_82] : memref<50x128xf32, #tpu.memory_space<vmem>>, vector<1x128xf32>
    %311 = vector.shape_cast %310 : vector<1x128xf32> to vector<128xf32>
    %312 = vector.shape_cast %311 : vector<128xf32> to vector<1x128xf32>
    %313 = vector.broadcast %312 : vector<1x128xf32> to vector<17x128xf32>
    %314 = arith.mulf %309, %313 : vector<17x128xf32>
    %315 = arith.addf %302, %314 : vector<17x128xf32>
    %c47 = arith.constant 47 : index
    %c0_83 = arith.constant 0 : index
    %316 = vector.load %arg0[%c47, %c0_83] : memref<50x128xf32, #tpu.memory_space<vmem>>, vector<1x128xf32>
    %317 = vector.shape_cast %316 : vector<1x128xf32> to vector<128xf32>
    %318 = vector.shape_cast %317 : vector<128xf32> to vector<1x128xf32>
    %319 = vector.broadcast %318 : vector<1x128xf32> to vector<17x128xf32>
    %320 = arith.mulf %309, %319 : vector<17x128xf32>
    %321 = arith.addf %308, %320 : vector<17x128xf32>
    %322 = vector.extract_strided_slice %20 {offsets = [4, 3], sizes = [17, 128], strides = [1, 1]} : vector<21x132xf32> to vector<17x128xf32>
    %c23_84 = arith.constant 23 : index
    %c0_85 = arith.constant 0 : index
    %323 = vector.load %arg0[%c23_84, %c0_85] : memref<50x128xf32, #tpu.memory_space<vmem>>, vector<1x128xf32>
    %324 = vector.shape_cast %323 : vector<1x128xf32> to vector<128xf32>
    %325 = vector.shape_cast %324 : vector<128xf32> to vector<1x128xf32>
    %326 = vector.broadcast %325 : vector<1x128xf32> to vector<17x128xf32>
    %327 = arith.mulf %322, %326 : vector<17x128xf32>
    %328 = arith.addf %315, %327 : vector<17x128xf32>
    %c48 = arith.constant 48 : index
    %c0_86 = arith.constant 0 : index
    %329 = vector.load %arg0[%c48, %c0_86] : memref<50x128xf32, #tpu.memory_space<vmem>>, vector<1x128xf32>
    %330 = vector.shape_cast %329 : vector<1x128xf32> to vector<128xf32>
    %331 = vector.shape_cast %330 : vector<128xf32> to vector<1x128xf32>
    %332 = vector.broadcast %331 : vector<1x128xf32> to vector<17x128xf32>
    %333 = arith.mulf %322, %332 : vector<17x128xf32>
    %334 = arith.addf %321, %333 : vector<17x128xf32>
    %335 = vector.extract_strided_slice %20 {offsets = [4, 4], sizes = [17, 128], strides = [1, 1]} : vector<21x132xf32> to vector<17x128xf32>
    %c24 = arith.constant 24 : index
    %c0_87 = arith.constant 0 : index
    %336 = vector.load %arg0[%c24, %c0_87] : memref<50x128xf32, #tpu.memory_space<vmem>>, vector<1x128xf32>
    %337 = vector.shape_cast %336 : vector<1x128xf32> to vector<128xf32>
    %338 = vector.shape_cast %337 : vector<128xf32> to vector<1x128xf32>
    %339 = vector.broadcast %338 : vector<1x128xf32> to vector<17x128xf32>
    %340 = arith.mulf %335, %339 : vector<17x128xf32>
    %341 = arith.addf %328, %340 : vector<17x128xf32>
    %c49 = arith.constant 49 : index
    %c0_88 = arith.constant 0 : index
    %342 = vector.load %arg0[%c49, %c0_88] : memref<50x128xf32, #tpu.memory_space<vmem>>, vector<1x128xf32>
    %343 = vector.shape_cast %342 : vector<1x128xf32> to vector<128xf32>
    %344 = vector.shape_cast %343 : vector<128xf32> to vector<1x128xf32>
    %345 = vector.broadcast %344 : vector<1x128xf32> to vector<17x128xf32>
    %346 = arith.mulf %335, %345 : vector<17x128xf32>
    %347 = arith.addf %334, %346 : vector<17x128xf32>
    %348 = vector.extract_strided_slice %341 {offsets = [0, 0], sizes = [17, 17], strides = [1, 1]} : vector<17x128xf32> to vector<17x17xf32>
    %349 = vector.extract_strided_slice %341 {offsets = [0, 21], sizes = [17, 17], strides = [1, 1]} : vector<17x128xf32> to vector<17x17xf32>
    %350 = arith.addf %348, %349 : vector<17x17xf32>
    %351 = vector.extract_strided_slice %341 {offsets = [0, 42], sizes = [17, 17], strides = [1, 1]} : vector<17x128xf32> to vector<17x17xf32>
    %352 = arith.addf %350, %351 : vector<17x17xf32>
    %c0_89 = arith.constant 0 : index
    %353 = memref.load %arg1[%c0_89] : memref<2xf32, #tpu.memory_space<smem>>
    %354 = vector.broadcast %353 : f32 to vector<17x17xf32>
    %355 = arith.addf %352, %354 : vector<17x17xf32>
    %cst_90 = arith.constant 5.000000e-01 : f32
    %356 = vector.broadcast %cst_90 : f32 to vector<17x17xf32>
    %357 = arith.mulf %356, %355 : vector<17x17xf32>
    %358 = math.tanh %357 : vector<17x17xf32>
    %cst_91 = arith.constant 1.000000e+00 : f32
    %359 = vector.broadcast %cst_91 : f32 to vector<17x17xf32>
    %360 = arith.addf %358, %359 : vector<17x17xf32>
    %cst_92 = arith.constant 5.000000e-01 : f32
    %361 = vector.broadcast %cst_92 : f32 to vector<17x17xf32>
    %362 = arith.mulf %361, %360 : vector<17x17xf32>
    %c0_93 = arith.constant 0 : index
    %c0_94 = arith.constant 0 : index
    %c0_95 = arith.constant 0 : index
    %c0_96 = arith.constant 0 : index
    %363 = vector.load %arg3[%c0_93, %c0_94, %c0_95, %c0_96] : memref<2x2x17x17xf32, #tpu.memory_space<vmem>>, vector<1x1x17x17xf32>
    %364 = vector.shape_cast %363 : vector<1x1x17x17xf32> to vector<17x17xf32>
    %365 = vector.shape_cast %362 : vector<17x17xf32> to vector<1x1x17x17xf32>
    tpu.vector_store %arg3[%c0_93, %c0_94, %c0_95, %c0_96], %365 {strides = array<i32>} : memref<2x2x17x17xf32, #tpu.memory_space<vmem>>, vector<1x1x17x17xf32>,
    %366 = vector.extract_strided_slice %347 {offsets = [0, 0], sizes = [17, 17], strides = [1, 1]} : vector<17x128xf32> to vector<17x17xf32>
    %367 = vector.extract_strided_slice %347 {offsets = [0, 21], sizes = [17, 17], strides = [1, 1]} : vector<17x128xf32> to vector<17x17xf32>
    %368 = arith.addf %366, %367 : vector<17x17xf32>
    %369 = vector.extract_strided_slice %347 {offsets = [0, 42], sizes = [17, 17], strides = [1, 1]} : vector<17x128xf32> to vector<17x17xf32>
    %370 = arith.addf %368, %369 : vector<17x17xf32>
    %c1_97 = arith.constant 1 : index
    %371 = memref.load %arg1[%c1_97] : memref<2xf32, #tpu.memory_space<smem>>
    %372 = vector.broadcast %371 : f32 to vector<17x17xf32>
    %373 = arith.addf %370, %372 : vector<17x17xf32>
    %cst_98 = arith.constant 5.000000e-01 : f32
    %374 = vector.broadcast %cst_98 : f32 to vector<17x17xf32>
    %375 = arith.mulf %374, %373 : vector<17x17xf32>
    %376 = math.tanh %375 : vector<17x17xf32>
    %cst_99 = arith.constant 1.000000e+00 : f32
    %377 = vector.broadcast %cst_99 : f32 to vector<17x17xf32>
    %378 = arith.addf %376, %377 : vector<17x17xf32>
    %cst_100 = arith.constant 5.000000e-01 : f32
    %379 = vector.broadcast %cst_100 : f32 to vector<17x17xf32>
    %380 = arith.mulf %379, %378 : vector<17x17xf32>
    %c0_101 = arith.constant 0 : index
    %c1_102 = arith.constant 1 : index
    %c0_103 = arith.constant 0 : index
    %c0_104 = arith.constant 0 : index
    %381 = vector.load %arg3[%c0_101, %c1_102, %c0_103, %c0_104] : memref<2x2x17x17xf32, #tpu.memory_space<vmem>>, vector<1x1x17x17xf32>
    %382 = vector.shape_cast %381 : vector<1x1x17x17xf32> to vector<17x17xf32>
    %383 = vector.shape_cast %380 : vector<17x17xf32> to vector<1x1x17x17xf32>
    tpu.vector_store %arg3[%c0_101, %c1_102, %c0_103, %c0_104], %383 {strides = array<i32>} : memref<2x2x17x17xf32, #tpu.memory_space<vmem>>, vector<1x1x17x17xf32>,
    %384 = vector.extract_strided_slice %341 {offsets = [0, 63], sizes = [17, 17], strides = [1, 1]} : vector<17x128xf32> to vector<17x17xf32>
    %385 = vector.extract_strided_slice %341 {offsets = [0, 84], sizes = [17, 17], strides = [1, 1]} : vector<17x128xf32> to vector<17x17xf32>
    %386 = arith.addf %384, %385 : vector<17x17xf32>
    %387 = vector.extract_strided_slice %341 {offsets = [0, 105], sizes = [17, 17], strides = [1, 1]} : vector<17x128xf32> to vector<17x17xf32>
    %388 = arith.addf %386, %387 : vector<17x17xf32>
    %c0_105 = arith.constant 0 : index
    %389 = memref.load %arg1[%c0_105] : memref<2xf32, #tpu.memory_space<smem>>
    %390 = vector.broadcast %389 : f32 to vector<17x17xf32>
    %391 = arith.addf %388, %390 : vector<17x17xf32>
    %cst_106 = arith.constant 5.000000e-01 : f32
    %392 = vector.broadcast %cst_106 : f32 to vector<17x17xf32>
    %393 = arith.mulf %392, %391 : vector<17x17xf32>
    %394 = math.tanh %393 : vector<17x17xf32>
    %cst_107 = arith.constant 1.000000e+00 : f32
    %395 = vector.broadcast %cst_107 : f32 to vector<17x17xf32>
    %396 = arith.addf %394, %395 : vector<17x17xf32>
    %cst_108 = arith.constant 5.000000e-01 : f32
    %397 = vector.broadcast %cst_108 : f32 to vector<17x17xf32>
    %398 = arith.mulf %397, %396 : vector<17x17xf32>
    %c1_109 = arith.constant 1 : index
    %c0_110 = arith.constant 0 : index
    %c0_111 = arith.constant 0 : index
    %c0_112 = arith.constant 0 : index
    %399 = vector.load %arg3[%c1_109, %c0_110, %c0_111, %c0_112] : memref<2x2x17x17xf32, #tpu.memory_space<vmem>>, vector<1x1x17x17xf32>
    %400 = vector.shape_cast %399 : vector<1x1x17x17xf32> to vector<17x17xf32>
    %401 = vector.shape_cast %398 : vector<17x17xf32> to vector<1x1x17x17xf32>
    tpu.vector_store %arg3[%c1_109, %c0_110, %c0_111, %c0_112], %401 {strides = array<i32>} : memref<2x2x17x17xf32, #tpu.memory_space<vmem>>, vector<1x1x17x17xf32>,
    %402 = vector.extract_strided_slice %347 {offsets = [0, 63], sizes = [17, 17], strides = [1, 1]} : vector<17x128xf32> to vector<17x17xf32>
    %403 = vector.extract_strided_slice %347 {offsets = [0, 84], sizes = [17, 17], strides = [1, 1]} : vector<17x128xf32> to vector<17x17xf32>
    %404 = arith.addf %402, %403 : vector<17x17xf32>
    %405 = vector.extract_strided_slice %347 {offsets = [0, 105], sizes = [17, 17], strides = [1, 1]} : vector<17x128xf32> to vector<17x17xf32>
    %406 = arith.addf %404, %405 : vector<17x17xf32>
    %c1_113 = arith.constant 1 : index
    %407 = memref.load %arg1[%c1_113] : memref<2xf32, #tpu.memory_space<smem>>
    %408 = vector.broadcast %407 : f32 to vector<17x17xf32>
    %409 = arith.addf %406, %408 : vector<17x17xf32>
    %cst_114 = arith.constant 5.000000e-01 : f32
    %410 = vector.broadcast %cst_114 : f32 to vector<17x17xf32>
    %411 = arith.mulf %410, %409 : vector<17x17xf32>
    %412 = math.tanh %411 : vector<17x17xf32>
    %cst_115 = arith.constant 1.000000e+00 : f32
    %413 = vector.broadcast %cst_115 : f32 to vector<17x17xf32>
    %414 = arith.addf %412, %413 : vector<17x17xf32>
    %cst_116 = arith.constant 5.000000e-01 : f32
    %415 = vector.broadcast %cst_116 : f32 to vector<17x17xf32>
    %416 = arith.mulf %415, %414 : vector<17x17xf32>
    %c1_117 = arith.constant 1 : index
    %c1_118 = arith.constant 1 : index
    %c0_119 = arith.constant 0 : index
    %c0_120 = arith.constant 0 : index
    %417 = vector.load %arg3[%c1_117, %c1_118, %c0_119, %c0_120] : memref<2x2x17x17xf32, #tpu.memory_space<vmem>>, vector<1x1x17x17xf32>
    %418 = vector.shape_cast %417 : vector<1x1x17x17xf32> to vector<17x17xf32>
    %419 = vector.shape_cast %416 : vector<17x17xf32> to vector<1x1x17x17xf32>
    tpu.vector_store %arg3[%c1_117, %c1_118, %c0_119, %c0_120], %419 {strides = array<i32>} : memref<2x2x17x17xf32, #tpu.memory_space<vmem>>, vector<1x1x17x17xf32>,
    return
  }
}

</mosaic_0001>

<bundles_post_ra>
// kernel: tpu_custom_call.1
= control target key start
LH: loop header
LB: loop body
LE: loop exit
PB: predicated region body
PF: predicated region fallthrough
CT: control target
= control target key end

     0   :  { %8 = vsyncpa [#allocation4], 0  ;;  %s4553_s0 = inlined_call_operand.hbm [shape: f32[50,128], index: 0, kind: input, shape index: {}]   ;;  %s4554_s1 = inlined_call_operand.vmem [shape: f32[2], index: 1, kind: input, shape index: {}]   ;;  %s4555_s2 = inlined_call_operand.hbm [shape: f32[2,3,16,16], index: 2, kind: input, shape index: {}]   ;;  %s4556_s3 = inlined_call_operand.vmem [shape: f32[2,2,17,17], index: 3, kind: output, shape index: {}]  }
   0x1   :  { %9 = vsyncpa [#allocation5], 0 }
   0x2   :  { %10 = vsyncpa [#allocation8], 0  ;;  %s2749_s12 = smov [#allocation3]   ;;  %s29_s16 = sshll.u32 %s4554_s1, 4  ;;  %s30_s16 = int_to_ptr.vmem [resolvable:$true] %s29_s16 }
   0x3   :  { %s16_s13 = sshll.u32 %s2749_s12, 4  ;;  %s2687_s19 = scalar_lea.hbm %s4553_s0, 896  ;;  %s17_s13 = int_to_ptr.vmem [resolvable:$true] %s16_s13 }
   0x4   :  { %p2688_p0 = scmp.ne.s32.totalorder %s4553_s0, %s2687_s19  ;;  %p2691_p1 = scmp.lt.u32.totalorder %s2687_s19, %s4553_s0 }
   0x6   :  { %p2693_p2 = pnand %p2691_p1, %p2688_p0 }
   0x8   :  { %2696 = shalt.err (!%p2693_p2)
}
   0x9   :  { %s2697_s24 = scalar_lea.vmem %s17_s13, 896  ;;  %p2702_p4 = scmp.lt.s32.totalorder %s17_s13, %s17_s13 }
   0xa   :  { %p2698_p3 = scmp.ne.s32.totalorder %s17_s13, %s2697_s24  ;;  %p2703_p5 = scmp.lt.s32.totalorder %s2697_s24, %s2697_s24 }
   0xc   :  { %p2704_p6 = por %p2703_p5, %p2702_p4 }
   0xe   :  { %p2705_p7 = pnand %p2704_p6, %p2698_p3 }
  0x10   :  { %2708 = shalt.err (!%p2705_p7)
}
  0x11   :  { %s2750_s1 = smov 128   ;;  %s2751_s25 = smov 8  }
  0x12   :  { %22 = dma.hbm_to_vmem [thread:$0]  %s4553_s0, 896, %s17_s13, [#allocation4], %s2750_s1, %s2750_s1, %s2751_s25  }
  0x13   :  { %s2709_s28 = scalar_lea.vmem %s30_s16, 16  ;;  %p2714_p9 = scmp.lt.s32.totalorder %s30_s16, %s30_s16 }
  0x14   :  { %p2710_p8 = scmp.ne.s32.totalorder %s30_s16, %s2709_s28  ;;  %p2715_p10 = scmp.lt.s32.totalorder %s2709_s28, %s2709_s28 }
  0x16   :  { %p2716_p11 = por %p2715_p10, %p2714_p9 }
  0x18   :  { %p2717_p12 = pnand %p2716_p11, %p2710_p8 }
  0x1a   :  { %2720 = shalt.err (!%p2717_p12)
}
  0x1b   :  { %s2752_s29 = smov [#allocation6]   ;;  %s2753_s30 = smov [#allocation7]  }
  0x1c   :  { %32 = dma.vmem_to_smem %s30_s16, 16, %s2752_s29, [#allocation5]  }
  0x1d   :  { %s38_s4 = sshll.u32 %s2753_s30, 4  ;;  %s2721_s7 = scalar_lea.hbm %s4555_s2, 1536  ;;  %s39_s4 = int_to_ptr.vmem [resolvable:$true] %s38_s4 }
  0x1e   :  { %p2722_p13 = scmp.ne.s32.totalorder %s4555_s2, %s2721_s7  ;;  %p2725_p0 = scmp.lt.u32.totalorder %s2721_s7, %s4555_s2 }
  0x20   :  { %p2727_p1 = pnand %p2725_p0, %p2722_p13 }
  0x22   :  { %2730 = shalt.err (!%p2727_p1)
}
  0x23   :  { %s2731_s11 = scalar_lea.vmem %s39_s4, 1536  ;;  %p2736_p3 = scmp.lt.s32.totalorder %s39_s4, %s39_s4 }
  0x24   :  { %p2732_p2 = scmp.ne.s32.totalorder %s39_s4, %s2731_s11  ;;  %p2737_p4 = scmp.lt.s32.totalorder %s2731_s11, %s2731_s11 }
  0x26   :  { %p2738_p5 = por %p2737_p4, %p2736_p3 }
  0x28   :  { %p2739_p6 = pnand %p2738_p5, %p2732_p2 }
  0x2a   :  { %2742 = shalt.err (!%p2739_p6)
}
  0x2b   :  { %44 = dma.hbm_to_vmem [thread:$0]  %s4555_s2, 1536, %s39_s4, [#allocation8], %s2750_s1, %s2750_s1, %s2751_s25  }
  0x2c   :  { %2743 = dma.done.wait [#allocation4], 896  }
  0x2d   :  { %2744 = vsyncadd [#allocation4], 4294966400 }
  0x2e   :  { %2745 = dma.done.wait [#allocation5], 16  }
  0x2f   :  { %2746 = vsyncadd [#allocation5], 4294967280 }
  0x30   :  { %2747 = dma.done.wait [#allocation8], 1536  }
  0x31   :  { %2748 = vsyncadd [#allocation8], 4294965760 }
  0x32   :  { %54 = sfence }
  0x33   :  { %v64_v0 = vld [vmem:[#allocation7 + $0x8] sm:$0xff]  ;;  %v63_v1 = vld [vmem:[#allocation7] sm:$0xff]  ;;  %v87_v2 = vld [vmem:[#allocation7 + $0x10] sm:$0xff]  ;;  %vm67_vm0 = vcmask 1041408   ;;  %s2754_s14 = smov 2   ;;  %s2755_s2 = smov 23  }
  0x34   :  { %v69_v3 = vrot.slane %v64_v0, 6  ;;  %v68_v4 = vrot.slane %v63_v1, 6  ;;  %v88_v5 = vld [vmem:[#allocation7 + $0x18] sm:$0xff]  ;;  %v91_v6 = vrot.slane %v87_v2, 6  ;;  %v110_v9 = vld [vmem:[#allocation7 + $0x20] sm:$0xff]  ;;  %v111_v10 = vld [vmem:[#allocation7 + $0x28] sm:$0xff] }
  0x35   :  { %v92_v8 = vrot.slane %v88_v5, 6  ;;  %v114_v11 = vrot.slane %v110_v9, 6  ;;  %v115_v12 = vrot.slane %v111_v10, 6  ;;  %vm56_vm1 = vcmask 31744   ;;  %v133_v16 = vld [vmem:[#allocation7 + $0x30] sm:$0xff]  ;;  %v134_v17 = vld [vmem:[#allocation7 + $0x38] sm:$0xff] }
  0x36   :  { %75 = vrot.lane.b32.xlu1 %v69_v3, %s2754_s14  ;;  %71 = vrot.lane.b32.xlu0 %v68_v4, %s2754_s14  ;;  %v70_v7 = vsel %vm67_vm0, %v68_v4, %v69_v3  ;;  %vm61_vm2 = vcmask 28672   ;;  %v2756_v14 = vmov 0.0   ;;  %s2757_s15 = smov 44   ;;  %v137_v18 = vrot.slane %v133_v16, 6  ;;  %v156_v20 = vld [vmem:[#allocation7 + $0x40] sm:$0xff]  ;;  %v157_v21 = vld [vmem:[#allocation7 + $0x48] sm:$0xff] }
  0x37   :  { %v93_v13 = vsel %vm67_vm0, %v91_v6, %v92_v8  ;;  %57 = vst.msk [vmem:[#allocation2 + $0x8] sm:$0xff] %vm56_vm1, %v2756_v14  ;;  %59 = vst.msk [vmem:[#allocation2 + $0x18] sm:$0xff] %vm56_vm1, %v2756_v14  ;;  %v116_v15 = vsel %vm67_vm0, %v114_v11, %v115_v12  ;;  %v138_v19 = vrot.slane %v134_v17, 6  ;;  %s2758_s16 = smov 65   ;;  %v160_v23 = vrot.slane %v156_v20, 6  ;;  %v179_v26 = vld [vmem:[#allocation7 + $0x50] sm:$0xff] }
  0x38   :  { %60 = vst [vmem:[#allocation2 + $0x20] sm:$0x1f] %v2756_v14  ;;  %62 = vst.msk [vmem:[#allocation2 + $0x28] sm:$0x1f] %vm61_vm2, %v2756_v14  ;;  %v161_v24 = vrot.slane %v157_v21, 6  ;;  %v180_v27 = vld [vmem:[#allocation7 + $0x58] sm:$0xff] }
  0x39   :  { %55 = vst [vmem:[#allocation2] sm:$0xff] %v2756_v14  ;;  %58 = vst [vmem:[#allocation2 + $0x10] sm:$0xff] %v2756_v14  ;;  %v139_v22 = vsel %vm67_vm0, %v137_v18, %v138_v19  ;;  %s2759_s17 = smov 86   ;;  %v183_v28 = vrot.slane %v179_v26, 6  ;;  %v184_v29 = vrot.slane %v180_v27, 6  ;;  %s2760_s18 = smov 107  }
  0x3a   :  { %94 = vrot.lane.b32.xlu1 %v91_v6, %s2755_s2  ;;  %73 = vrot.lane.b32.xlu0 %v70_v7, %s2754_s14  ;;  %v162_v25 = vsel %vm67_vm0, %v160_v23, %v161_v24  ;;  %v2586_v31 = vld [vmem:[#allocation3 + $0x1a] ss:$0 sm:$0xff]  ;;  %v2585_v32 = vld [vmem:[#allocation3 + $0x1] ss:$0 sm:$0xff]  ;;  %s2761_s19 = smov 1   ;;  %s2762_s20 = smov 3  }
  0x3b   :  { %v185_v30 = vsel %vm67_vm0, %v183_v28, %v184_v29  ;;  %v2588_v33 = vld [vmem:[#allocation3 + $0x1b] ss:$0 sm:$0xff]  ;;  %v2587_v34 = vld [vmem:[#allocation3 + $0x2] ss:$0 sm:$0xff]  ;;  %v2590_v35 = vld [vmem:[#allocation3 + $0x1c] ss:$0 sm:$0xff] }
  0x3c   :  { %v2589_v36 = vld [vmem:[#allocation3 + $0x3] ss:$0 sm:$0xff]  ;;  %v2592_v37 = vld [vmem:[#allocation3 + $0x1d] ss:$0 sm:$0xff]  ;;  %v2591_v38 = vld [vmem:[#allocation3 + $0x4] ss:$0 sm:$0xff] }
  0x3d   :  { %s2763_s21 = smov 4   ;;  %vm84_vm3 = vcmask 140304   ;;  %vm80_vm4 = vcmask 146450   ;;  %vm103_vm5 = vcmask 318650   ;;  %vm82_vm6 = vcmask 146448   ;;  %s2764_s22 = smov 127  }
  0x3e   :  { %98 = vrot.lane.b32.xlu1 %v92_v8, %s2755_s2  ;;  %96 = vrot.lane.b32.xlu0 %v93_v13, %s2755_s2  ;;  %vm107_vm7 = vcmask 312504   ;;  %vm105_vm8 = vcmask 318648   ;;  %vm128_vm9 = vcmask 490848   ;;  %vm126_vm10 = vcmask 490850   ;;  %v2847_v57 = vld [vmem:[#allocation2 + $0x8] sm:$0xff]  ;;  %v2857_v62 = vld [vmem:[#allocation2 + $0x18] sm:$0xff] }
  0x3f   :  { %vm149_vm11 = vcmask 663050   ;;  %vm130_vm12 = vcmask 484704   ;;  %vm153_vm13 = vcmask 656904   ;;  %vm151_vm14 = vcmask 663048   ;;  %v2865_v1 = vld [vmem:[#allocation2 + $0x28] sm:$0x1f] }
  0x40   :  { %vm174_vm15 = vcmask 835248   ;;  %vm172_vm0 = vcmask 835250   ;;  %vm195_vm1 = vcmask 1007450   ;;  %vm176_vm2 = vcmask 829104   ;;  %s2765_s23 = smov 126   ;;  %s2766_s24 = smov 125  }
  0x41   :  { %s2767_s1 = smov 124   ;;  %s2440_s25 = sld [smem:[#allocation6]] }
  0x42   :  { %119 = vrot.lane.b32.xlu1 %v116_v15, %s2757_s15  ;;  %117 = vrot.lane.b32.xlu0 %v114_v11, %s2757_s15  ;;  %s2633_s26 = sld [smem:[#allocation6 + $0x1]] }
  0x46   :  { %140 = vrot.lane.b32.xlu1 %v137_v18, %s2758_s16  ;;  %121 = vrot.lane.b32.xlu0 %v115_v12, %s2757_s15 }
  0x4a   :  { %144 = vrot.lane.b32.xlu1 %v138_v19, %s2758_s16  ;;  %142 = vrot.lane.b32.xlu0 %v139_v22, %s2758_s16 }
  0x4e   :  { %165 = vrot.lane.b32.xlu1 %v162_v25, %s2759_s17  ;;  %163 = vrot.lane.b32.xlu0 %v160_v23, %s2759_s17 }
  0x52   :  { %186 = vrot.lane.b32.xlu1 %v183_v28, %s2760_s18  ;;  %167 = vrot.lane.b32.xlu0 %v161_v24, %s2759_s17 }
  0x56   :  { %190 = vrot.lane.b32.xlu1 %v184_v29, %s2760_s18  ;;  %188 = vrot.lane.b32.xlu0 %v185_v30, %s2760_s18 }
  0x5a   :  { %278 = vrot.lane.b32.xlu1 %v2586_v31, %s2761_s19  ;;  %235 = vrot.lane.b32.xlu0 %v2585_v32, %s2761_s19 }
  0x5e   :  { %363 = vrot.lane.b32.xlu1 %v2588_v33, %s2754_s14  ;;  %320 = vrot.lane.b32.xlu0 %v2587_v34, %s2754_s14 }
  0x62   :  { %448 = vrot.lane.b32.xlu1 %v2590_v35, %s2762_s20  ;;  %405 = vrot.lane.b32.xlu0 %v2589_v36, %s2762_s20 }
  0x66   :  { %533 = vrot.lane.b32.xlu1 %v2592_v37, %s2763_s21  ;;  %490 = vrot.lane.b32.xlu0 %v2591_v38, %s2763_s21 }
  0xa8   :  { %v76_v39 = vpop.permute.xlu1 %75  ;;  %v72_v40 = vpop.permute.xlu0 %71 }
  0xa9   :  { %85 = vst.msk [vmem:[#allocation2 + $0x20] sm:$0x3] %vm84_vm3, %v76_v39  ;;  %vm199_vm3 = vcmask 1001304  }
  0xaa   :  { %81 = vst.msk [vmem:[#allocation2] sm:$0xfc] %vm80_vm4, %v72_v40  ;;  %vm197_vm4 = vcmask 1007448  }
  0xac   :  { %v95_v41 = vpop.permute.xlu1 %94  ;;  %v74_v42 = vpop.permute.xlu0 %73 }
  0xad   :  { %104 = vst.msk [vmem:[#allocation2] sm:$0xfc] %vm103_vm5, %v95_v41  ;;  %vm580_vm5 = vcmask 1046528  }
  0xae   :  { %83 = vst.msk [vmem:[#allocation2 + $0x10] sm:$0xff] %vm82_vm6, %v74_v42  ;;  %vm1041_vm6 = vcmask 1045504  }
  0xb0   :  { %v99_v43 = vpop.permute.xlu1 %98  ;;  %v97_v44 = vpop.permute.xlu0 %96 }
  0xb1   :  { %108 = vst.msk [vmem:[#allocation2 + $0x20] sm:$0x3] %vm107_vm7, %v99_v43  ;;  %vm1502_vm7 = vcmask 1044480  }
  0xb2   :  { %106 = vst.msk [vmem:[#allocation2 + $0x10] sm:$0xff] %vm105_vm8, %v97_v44  ;;  %vm1963_vm8 = vcmask 1043456  }
  0xb4   :  { %v120_v45 = vpop.permute.xlu1 %119  ;;  %v118_v46 = vpop.permute.xlu0 %117 }
  0xb5   :  { %129 = vst.msk [vmem:[#allocation2 + $0x10] sm:$0xff] %vm128_vm9, %v120_v45  ;;  %vm262_vm9 = vcmask 1039360  }
  0xb6   :  { %127 = vst.msk [vmem:[#allocation2] sm:$0xfc] %vm126_vm10, %v118_v46  ;;  %vm347_vm10 = vcmask 1031168  }
  0xb8   :  { %v141_v47 = vpop.permute.xlu1 %140  ;;  %v122_v48 = vpop.permute.xlu0 %121 }
  0xb9   :  { %150 = vst.msk [vmem:[#allocation2] sm:$0xfc] %vm149_vm11, %v141_v47  ;;  %vm432_vm11 = vcmask 1022976  }
  0xba   :  { %131 = vst.msk [vmem:[#allocation2 + $0x20] sm:$0x3] %vm130_vm12, %v122_v48  ;;  %vm517_vm12 = vcmask 1014784  }
  0xbc   :  { %v145_v49 = vpop.permute.xlu1 %144  ;;  %v143_v50 = vpop.permute.xlu0 %142 }
  0xbd   :  { %154 = vst.msk [vmem:[#allocation2 + $0x20] sm:$0x3] %vm153_vm13, %v145_v49  ;;  %vm2457_vm13 = vcmask 138240  }
  0xbe   :  { %152 = vst.msk [vmem:[#allocation2 + $0x10] sm:$0xff] %vm151_vm14, %v143_v50  ;;  %vm2460_vm14 = vcmask 131072  }
  0xc0   :  { %v166_v51 = vpop.permute.xlu1 %165  ;;  %v164_v52 = vpop.permute.xlu0 %163 }
  0xc1   :  { %175 = vst.msk [vmem:[#allocation2 + $0x10] sm:$0xff] %vm174_vm15, %v166_v51 }
  0xc2   :  { %173 = vst.msk [vmem:[#allocation2] sm:$0xfc] %vm172_vm0, %v164_v52 }
  0xc4   :  { %v187_v53 = vpop.permute.xlu1 %186  ;;  %v168_v54 = vpop.permute.xlu0 %167 }
  0xc5   :  { %196 = vst.msk [vmem:[#allocation2] sm:$0xfc] %vm195_vm1, %v187_v53 }
  0xc6   :  { %177 = vst.msk [vmem:[#allocation2 + $0x20] sm:$0x3] %vm176_vm2, %v168_v54 }
  0xc8   :  { %v191_v55 = vpop.permute.xlu1 %190  ;;  %v189_v56 = vpop.permute.xlu0 %188 }
  0xc9   :  { %200 = vst.msk [vmem:[#allocation2 + $0x20] sm:$0x3] %vm199_vm3, %v191_v55  ;;  %v2595_v55 = vld [vmem:[#allocation3 + $0x6] ss:$0 sm:$0xff] }
  0xca   :  { %198 = vst.msk [vmem:[#allocation2 + $0x10] sm:$0xff] %vm197_vm4, %v189_v56 }
  0xcc   :  { %v2849_v58 = vpop.permute.xlu1 %278  ;;  %v2851_v59 = vpop.permute.xlu0 %235  ;;  %v2912_v20 = vld [vmem:[#allocation2] sm:$0xff] }
  0xcd   :  { %v282_v60 = vmul.f32 %v2849_v58, %v2847_v57  ;;  %v239_v61 = vmul.f32 %v2851_v59, %v2847_v57  ;;  %v284_v63 = vmul.f32 %v2849_v58, %v2857_v62  ;;  %v241_v0 = vmul.f32 %v2851_v59, %v2857_v62 }
  0xce   :  { %v286_v2 = vmul.f32 %v2849_v58, %v2865_v1  ;;  %v243_v3 = vmul.f32 %v2851_v59, %v2865_v1  ;;  %v238_v23 = vmul.f32 %v2851_v59, %v2912_v20  ;;  %v281_v29 = vmul.f32 %v2849_v58, %v2912_v20 }
  0xcf   :  { %295 = vrot.lane.b32.xlu1 %v282_v60, %s2764_s22  ;;  %252 = vrot.lane.b32.xlu0 %v239_v61, %s2764_s22 }
  0xd0   :  { %v2873_v4 = vpop.permute.xlu1 %363  ;;  %v2875_v5 = vpop.permute.xlu0 %320  ;;  %v2919_v24 = vld [vmem:[#allocation2 + $0x20] sm:$0x1f] }
  0xd1   :  { %v367_v6 = vmul.f32 %v2873_v4, %v2847_v57  ;;  %v324_v7 = vmul.f32 %v2875_v5, %v2847_v57  ;;  %v369_v8 = vmul.f32 %v2873_v4, %v2857_v62  ;;  %v326_v9 = vmul.f32 %v2875_v5, %v2857_v62  ;;  %v2957_v39 = vld [vmem:[#allocation2 + $0x10] sm:$0xff] }
  0xd2   :  { %v371_v10 = vmul.f32 %v2873_v4, %v2865_v1  ;;  %v328_v11 = vmul.f32 %v2875_v5, %v2865_v1  ;;  %v242_v26 = vmul.f32 %v2851_v59, %v2919_v24  ;;  %v323_v28 = vmul.f32 %v2875_v5, %v2912_v20 }
  0xd3   :  { %299 = vrot.lane.b32.xlu1 %v284_v63, %s2764_s22  ;;  %256 = vrot.lane.b32.xlu0 %v241_v0, %s2764_s22  ;;  %v327_v30 = vmul.f32 %v2875_v5, %v2919_v24  ;;  %v285_v31 = vmul.f32 %v2849_v58, %v2919_v24  ;;  %v366_v33 = vmul.f32 %v2873_v4, %v2912_v20 }
  0xd4   :  { %v2895_v12 = vpop.permute.xlu1 %448  ;;  %v406_v13 = vpop.permute.xlu0 %405  ;;  %v370_v35 = vmul.f32 %v2873_v4, %v2919_v24  ;;  %v240_v41 = vmul.f32 %v2851_v59, %v2957_v39  ;;  %v283_v42 = vmul.f32 %v2849_v58, %v2957_v39  ;;  %v325_v43 = vmul.f32 %v2875_v5, %v2957_v39 }
  0xd5   :  { %v452_v14 = vmul.f32 %v2895_v12, %v2847_v57  ;;  %v409_v15 = vmul.f32 %v406_v13, %v2847_v57  ;;  %v454_v16 = vmul.f32 %v2895_v12, %v2857_v62  ;;  %v411_v17 = vmul.f32 %v406_v13, %v2857_v62 }
  0xd6   :  { %v456_v18 = vmul.f32 %v2895_v12, %v2865_v1  ;;  %v413_v19 = vmul.f32 %v406_v13, %v2865_v1  ;;  %v408_v32 = vmul.f32 %v406_v13, %v2912_v20  ;;  %v412_v34 = vmul.f32 %v406_v13, %v2919_v24 }
  0xd7   :  { %303 = vrot.lane.b32.xlu1 %v286_v2, %s2764_s22  ;;  %260 = vrot.lane.b32.xlu0 %v243_v3, %s2764_s22  ;;  %v451_v37 = vmul.f32 %v2895_v12, %v2912_v20  ;;  %v455_v40 = vmul.f32 %v2895_v12, %v2919_v24  ;;  %v368_v44 = vmul.f32 %v2873_v4, %v2957_v39 }
  0xd8   :  { %v491_v21 = vpop.permute.xlu0 %490  ;;  %v410_v45 = vmul.f32 %v406_v13, %v2957_v39  ;;  %v453_v46 = vmul.f32 %v2895_v12, %v2957_v39  ;;  %v534_v48 = vpop.permute.xlu1 %533 }
  0xd9   :  { %v494_v22 = vmul.f32 %v491_v21, %v2847_v57  ;;  %v496_v25 = vmul.f32 %v491_v21, %v2857_v62  ;;  %v498_v27 = vmul.f32 %v491_v21, %v2865_v1  ;;  %v493_v36 = vmul.f32 %v491_v21, %v2912_v20 }
  0xda   :  { %v497_v38 = vmul.f32 %v491_v21, %v2919_v24  ;;  %v495_v47 = vmul.f32 %v491_v21, %v2957_v39  ;;  %v537_v49 = vmul.f32 %v534_v48, %v2847_v57  ;;  %v536_v50 = vmul.f32 %v534_v48, %v2912_v20 }
  0xdb   :  { %380 = vrot.lane.b32.xlu1 %v367_v6, %s2765_s23  ;;  %337 = vrot.lane.b32.xlu0 %v324_v7, %s2765_s23  ;;  %v538_v51 = vmul.f32 %v534_v48, %v2957_v39  ;;  %v539_v52 = vmul.f32 %v534_v48, %v2857_v62  ;;  %v540_v53 = vmul.f32 %v534_v48, %v2919_v24 }
  0xdc   :  { %v541_v54 = vmul.f32 %v534_v48, %v2865_v1 }
  0xdf   :  { %384 = vrot.lane.b32.xlu1 %v369_v8, %s2765_s23  ;;  %341 = vrot.lane.b32.xlu0 %v326_v9, %s2765_s23 }
  0xe3   :  { %388 = vrot.lane.b32.xlu1 %v371_v10, %s2765_s23  ;;  %345 = vrot.lane.b32.xlu0 %v328_v11, %s2765_s23 }
  0xe7   :  { %465 = vrot.lane.b32.xlu1 %v452_v14, %s2766_s24  ;;  %422 = vrot.lane.b32.xlu0 %v409_v15, %s2766_s24 }
  0xeb   :  { %469 = vrot.lane.b32.xlu1 %v454_v16, %s2766_s24  ;;  %426 = vrot.lane.b32.xlu0 %v411_v17, %s2766_s24 }
  0xef   :  { %473 = vrot.lane.b32.xlu1 %v456_v18, %s2766_s24  ;;  %430 = vrot.lane.b32.xlu0 %v413_v19, %s2766_s24 }
  0xf3   :  { %507 = vrot.lane.b32.xlu0 %v494_v22, %s2767_s1  ;;  %250 = vrot.lane.b32.xlu1 %v238_v23, %s2764_s22 }
  0xf7   :  { %511 = vrot.lane.b32.xlu0 %v496_v25, %s2767_s1  ;;  %258 = vrot.lane.b32.xlu1 %v242_v26, %s2764_s22 }
  0xfb   :  { %515 = vrot.lane.b32.xlu0 %v498_v27, %s2767_s1  ;;  %335 = vrot.lane.b32.xlu1 %v323_v28, %s2765_s23 }
  0xff   :  { %293 = vrot.lane.b32.xlu0 %v281_v29, %s2764_s22  ;;  %343 = vrot.lane.b32.xlu1 %v327_v30, %s2765_s23 }
 0x103   :  { %301 = vrot.lane.b32.xlu0 %v285_v31, %s2764_s22  ;;  %420 = vrot.lane.b32.xlu1 %v408_v32, %s2766_s24 }
 0x107   :  { %378 = vrot.lane.b32.xlu0 %v366_v33, %s2765_s23  ;;  %428 = vrot.lane.b32.xlu1 %v412_v34, %s2766_s24 }
 0x10b   :  { %386 = vrot.lane.b32.xlu0 %v370_v35, %s2765_s23  ;;  %505 = vrot.lane.b32.xlu1 %v493_v36, %s2767_s1 }
 0x10f   :  { %463 = vrot.lane.b32.xlu0 %v451_v37, %s2766_s24  ;;  %513 = vrot.lane.b32.xlu1 %v497_v38, %s2767_s1 }
 0x113   :  { %471 = vrot.lane.b32.xlu0 %v455_v40, %s2766_s24  ;;  %254 = vrot.lane.b32.xlu1 %v240_v41, %s2764_s22 }
 0x117   :  { %297 = vrot.lane.b32.xlu0 %v283_v42, %s2764_s22  ;;  %339 = vrot.lane.b32.xlu1 %v325_v43, %s2765_s23 }
 0x11b   :  { %382 = vrot.lane.b32.xlu0 %v368_v44, %s2765_s23  ;;  %424 = vrot.lane.b32.xlu1 %v410_v45, %s2766_s24 }
 0x11f   :  { %467 = vrot.lane.b32.xlu0 %v453_v46, %s2766_s24  ;;  %509 = vrot.lane.b32.xlu1 %v495_v47, %s2767_s1  ;;  %v2596_v46 = vld [vmem:[#allocation3 + $0x1f] ss:$0 sm:$0xff] }
 0x123   :  { %548 = vrot.lane.b32.xlu0 %v536_v50, %s2767_s1  ;;  %550 = vrot.lane.b32.xlu1 %v537_v49, %s2767_s1 }
 0x127   :  { %552 = vrot.lane.b32.xlu0 %v538_v51, %s2767_s1  ;;  %554 = vrot.lane.b32.xlu1 %v539_v52, %s2767_s1 }
 0x12b   :  { %556 = vrot.lane.b32.xlu0 %v540_v53, %s2767_s1  ;;  %558 = vrot.lane.b32.xlu1 %v541_v54, %s2767_s1 }
 0x12f   :  { %620 = vrot.lane.b32.xlu0 %v2595_v55, %s2761_s19 }
 0x141   :  { %v2996_v56 = vpop.permute.xlu0 %252  ;;  %v3034_v14 = vpop.permute.xlu1 %295 }
 0x145   :  { %v2998_v58 = vpop.permute.xlu0 %256  ;;  %v3038_v16 = vpop.permute.xlu1 %299 }
 0x146   :  { %4573 = vst [vmem:[#allocation20_spill] sm:$0xff] %v3038_v16 }
 0x149   :  { %v3000_v59 = vpop.permute.xlu0 %260  ;;  %v3044_v19 = vpop.permute.xlu1 %303 }
 0x14d   :  { %v3002_v60 = vpop.permute.xlu0 %337  ;;  %v3048_v22 = vpop.permute.xlu1 %380 }
 0x151   :  { %v3004_v61 = vpop.permute.xlu0 %341  ;;  %v3056_v30 = vpop.permute.xlu1 %384 }
 0x152   :  { %4565 = vst [vmem:[#allocation12_spill] sm:$0xff] %v3004_v61  ;;  %4578 = vst [vmem:[#allocation25_spill] sm:$0xff] %v3056_v30 }
 0x155   :  { %v3006_v63 = vpop.permute.xlu0 %345  ;;  %v3064_v42 = vpop.permute.xlu1 %388 }
 0x159   :  { %v3008_v0 = vpop.permute.xlu0 %422  ;;  %v3070_v45 = vpop.permute.xlu1 %465 }
 0x15a   :  { %4579 = vst [vmem:[#allocation26_spill] sm:$0xff] %v3070_v45 }
 0x15d   :  { %v3010_v2 = vpop.permute.xlu0 %426  ;;  %v3075_v47 = vpop.permute.xlu1 %469 }
 0x15e   :  { %4566 = vst [vmem:[#allocation13_spill] sm:$0xff] %v3010_v2  ;;  %4580 = vst [vmem:[#allocation27_spill] sm:$0xff] %v3075_v47  ;;  %v2583_v47 = vld [vmem:[#allocation3] ss:$0 sm:$0xff] }
 0x161   :  { %v3012_v3 = vpop.permute.xlu0 %430  ;;  %v3077_v48 = vpop.permute.xlu1 %473 }
 0x162   :  { %4581 = vst [vmem:[#allocation28_spill] sm:$0xff] %v3077_v48 }
 0x165   :  { %v3014_v4 = vpop.permute.xlu0 %507  ;;  %v3079_v49 = vpop.permute.xlu1 %250 }
 0x169   :  { %v3016_v5 = vpop.permute.xlu0 %511  ;;  %v3081_v50 = vpop.permute.xlu1 %258 }
 0x16a   :  { %4567 = vst [vmem:[#allocation14_spill] sm:$0xff] %v3016_v5 }
 0x16d   :  { %v3018_v6 = vpop.permute.xlu0 %515  ;;  %v3083_v51 = vpop.permute.xlu1 %335 }
 0x16e   :  { %4568 = vst [vmem:[#allocation15_spill] sm:$0xff] %v3018_v6 }
 0x171   :  { %v3020_v7 = vpop.permute.xlu0 %293  ;;  %v3085_v52 = vpop.permute.xlu1 %343 }
 0x175   :  { %v3022_v8 = vpop.permute.xlu0 %301  ;;  %v3087_v53 = vpop.permute.xlu1 %420 }
 0x179   :  { %v3024_v9 = vpop.permute.xlu0 %378  ;;  %v3089_v54 = vpop.permute.xlu1 %428 }
 0x17d   :  { %v3026_v10 = vpop.permute.xlu0 %386  ;;  %v3091_v55 = vpop.permute.xlu1 %505 }
 0x181   :  { %v3028_v11 = vpop.permute.xlu0 %463 }
 0x182   :  { %4569 = vst [vmem:[#allocation16_spill] sm:$0xff] %v3028_v11 }
 0x185   :  { %v3030_v12 = vpop.permute.xlu0 %471 }
 0x186   :  { %4570 = vst [vmem:[#allocation17_spill] sm:$0xff] %v3030_v12 }
 0x189   :  { %v3032_v13 = vpop.permute.xlu0 %297 }
 0x18a   :  { %4571 = vst [vmem:[#allocation18_spill] sm:$0xff] %v3032_v13 }
 0x18d   :  { %v3036_v15 = vpop.permute.xlu0 %382 }
 0x18e   :  { %4572 = vst [vmem:[#allocation19_spill] sm:$0xff] %v3036_v15 }
 0x191   :  { %v3040_v17 = vpop.permute.xlu0 %467 }
 0x192   :  { %4574 = vst [vmem:[#allocation21_spill] sm:$0xff] %v3040_v17 }
 0x195   :  { %v3042_v18 = vpop.permute.xlu0 %548 }
 0x196   :  { %4575 = vst [vmem:[#allocation22_spill] sm:$0xff] %v3042_v18 }
 0x199   :  { %v3046_v21 = vpop.permute.xlu0 %552 }
 0x19a   :  { %4576 = vst [vmem:[#allocation23_spill] sm:$0xff] %v3046_v21 }
 0x19d   :  { %v3050_v23 = vpop.permute.xlu0 %556 }
 0x19e   :  { %4577 = vst [vmem:[#allocation24_spill] sm:$0xff] %v3050_v23 }
 0x1a1   :  { %v621_v25 = vpop.permute.xlu0 %620 }
 0x1a2   :  { %v624_v26 = vmul.f32 %v621_v25, %v2847_v57  ;;  %v626_v27 = vmul.f32 %v621_v25, %v2857_v62  ;;  %v623_v28 = vmul.f32 %v621_v25, %v2912_v20  ;;  %v625_v29 = vmul.f32 %v621_v25, %v2957_v39 }
 0x1a3   :  { %v628_v31 = vmul.f32 %v621_v25, %v2865_v1  ;;  %v627_v32 = vmul.f32 %v621_v25, %v2919_v24  ;;  %v3093_v25 = vpop.permute.xlu1 %513 }
 0x1a4   :  { %v638_v33 = vrot.slane %v624_v26, 1  ;;  %v639_v34 = vrot.slane %v626_v27, 1  ;;  %v635_v35 = vrot.slane %v623_v28, 1  ;;  %v636_v36 = vrot.slane %v625_v29, 1  ;;  %4582 = vst [vmem:[#allocation29_spill] sm:$0xff] %v3093_v25 }
 0x1a5   :  { %v643_v40 = vrot.slane %v628_v31, 1  ;;  %v641_v41 = vrot.slane %v627_v32, 1 }
 0x1a6   :  { %v640_v37 = vsel %vm580_vm5, %v638_v33, %v639_v34  ;;  %v637_v38 = vsel %vm580_vm5, %v635_v35, %v636_v36 }
 0x1a7   :  { %647 = vrot.lane.b32.xlu0 %v640_v37, %s2764_s22  ;;  %645 = vrot.lane.b32.xlu1 %v637_v38, %s2764_s22  ;;  %v644_v43 = vsel %vm580_vm5, %v639_v34, %v643_v40  ;;  %v642_v44 = vsel %vm580_vm5, %v636_v36, %v641_v41  ;;  %v3095_v26 = vpop.permute.xlu1 %254 }
 0x1a8   :  { %4583 = vst [vmem:[#allocation30_spill] sm:$0xff] %v3095_v26 }
 0x1ab   :  { %651 = vrot.lane.b32.xlu0 %v644_v43, %s2764_s22  ;;  %649 = vrot.lane.b32.xlu1 %v642_v44, %s2764_s22  ;;  %v3097_v27 = vpop.permute.xlu1 %339 }
 0x1ac   :  { %4584 = vst [vmem:[#allocation31_spill] sm:$0xff] %v3097_v27 }
 0x1af   :  { %655 = vrot.lane.b32.xlu0 %v643_v40, %s2764_s22  ;;  %653 = vrot.lane.b32.xlu1 %v641_v41, %s2764_s22  ;;  %v3099_v28 = vpop.permute.xlu1 %424 }
 0x1b0   :  { %4585 = vst [vmem:[#allocation32_spill] sm:$0xff] %v3099_v28 }
 0x1b3   :  { %672 = vrot.lane.b32.xlu1 %v2596_v46, %s2761_s19  ;;  %v3101_v29 = vpop.permute.xlu1 %509 }
 0x1b4   :  { %4586 = vst [vmem:[#allocation33_spill] sm:$0xff] %v3101_v29 }
 0x1b7   :  { %v3103_v31 = vpop.permute.xlu1 %550 }
 0x1b8   :  { %4587 = vst [vmem:[#allocation34_spill] sm:$0xff] %v3103_v31 }
 0x1bb   :  { %v3105_v32 = vpop.permute.xlu1 %554 }
 0x1bc   :  { %4588 = vst [vmem:[#allocation35_spill] sm:$0xff] %v3105_v32 }
 0x1bf   :  { %v3107_v33 = vpop.permute.xlu1 %558 }
 0x1c0   :  { %4589 = vst [vmem:[#allocation36_spill] sm:$0xff] %v3107_v33 }
 0x219   :  { %v3109_v34 = vpop.permute.xlu1 %645 }
 0x21a   :  { %4590 = vst [vmem:[#allocation37_spill] sm:$0xff] %v3109_v34 }
 0x21d   :  { %v3111_v35 = vpop.permute.xlu1 %649 }
 0x21e   :  { %4591 = vst [vmem:[#allocation38_spill] sm:$0xff] %v3111_v35 }
 0x221   :  { %v3113_v36 = vpop.permute.xlu1 %653 }
 0x222   :  { %4592 = vst [vmem:[#allocation39_spill] sm:$0xff] %v3113_v36 }
 0x225   :  { %v673_v37 = vpop.permute.xlu1 %672 }
 0x226   :  { %v676_v38 = vmul.f32 %v673_v37, %v2847_v57  ;;  %v678_v40 = vmul.f32 %v673_v37, %v2857_v62  ;;  %v675_v41 = vmul.f32 %v673_v37, %v2912_v20  ;;  %v677_v43 = vmul.f32 %v673_v37, %v2957_v39 }
 0x227   :  { %v680_v44 = vmul.f32 %v673_v37, %v2865_v1  ;;  %v679_v46 = vmul.f32 %v673_v37, %v2919_v24 }
 0x228   :  { %v690_v23 = vrot.slane %v676_v38, 1  ;;  %v691_v33 = vrot.slane %v678_v40, 1  ;;  %v687_v34 = vrot.slane %v675_v41, 1  ;;  %v688_v21 = vrot.slane %v677_v43, 1 }
 0x229   :  { %v695_v32 = vrot.slane %v680_v44, 1  ;;  %v693_v18 = vrot.slane %v679_v46, 1 }
 0x22a   :  { %v692_v35 = vsel %vm580_vm5, %v690_v23, %v691_v33  ;;  %v689_v36 = vsel %vm580_vm5, %v687_v34, %v688_v21  ;;  %v2597_v23 = vld [vmem:[#allocation3 + $0x7] ss:$0 sm:$0xff]  ;;  %v3132_v34 = vpop.permute.xlu0 %647 }
 0x22b   :  { %699 = vrot.lane.b32.xlu1 %v692_v35, %s2764_s22  ;;  %697 = vrot.lane.b32.xlu0 %v689_v36, %s2764_s22  ;;  %v696_v31 = vsel %vm580_vm5, %v691_v33, %v695_v32  ;;  %v694_v29 = vsel %vm580_vm5, %v688_v21, %v693_v18  ;;  %4593 = vst [vmem:[#allocation40_spill] sm:$0xff] %v3132_v34 }
 0x22e   :  { %v3134_v35 = vpop.permute.xlu0 %651 }
 0x22f   :  { %703 = vrot.lane.b32.xlu1 %v696_v31, %s2764_s22  ;;  %701 = vrot.lane.b32.xlu0 %v694_v29, %s2764_s22  ;;  %4594 = vst [vmem:[#allocation41_spill] sm:$0xff] %v3134_v35 }
 0x232   :  { %v3136_v36 = vpop.permute.xlu0 %655 }
 0x233   :  { %707 = vrot.lane.b32.xlu1 %v695_v32, %s2764_s22  ;;  %705 = vrot.lane.b32.xlu0 %v693_v18, %s2764_s22  ;;  %4595 = vst [vmem:[#allocation42_spill] sm:$0xff] %v3136_v36 }
 0x237   :  { %724 = vrot.lane.b32.xlu0 %v2597_v23, %s2754_s14 }
 0x29d   :  { %v3138_v33 = vpop.permute.xlu0 %697 }
 0x29e   :  { %4596 = vst [vmem:[#allocation43_spill] sm:$0xff] %v3138_v33 }
 0x2a1   :  { %v3140_v21 = vpop.permute.xlu0 %701 }
 0x2a2   :  { %4597 = vst [vmem:[#allocation44_spill] sm:$0xff] %v3140_v21 }
 0x2a5   :  { %v3142_v31 = vpop.permute.xlu0 %705 }
 0x2a6   :  { %4598 = vst [vmem:[#allocation45_spill] sm:$0xff] %v3142_v31 }
 0x2a9   :  { %v725_v29 = vpop.permute.xlu0 %724 }
 0x2aa   :  { %v728_v32 = vmul.f32 %v725_v29, %v2847_v57  ;;  %v730_v18 = vmul.f32 %v725_v29, %v2857_v62  ;;  %v727_v37 = vmul.f32 %v725_v29, %v2912_v20  ;;  %v729_v38 = vmul.f32 %v725_v29, %v2957_v39 }
 0x2ab   :  { %v732_v40 = vmul.f32 %v725_v29, %v2865_v1  ;;  %v731_v41 = vmul.f32 %v725_v29, %v2919_v24  ;;  %v2598_v29 = vld [vmem:[#allocation3 + $0x20] ss:$0 sm:$0xff] }
 0x2ac   :  { %v742_v43 = vrot.slane %v728_v32, 1  ;;  %v743_v44 = vrot.slane %v730_v18, 1  ;;  %v739_v46 = vrot.slane %v727_v37, 1  ;;  %v740_v23 = vrot.slane %v729_v38, 1  ;;  %v3161_v32 = vpop.permute.xlu1 %699 }
 0x2ad   :  { %v747_v33 = vrot.slane %v732_v40, 1  ;;  %v745_v36 = vrot.slane %v731_v41, 1  ;;  %4599 = vst [vmem:[#allocation46_spill] sm:$0xff] %v3161_v32 }
 0x2ae   :  { %v744_v21 = vsel %vm580_vm5, %v742_v43, %v743_v44  ;;  %v741_v31 = vsel %vm580_vm5, %v739_v46, %v740_v23 }
 0x2af   :  { %751 = vrot.lane.b32.xlu0 %v744_v21, %s2765_s23  ;;  %749 = vrot.lane.b32.xlu1 %v741_v31, %s2765_s23  ;;  %v748_v35 = vsel %vm580_vm5, %v743_v44, %v747_v33  ;;  %v746_v34 = vsel %vm580_vm5, %v740_v23, %v745_v36 }
 0x2b0   :  { %v3163_v21 = vpop.permute.xlu1 %703 }
 0x2b1   :  { %4600 = vst [vmem:[#allocation47_spill] sm:$0xff] %v3163_v21 }
 0x2b3   :  { %755 = vrot.lane.b32.xlu0 %v748_v35, %s2765_s23  ;;  %753 = vrot.lane.b32.xlu1 %v746_v34, %s2765_s23 }
 0x2b4   :  { %v3165_v31 = vpop.permute.xlu1 %707 }
 0x2b5   :  { %4601 = vst [vmem:[#allocation48_spill] sm:$0xff] %v3165_v31 }
 0x2b7   :  { %759 = vrot.lane.b32.xlu0 %v747_v33, %s2765_s23  ;;  %757 = vrot.lane.b32.xlu1 %v745_v36, %s2765_s23 }
 0x2bb   :  { %776 = vrot.lane.b32.xlu1 %v2598_v29, %s2754_s14 }
 0x321   :  { %v3167_v18 = vpop.permute.xlu1 %749 }
 0x322   :  { %4602 = vst [vmem:[#allocation49_spill] sm:$0xff] %v3167_v18 }
 0x325   :  { %v3169_v37 = vpop.permute.xlu1 %753 }
 0x326   :  { %4603 = vst [vmem:[#allocation50_spill] sm:$0xff] %v3169_v37 }
 0x329   :  { %v3171_v35 = vpop.permute.xlu1 %757 }
 0x32a   :  { %4604 = vst [vmem:[#allocation51_spill] sm:$0xff] %v3171_v35 }
 0x32d   :  { %v777_v34 = vpop.permute.xlu1 %776 }
 0x32e   :  { %v780_v33 = vmul.f32 %v777_v34, %v2847_v57  ;;  %v782_v36 = vmul.f32 %v777_v34, %v2857_v62  ;;  %v779_v38 = vmul.f32 %v777_v34, %v2912_v20  ;;  %v781_v40 = vmul.f32 %v777_v34, %v2957_v39 }
 0x32f   :  { %v784_v41 = vmul.f32 %v777_v34, %v2865_v1  ;;  %v783_v43 = vmul.f32 %v777_v34, %v2919_v24  ;;  %v2599_v34 = vld [vmem:[#allocation3 + $0x8] ss:$0 sm:$0xff] }
 0x330   :  { %v794_v44 = vrot.slane %v780_v33, 1  ;;  %v795_v46 = vrot.slane %v782_v36, 1  ;;  %v791_v23 = vrot.slane %v779_v38, 1  ;;  %v792_v29 = vrot.slane %v781_v40, 1  ;;  %v3190_v33 = vpop.permute.xlu0 %751 }
 0x331   :  { %v799_v18 = vrot.slane %v784_v41, 1  ;;  %v797_v31 = vrot.slane %v783_v43, 1  ;;  %4605 = vst [vmem:[#allocation52_spill] sm:$0xff] %v3190_v33 }
 0x332   :  { %v796_v37 = vsel %vm580_vm5, %v794_v44, %v795_v46  ;;  %v793_v35 = vsel %vm580_vm5, %v791_v23, %v792_v29 }
 0x333   :  { %803 = vrot.lane.b32.xlu1 %v796_v37, %s2765_s23  ;;  %801 = vrot.lane.b32.xlu0 %v793_v35, %s2765_s23  ;;  %v800_v21 = vsel %vm580_vm5, %v795_v46, %v799_v18  ;;  %v798_v32 = vsel %vm580_vm5, %v792_v29, %v797_v31 }
 0x334   :  { %v3192_v37 = vpop.permute.xlu0 %755 }
 0x335   :  { %4606 = vst [vmem:[#allocation53_spill] sm:$0xff] %v3192_v37 }
 0x337   :  { %807 = vrot.lane.b32.xlu1 %v800_v21, %s2765_s23  ;;  %805 = vrot.lane.b32.xlu0 %v798_v32, %s2765_s23 }
 0x338   :  { %v3194_v35 = vpop.permute.xlu0 %759 }
 0x339   :  { %4607 = vst [vmem:[#allocation54_spill] sm:$0xff] %v3194_v35 }
 0x33b   :  { %811 = vrot.lane.b32.xlu1 %v799_v18, %s2765_s23  ;;  %809 = vrot.lane.b32.xlu0 %v797_v31, %s2765_s23 }
 0x33f   :  { %828 = vrot.lane.b32.xlu0 %v2599_v34, %s2762_s20 }
 0x3a5   :  { %v3196_v36 = vpop.permute.xlu0 %801 }
 0x3a6   :  { %4608 = vst [vmem:[#allocation55_spill] sm:$0xff] %v3196_v36 }
 0x3a9   :  { %v3198_v38 = vpop.permute.xlu0 %805 }
 0x3aa   :  { %4609 = vst [vmem:[#allocation56_spill] sm:$0xff] %v3198_v38 }
 0x3ad   :  { %v3200_v21 = vpop.permute.xlu0 %809 }
 0x3ae   :  { %4610 = vst [vmem:[#allocation57_spill] sm:$0xff] %v3200_v21 }
 0x3b1   :  { %v829_v32 = vpop.permute.xlu0 %828 }
 0x3b2   :  { %v832_v18 = vmul.f32 %v829_v32, %v2847_v57  ;;  %v834_v31 = vmul.f32 %v829_v32, %v2857_v62  ;;  %v831_v40 = vmul.f32 %v829_v32, %v2912_v20  ;;  %v833_v41 = vmul.f32 %v829_v32, %v2957_v39 }
 0x3b3   :  { %v836_v43 = vmul.f32 %v829_v32, %v2865_v1  ;;  %v835_v44 = vmul.f32 %v829_v32, %v2919_v24  ;;  %v2600_v32 = vld [vmem:[#allocation3 + $0x21] ss:$0 sm:$0xff] }
 0x3b4   :  { %v846_v46 = vrot.slane %v832_v18, 1  ;;  %v847_v23 = vrot.slane %v834_v31, 1  ;;  %v843_v29 = vrot.slane %v831_v40, 1  ;;  %v844_v34 = vrot.slane %v833_v41, 1  ;;  %v3219_v18 = vpop.permute.xlu1 %803 }
 0x3b5   :  { %v851_v36 = vrot.slane %v836_v43, 1  ;;  %v849_v35 = vrot.slane %v835_v44, 1  ;;  %4611 = vst [vmem:[#allocation58_spill] sm:$0xff] %v3219_v18 }
 0x3b6   :  { %v848_v38 = vsel %vm580_vm5, %v846_v46, %v847_v23  ;;  %v845_v21 = vsel %vm580_vm5, %v843_v29, %v844_v34 }
 0x3b7   :  { %855 = vrot.lane.b32.xlu0 %v848_v38, %s2766_s24  ;;  %853 = vrot.lane.b32.xlu1 %v845_v21, %s2766_s24  ;;  %v852_v37 = vsel %vm580_vm5, %v847_v23, %v851_v36  ;;  %v850_v33 = vsel %vm580_vm5, %v844_v34, %v849_v35 }
 0x3b8   :  { %v3221_v38 = vpop.permute.xlu1 %807 }
 0x3b9   :  { %4612 = vst [vmem:[#allocation59_spill] sm:$0xff] %v3221_v38 }
 0x3bb   :  { %859 = vrot.lane.b32.xlu0 %v852_v37, %s2766_s24  ;;  %857 = vrot.lane.b32.xlu1 %v850_v33, %s2766_s24 }
 0x3bc   :  { %v3223_v21 = vpop.permute.xlu1 %811 }
 0x3bd   :  { %4613 = vst [vmem:[#allocation60_spill] sm:$0xff] %v3223_v21 }
 0x3bf   :  { %863 = vrot.lane.b32.xlu0 %v851_v36, %s2766_s24  ;;  %861 = vrot.lane.b32.xlu1 %v849_v35, %s2766_s24 }
 0x3c3   :  { %880 = vrot.lane.b32.xlu1 %v2600_v32, %s2762_s20 }
 0x429   :  { %v3225_v31 = vpop.permute.xlu1 %853 }
 0x42a   :  { %4614 = vst [vmem:[#allocation61_spill] sm:$0xff] %v3225_v31 }
 0x42d   :  { %v3227_v40 = vpop.permute.xlu1 %857 }
 0x42e   :  { %4615 = vst [vmem:[#allocation62_spill] sm:$0xff] %v3227_v40 }
 0x431   :  { %v3229_v37 = vpop.permute.xlu1 %861 }
 0x432   :  { %4616 = vst [vmem:[#allocation63_spill] sm:$0xff] %v3229_v37 }
 0x435   :  { %v881_v33 = vpop.permute.xlu1 %880 }
 0x436   :  { %v884_v36 = vmul.f32 %v881_v33, %v2847_v57  ;;  %v886_v35 = vmul.f32 %v881_v33, %v2857_v62  ;;  %v883_v41 = vmul.f32 %v881_v33, %v2912_v20  ;;  %v885_v43 = vmul.f32 %v881_v33, %v2957_v39 }
 0x437   :  { %v888_v44 = vmul.f32 %v881_v33, %v2865_v1  ;;  %v887_v46 = vmul.f32 %v881_v33, %v2919_v24  ;;  %v2601_v33 = vld [vmem:[#allocation3 + $0x9] ss:$0 sm:$0xff] }
 0x438   :  { %v898_v23 = vrot.slane %v884_v36, 1  ;;  %v899_v29 = vrot.slane %v886_v35, 1  ;;  %v895_v34 = vrot.slane %v883_v41, 1  ;;  %v896_v32 = vrot.slane %v885_v43, 1  ;;  %v3248_v36 = vpop.permute.xlu0 %855 }
 0x439   :  { %v903_v31 = vrot.slane %v888_v44, 1  ;;  %v901_v21 = vrot.slane %v887_v46, 1  ;;  %4617 = vst [vmem:[#allocation64_spill] sm:$0xff] %v3248_v36 }
 0x43a   :  { %v900_v40 = vsel %vm580_vm5, %v898_v23, %v899_v29  ;;  %v897_v37 = vsel %vm580_vm5, %v895_v34, %v896_v32 }
 0x43b   :  { %907 = vrot.lane.b32.xlu1 %v900_v40, %s2766_s24  ;;  %905 = vrot.lane.b32.xlu0 %v897_v37, %s2766_s24  ;;  %v904_v38 = vsel %vm580_vm5, %v899_v29, %v903_v31  ;;  %v902_v18 = vsel %vm580_vm5, %v896_v32, %v901_v21 }
 0x43c   :  { %v3250_v40 = vpop.permute.xlu0 %859 }
 0x43d   :  { %4618 = vst [vmem:[#allocation65_spill] sm:$0xff] %v3250_v40 }
 0x43f   :  { %911 = vrot.lane.b32.xlu1 %v904_v38, %s2766_s24  ;;  %909 = vrot.lane.b32.xlu0 %v902_v18, %s2766_s24 }
 0x440   :  { %v3252_v37 = vpop.permute.xlu0 %863 }
 0x441   :  { %4619 = vst [vmem:[#allocation66_spill] sm:$0xff] %v3252_v37 }
 0x443   :  { %915 = vrot.lane.b32.xlu1 %v903_v31, %s2766_s24  ;;  %913 = vrot.lane.b32.xlu0 %v901_v21, %s2766_s24 }
 0x447   :  { %932 = vrot.lane.b32.xlu0 %v2601_v33, %s2763_s21 }
 0x4ad   :  { %v3254_v35 = vpop.permute.xlu0 %905 }
 0x4ae   :  { %4620 = vst [vmem:[#allocation67_spill] sm:$0xff] %v3254_v35 }
 0x4b1   :  { %v3256_v41 = vpop.permute.xlu0 %909 }
 0x4b2   :  { %4621 = vst [vmem:[#allocation68_spill] sm:$0xff] %v3256_v41 }
 0x4b5   :  { %v3258_v38 = vpop.permute.xlu0 %913 }
 0x4b6   :  { %4622 = vst [vmem:[#allocation69_spill] sm:$0xff] %v3258_v38 }
 0x4b9   :  { %v933_v18 = vpop.permute.xlu0 %932 }
 0x4ba   :  { %v936_v31 = vmul.f32 %v933_v18, %v2847_v57  ;;  %v938_v21 = vmul.f32 %v933_v18, %v2857_v62  ;;  %v935_v43 = vmul.f32 %v933_v18, %v2912_v20  ;;  %v937_v44 = vmul.f32 %v933_v18, %v2957_v39 }
 0x4bb   :  { %v940_v46 = vmul.f32 %v933_v18, %v2865_v1  ;;  %v939_v23 = vmul.f32 %v933_v18, %v2919_v24  ;;  %v2602_v18 = vld [vmem:[#allocation3 + $0x22] ss:$0 sm:$0xff] }
 0x4bc   :  { %v950_v29 = vrot.slane %v936_v31, 1  ;;  %v951_v34 = vrot.slane %v938_v21, 1  ;;  %v947_v32 = vrot.slane %v935_v43, 1  ;;  %v948_v33 = vrot.slane %v937_v44, 1  ;;  %v3277_v31 = vpop.permute.xlu1 %907 }
 0x4bd   :  { %v955_v35 = vrot.slane %v940_v46, 1  ;;  %v953_v37 = vrot.slane %v939_v23, 1  ;;  %4623 = vst [vmem:[#allocation70_spill] sm:$0xff] %v3277_v31 }
 0x4be   :  { %v952_v41 = vsel %vm580_vm5, %v950_v29, %v951_v34  ;;  %v949_v38 = vsel %vm580_vm5, %v947_v32, %v948_v33 }
 0x4bf   :  { %959 = vrot.lane.b32.xlu0 %v952_v41, %s2767_s1  ;;  %957 = vrot.lane.b32.xlu1 %v949_v38, %s2767_s1  ;;  %v956_v40 = vsel %vm580_vm5, %v951_v34, %v955_v35  ;;  %v954_v36 = vsel %vm580_vm5, %v948_v33, %v953_v37 }
 0x4c0   :  { %v3279_v41 = vpop.permute.xlu1 %911 }
 0x4c1   :  { %4624 = vst [vmem:[#allocation71_spill] sm:$0xff] %v3279_v41 }
 0x4c3   :  { %963 = vrot.lane.b32.xlu0 %v956_v40, %s2767_s1  ;;  %961 = vrot.lane.b32.xlu1 %v954_v36, %s2767_s1 }
 0x4c4   :  { %v3281_v38 = vpop.permute.xlu1 %915 }
 0x4c5   :  { %4625 = vst [vmem:[#allocation72_spill] sm:$0xff] %v3281_v38 }
 0x4c7   :  { %967 = vrot.lane.b32.xlu0 %v955_v35, %s2767_s1  ;;  %965 = vrot.lane.b32.xlu1 %v953_v37, %s2767_s1 }
 0x4cb   :  { %984 = vrot.lane.b32.xlu1 %v2602_v18, %s2763_s21 }
 0x531   :  { %v3283_v21 = vpop.permute.xlu1 %957 }
 0x532   :  { %4626 = vst [vmem:[#allocation73_spill] sm:$0xff] %v3283_v21 }
 0x535   :  { %v3285_v43 = vpop.permute.xlu1 %961 }
 0x536   :  { %4627 = vst [vmem:[#allocation74_spill] sm:$0xff] %v3285_v43 }
 0x539   :  { %v3287_v40 = vpop.permute.xlu1 %965 }
 0x53a   :  { %4628 = vst [vmem:[#allocation75_spill] sm:$0xff] %v3287_v40 }
 0x53d   :  { %v985_v36 = vpop.permute.xlu1 %984 }
 0x53e   :  { %v988_v35 = vmul.f32 %v985_v36, %v2847_v57  ;;  %v990_v37 = vmul.f32 %v985_v36, %v2857_v62  ;;  %v987_v44 = vmul.f32 %v985_v36, %v2912_v20  ;;  %v989_v46 = vmul.f32 %v985_v36, %v2957_v39 }
 0x53f   :  { %v992_v23 = vmul.f32 %v985_v36, %v2865_v1  ;;  %v991_v29 = vmul.f32 %v985_v36, %v2919_v24  ;;  %v2605_v36 = vld [vmem:[#allocation3 + $0xb] ss:$0 sm:$0xff] }
 0x540   :  { %v1002_v34 = vrot.slane %v988_v35, 1  ;;  %v1003_v32 = vrot.slane %v990_v37, 1  ;;  %v999_v33 = vrot.slane %v987_v44, 1  ;;  %v1000_v18 = vrot.slane %v989_v46, 1  ;;  %v3306_v35 = vpop.permute.xlu0 %959 }
 0x541   :  { %v1007_v21 = vrot.slane %v992_v23, 1  ;;  %v1005_v38 = vrot.slane %v991_v29, 1  ;;  %4629 = vst [vmem:[#allocation76_spill] sm:$0xff] %v3306_v35 }
 0x542   :  { %v1004_v43 = vsel %vm580_vm5, %v1002_v34, %v1003_v32  ;;  %v1001_v40 = vsel %vm580_vm5, %v999_v33, %v1000_v18 }
 0x543   :  { %1011 = vrot.lane.b32.xlu1 %v1004_v43, %s2767_s1  ;;  %1009 = vrot.lane.b32.xlu0 %v1001_v40, %s2767_s1  ;;  %v1008_v41 = vsel %vm580_vm5, %v1003_v32, %v1007_v21  ;;  %v1006_v31 = vsel %vm580_vm5, %v1000_v18, %v1005_v38 }
 0x544   :  { %v3308_v43 = vpop.permute.xlu0 %963 }
 0x545   :  { %4630 = vst [vmem:[#allocation77_spill] sm:$0xff] %v3308_v43 }
 0x547   :  { %1015 = vrot.lane.b32.xlu1 %v1008_v41, %s2767_s1  ;;  %1013 = vrot.lane.b32.xlu0 %v1006_v31, %s2767_s1 }
 0x548   :  { %v3310_v40 = vpop.permute.xlu0 %967 }
 0x549   :  { %4631 = vst [vmem:[#allocation78_spill] sm:$0xff] %v3310_v40 }
 0x54b   :  { %1019 = vrot.lane.b32.xlu1 %v1007_v21, %s2767_s1  ;;  %1017 = vrot.lane.b32.xlu0 %v1005_v38, %s2767_s1 }
 0x54f   :  { %1081 = vrot.lane.b32.xlu0 %v2605_v36, %s2761_s19 }
 0x5b5   :  { %v3312_v37 = vpop.permute.xlu0 %1009 }
 0x5b6   :  { %4632 = vst [vmem:[#allocation79_spill] sm:$0xff] %v3312_v37 }
 0x5b9   :  { %v3314_v44 = vpop.permute.xlu0 %1013 }
 0x5ba   :  { %4633 = vst [vmem:[#allocation80_spill] sm:$0xff] %v3314_v44 }
 0x5bd   :  { %v3316_v41 = vpop.permute.xlu0 %1017 }
 0x5be   :  { %4634 = vst [vmem:[#allocation81_spill] sm:$0xff] %v3316_v41 }
 0x5c1   :  { %v1082_v31 = vpop.permute.xlu0 %1081 }
 0x5c2   :  { %v1085_v21 = vmul.f32 %v1082_v31, %v2847_v57  ;;  %v1087_v38 = vmul.f32 %v1082_v31, %v2857_v62  ;;  %v1084_v46 = vmul.f32 %v1082_v31, %v2912_v20  ;;  %v1086_v23 = vmul.f32 %v1082_v31, %v2957_v39 }
 0x5c3   :  { %v1089_v29 = vmul.f32 %v1082_v31, %v2865_v1  ;;  %v1088_v34 = vmul.f32 %v1082_v31, %v2919_v24  ;;  %v2606_v31 = vld [vmem:[#allocation3 + $0x24] ss:$0 sm:$0xff] }
 0x5c4   :  { %v1099_v32 = vrot.slane %v1085_v21, 2  ;;  %v1100_v33 = vrot.slane %v1087_v38, 2  ;;  %v1096_v18 = vrot.slane %v1084_v46, 2  ;;  %v1097_v36 = vrot.slane %v1086_v23, 2  ;;  %v3335_v21 = vpop.permute.xlu1 %1011 }
 0x5c5   :  { %v1104_v37 = vrot.slane %v1089_v29, 2  ;;  %v1102_v40 = vrot.slane %v1088_v34, 2  ;;  %4635 = vst [vmem:[#allocation82_spill] sm:$0xff] %v3335_v21 }
 0x5c6   :  { %v1101_v41 = vsel %vm1041_vm6, %v1099_v32, %v1100_v33  ;;  %v1098_v44 = vsel %vm1041_vm6, %v1096_v18, %v1097_v36 }
 0x5c7   :  { %1108 = vrot.lane.b32.xlu0 %v1101_v41, %s2764_s22  ;;  %1106 = vrot.lane.b32.xlu1 %v1098_v44, %s2764_s22  ;;  %v1105_v43 = vsel %vm1041_vm6, %v1100_v33, %v1104_v37  ;;  %v1103_v35 = vsel %vm1041_vm6, %v1097_v36, %v1102_v40 }
 0x5c8   :  { %v3337_v41 = vpop.permute.xlu1 %1015 }
 0x5c9   :  { %4636 = vst [vmem:[#allocation83_spill] sm:$0xff] %v3337_v41 }
 0x5cb   :  { %1112 = vrot.lane.b32.xlu0 %v1105_v43, %s2764_s22  ;;  %1110 = vrot.lane.b32.xlu1 %v1103_v35, %s2764_s22 }
 0x5cc   :  { %v3339_v44 = vpop.permute.xlu1 %1019 }
 0x5cd   :  { %4637 = vst [vmem:[#allocation84_spill] sm:$0xff] %v3339_v44 }
 0x5cf   :  { %1116 = vrot.lane.b32.xlu0 %v1104_v37, %s2764_s22  ;;  %1114 = vrot.lane.b32.xlu1 %v1102_v40, %s2764_s22 }
 0x5d3   :  { %1133 = vrot.lane.b32.xlu1 %v2606_v31, %s2761_s19 }
 0x639   :  { %v3341_v38 = vpop.permute.xlu1 %1106 }
 0x63a   :  { %4638 = vst [vmem:[#allocation85_spill] sm:$0xff] %v3341_v38 }
 0x63d   :  { %v3343_v46 = vpop.permute.xlu1 %1110 }
 0x63e   :  { %4639 = vst [vmem:[#allocation86_spill] sm:$0xff] %v3343_v46 }
 0x641   :  { %v3345_v43 = vpop.permute.xlu1 %1114 }
 0x642   :  { %4640 = vst [vmem:[#allocation87_spill] sm:$0xff] %v3345_v43 }
 0x645   :  { %v1134_v35 = vpop.permute.xlu1 %1133 }
 0x646   :  { %v1137_v37 = vmul.f32 %v1134_v35, %v2847_v57  ;;  %v1139_v40 = vmul.f32 %v1134_v35, %v2857_v62  ;;  %v1136_v23 = vmul.f32 %v1134_v35, %v2912_v20  ;;  %v1138_v29 = vmul.f32 %v1134_v35, %v2957_v39 }
 0x647   :  { %v1141_v34 = vmul.f32 %v1134_v35, %v2865_v1  ;;  %v1140_v32 = vmul.f32 %v1134_v35, %v2919_v24  ;;  %v2607_v35 = vld [vmem:[#allocation3 + $0xc] ss:$0 sm:$0xff] }
 0x648   :  { %v1151_v33 = vrot.slane %v1137_v37, 2  ;;  %v1152_v18 = vrot.slane %v1139_v40, 2  ;;  %v1148_v36 = vrot.slane %v1136_v23, 2  ;;  %v1149_v31 = vrot.slane %v1138_v29, 2  ;;  %v3364_v37 = vpop.permute.xlu0 %1108 }
 0x649   :  { %v1156_v38 = vrot.slane %v1141_v34, 2  ;;  %v1154_v44 = vrot.slane %v1140_v32, 2  ;;  %4641 = vst [vmem:[#allocation88_spill] sm:$0xff] %v3364_v37 }
 0x64a   :  { %v1153_v46 = vsel %vm1041_vm6, %v1151_v33, %v1152_v18  ;;  %v1150_v43 = vsel %vm1041_vm6, %v1148_v36, %v1149_v31 }
 0x64b   :  { %1160 = vrot.lane.b32.xlu1 %v1153_v46, %s2764_s22  ;;  %1158 = vrot.lane.b32.xlu0 %v1150_v43, %s2764_s22  ;;  %v1157_v41 = vsel %vm1041_vm6, %v1152_v18, %v1156_v38  ;;  %v1155_v21 = vsel %vm1041_vm6, %v1149_v31, %v1154_v44 }
 0x64c   :  { %v3366_v46 = vpop.permute.xlu0 %1112 }
 0x64d   :  { %4642 = vst [vmem:[#allocation89_spill] sm:$0xff] %v3366_v46 }
 0x64f   :  { %1164 = vrot.lane.b32.xlu1 %v1157_v41, %s2764_s22  ;;  %1162 = vrot.lane.b32.xlu0 %v1155_v21, %s2764_s22 }
 0x650   :  { %v3368_v43 = vpop.permute.xlu0 %1116 }
 0x651   :  { %4643 = vst [vmem:[#allocation90_spill] sm:$0xff] %v3368_v43 }
 0x653   :  { %1168 = vrot.lane.b32.xlu1 %v1156_v38, %s2764_s22  ;;  %1166 = vrot.lane.b32.xlu0 %v1154_v44, %s2764_s22 }
 0x657   :  { %1185 = vrot.lane.b32.xlu0 %v2607_v35, %s2754_s14 }
 0x6bd   :  { %v3370_v40 = vpop.permute.xlu0 %1158 }
 0x6be   :  { %4644 = vst [vmem:[#allocation91_spill] sm:$0xff] %v3370_v40 }
 0x6c1   :  { %v3372_v23 = vpop.permute.xlu0 %1162 }
 0x6c2   :  { %4645 = vst [vmem:[#allocation92_spill] sm:$0xff] %v3372_v23 }
 0x6c5   :  { %v3374_v41 = vpop.permute.xlu0 %1166 }
 0x6c6   :  { %4646 = vst [vmem:[#allocation93_spill] sm:$0xff] %v3374_v41 }
 0x6c9   :  { %v1186_v21 = vpop.permute.xlu0 %1185 }
 0x6ca   :  { %v1189_v38 = vmul.f32 %v1186_v21, %v2847_v57  ;;  %v1191_v44 = vmul.f32 %v1186_v21, %v2857_v62  ;;  %v1188_v29 = vmul.f32 %v1186_v21, %v2912_v20  ;;  %v1190_v34 = vmul.f32 %v1186_v21, %v2957_v39 }
 0x6cb   :  { %v1193_v32 = vmul.f32 %v1186_v21, %v2865_v1  ;;  %v1192_v33 = vmul.f32 %v1186_v21, %v2919_v24  ;;  %v2608_v21 = vld [vmem:[#allocation3 + $0x25] ss:$0 sm:$0xff] }
 0x6cc   :  { %v1203_v18 = vrot.slane %v1189_v38, 2  ;;  %v1204_v36 = vrot.slane %v1191_v44, 2  ;;  %v1200_v31 = vrot.slane %v1188_v29, 2  ;;  %v1201_v35 = vrot.slane %v1190_v34, 2  ;;  %v3393_v38 = vpop.permute.xlu1 %1160 }
 0x6cd   :  { %v1208_v40 = vrot.slane %v1193_v32, 2  ;;  %v1206_v43 = vrot.slane %v1192_v33, 2  ;;  %4647 = vst [vmem:[#allocation94_spill] sm:$0xff] %v3393_v38 }
 0x6ce   :  { %v1205_v23 = vsel %vm1041_vm6, %v1203_v18, %v1204_v36  ;;  %v1202_v41 = vsel %vm1041_vm6, %v1200_v31, %v1201_v35 }
 0x6cf   :  { %1212 = vrot.lane.b32.xlu0 %v1205_v23, %s2765_s23  ;;  %1210 = vrot.lane.b32.xlu1 %v1202_v41, %s2765_s23  ;;  %v1209_v46 = vsel %vm1041_vm6, %v1204_v36, %v1208_v40  ;;  %v1207_v37 = vsel %vm1041_vm6, %v1201_v35, %v1206_v43 }
 0x6d0   :  { %v3395_v23 = vpop.permute.xlu1 %1164 }
 0x6d1   :  { %4648 = vst [vmem:[#allocation95_spill] sm:$0xff] %v3395_v23 }
 0x6d3   :  { %1216 = vrot.lane.b32.xlu0 %v1209_v46, %s2765_s23  ;;  %1214 = vrot.lane.b32.xlu1 %v1207_v37, %s2765_s23 }
 0x6d4   :  { %v3397_v41 = vpop.permute.xlu1 %1168 }
 0x6d5   :  { %4649 = vst [vmem:[#allocation96_spill] sm:$0xff] %v3397_v41 }
 0x6d7   :  { %1220 = vrot.lane.b32.xlu0 %v1208_v40, %s2765_s23  ;;  %1218 = vrot.lane.b32.xlu1 %v1206_v43, %s2765_s23 }
 0x6db   :  { %1237 = vrot.lane.b32.xlu1 %v2608_v21, %s2754_s14 }
 0x741   :  { %v3399_v44 = vpop.permute.xlu1 %1210 }
 0x742   :  { %4650 = vst [vmem:[#allocation97_spill] sm:$0xff] %v3399_v44 }
 0x745   :  { %v3401_v29 = vpop.permute.xlu1 %1214 }
 0x746   :  { %4651 = vst [vmem:[#allocation98_spill] sm:$0xff] %v3401_v29 }
 0x749   :  { %v3403_v46 = vpop.permute.xlu1 %1218 }
 0x74a   :  { %4652 = vst [vmem:[#allocation99_spill] sm:$0xff] %v3403_v46 }
 0x74d   :  { %v1238_v37 = vpop.permute.xlu1 %1237 }
 0x74e   :  { %v1241_v40 = vmul.f32 %v1238_v37, %v2847_v57  ;;  %v1243_v43 = vmul.f32 %v1238_v37, %v2857_v62  ;;  %v1240_v34 = vmul.f32 %v1238_v37, %v2912_v20  ;;  %v1242_v32 = vmul.f32 %v1238_v37, %v2957_v39 }
 0x74f   :  { %v1245_v33 = vmul.f32 %v1238_v37, %v2865_v1  ;;  %v1244_v18 = vmul.f32 %v1238_v37, %v2919_v24  ;;  %v2609_v37 = vld [vmem:[#allocation3 + $0xd] ss:$0 sm:$0xff] }
 0x750   :  { %v1255_v36 = vrot.slane %v1241_v40, 2  ;;  %v1256_v31 = vrot.slane %v1243_v43, 2  ;;  %v1252_v35 = vrot.slane %v1240_v34, 2  ;;  %v1253_v21 = vrot.slane %v1242_v32, 2  ;;  %v3422_v40 = vpop.permute.xlu0 %1212 }
 0x751   :  { %v1260_v44 = vrot.slane %v1245_v33, 2  ;;  %v1258_v57 = vrot.slane %v1244_v18, 2  ;;  %4653 = vst [vmem:[#allocation100_spill] sm:$0xff] %v3422_v40  ;;  %v3434_v18 = vld [vmem:[#allocation2 + $0x8] sm:$0xff] }
 0x752   :  { %v1257_v29 = vsel %vm1041_vm6, %v1255_v36, %v1256_v31  ;;  %v1254_v46 = vsel %vm1041_vm6, %v1252_v35, %v1253_v21  ;;  %v3437_v36 = vld [vmem:[#allocation2 + $0x18] sm:$0xff] }
 0x753   :  { %1264 = vrot.lane.b32.xlu1 %v1257_v29, %s2765_s23  ;;  %1262 = vrot.lane.b32.xlu0 %v1254_v46, %s2765_s23  ;;  %v1261_v62 = vsel %vm1041_vm6, %v1256_v31, %v1260_v44  ;;  %v1259_v1 = vsel %vm1041_vm6, %v1253_v21, %v1258_v57 }
 0x754   :  { %v3424_v29 = vpop.permute.xlu0 %1216 }
 0x755   :  { %4654 = vst [vmem:[#allocation101_spill] sm:$0xff] %v3424_v29 }
 0x757   :  { %1268 = vrot.lane.b32.xlu1 %v1261_v62, %s2765_s23  ;;  %1266 = vrot.lane.b32.xlu0 %v1259_v1, %s2765_s23 }
 0x758   :  { %v3426_v46 = vpop.permute.xlu0 %1220 }
 0x759   :  { %4655 = vst [vmem:[#allocation102_spill] sm:$0xff] %v3426_v46 }
 0x75b   :  { %1272 = vrot.lane.b32.xlu1 %v1260_v44, %s2765_s23  ;;  %1270 = vrot.lane.b32.xlu0 %v1258_v57, %s2765_s23  ;;  %v3442_v57 = vld [vmem:[#allocation2 + $0x28] sm:$0x1f] }
 0x75f   :  { %1289 = vrot.lane.b32.xlu0 %v2609_v37, %s2762_s20 }
 0x7c5   :  { %v3428_v43 = vpop.permute.xlu0 %1262 }
 0x7c6   :  { %4656 = vst [vmem:[#allocation103_spill] sm:$0xff] %v3428_v43 }
 0x7c9   :  { %v3430_v34 = vpop.permute.xlu0 %1266 }
 0x7ca   :  { %4657 = vst [vmem:[#allocation104_spill] sm:$0xff] %v3430_v34 }
 0x7cd   :  { %v3432_v32 = vpop.permute.xlu0 %1270 }
 0x7ce   :  { %4658 = vst [vmem:[#allocation105_spill] sm:$0xff] %v3432_v32 }
 0x7d1   :  { %v1290_v33 = vpop.permute.xlu0 %1289 }
 0x7d2   :  { %v1293_v44 = vmul.f32 %v3434_v18, %v1290_v33  ;;  %v1295_v31 = vmul.f32 %v3437_v36, %v1290_v33  ;;  %v1292_v35 = vmul.f32 %v1290_v33, %v2912_v20  ;;  %v1294_v21 = vmul.f32 %v1290_v33, %v2957_v39 }
 0x7d3   :  { %v1297_v62 = vmul.f32 %v3442_v57, %v1290_v33  ;;  %v1296_v1 = vmul.f32 %v1290_v33, %v2919_v24  ;;  %v2610_v24 = vld [vmem:[#allocation3 + $0x26] ss:$0 sm:$0xff] }
 0x7d4   :  { %v1307_v37 = vrot.slane %v1293_v44, 2  ;;  %v1308_v32 = vrot.slane %v1295_v31, 2  ;;  %v1304_v34 = vrot.slane %v1292_v35, 2  ;;  %v1305_v43 = vrot.slane %v1294_v21, 2  ;;  %v3471_v44 = vld [vmem:[#allocation2] sm:$0xff] }
 0x7d5   :  { %v1312_v40 = vrot.slane %v1297_v62, 2  ;;  %v1310_v41 = vrot.slane %v1296_v1, 2  ;;  %v3476_v62 = vld [vmem:[#allocation2 + $0x20] sm:$0x1f] }
 0x7d6   :  { %v1309_v46 = vsel %vm1041_vm6, %v1307_v37, %v1308_v32  ;;  %v1306_v29 = vsel %vm1041_vm6, %v1304_v34, %v1305_v43  ;;  %v3457_v34 = vpop.permute.xlu1 %1264 }
 0x7d7   :  { %1316 = vrot.lane.b32.xlu0 %v1309_v46, %s2766_s24  ;;  %1314 = vrot.lane.b32.xlu1 %v1306_v29, %s2766_s24  ;;  %v1313_v20 = vsel %vm1041_vm6, %v1308_v32, %v1312_v40  ;;  %v1311_v23 = vsel %vm1041_vm6, %v1305_v43, %v1310_v41  ;;  %4659 = vst [vmem:[#allocation106_spill] sm:$0xff] %v3457_v34 }
 0x7da   :  { %v3459_v46 = vpop.permute.xlu1 %1268 }
 0x7db   :  { %1320 = vrot.lane.b32.xlu0 %v1313_v20, %s2766_s24  ;;  %1318 = vrot.lane.b32.xlu1 %v1311_v23, %s2766_s24  ;;  %4660 = vst [vmem:[#allocation107_spill] sm:$0xff] %v3459_v46 }
 0x7de   :  { %v3461_v29 = vpop.permute.xlu1 %1272 }
 0x7df   :  { %1324 = vrot.lane.b32.xlu0 %v1312_v40, %s2766_s24  ;;  %1322 = vrot.lane.b32.xlu1 %v1310_v41, %s2766_s24  ;;  %4661 = vst [vmem:[#allocation108_spill] sm:$0xff] %v3461_v29 }
 0x7e3   :  { %1341 = vrot.lane.b32.xlu1 %v2610_v24, %s2762_s20 }
 0x849   :  { %v3463_v32 = vpop.permute.xlu1 %1314 }
 0x84a   :  { %4662 = vst [vmem:[#allocation109_spill] sm:$0xff] %v3463_v32 }
 0x84d   :  { %v3465_v43 = vpop.permute.xlu1 %1318 }
 0x84e   :  { %4663 = vst [vmem:[#allocation110_spill] sm:$0xff] %v3465_v43 }
 0x851   :  { %v3467_v33 = vpop.permute.xlu1 %1322 }
 0x852   :  { %4664 = vst [vmem:[#allocation111_spill] sm:$0xff] %v3467_v33 }
 0x855   :  { %v1342_v23 = vpop.permute.xlu1 %1341 }
 0x856   :  { %v1345_v40 = vmul.f32 %v3434_v18, %v1342_v23  ;;  %v1347_v41 = vmul.f32 %v3437_v36, %v1342_v23  ;;  %v1344_v31 = vmul.f32 %v3471_v44, %v1342_v23  ;;  %v1346_v35 = vmul.f32 %v1342_v23, %v2957_v39 }
 0x857   :  { %v1349_v21 = vmul.f32 %v3442_v57, %v1342_v23  ;;  %v1348_v1 = vmul.f32 %v3476_v62, %v1342_v23  ;;  %v2611_v23 = vld [vmem:[#allocation3 + $0xe] ss:$0 sm:$0xff] }
 0x858   :  { %v1359_v37 = vrot.slane %v1345_v40, 2  ;;  %v1360_v20 = vrot.slane %v1347_v41, 2  ;;  %v1356_v24 = vrot.slane %v1344_v31, 2  ;;  %v1357_v43 = vrot.slane %v1346_v35, 2  ;;  %v3490_v40 = vpop.permute.xlu0 %1316 }
 0x859   :  { %v1364_v46 = vrot.slane %v1349_v21, 2  ;;  %v1362_v33 = vrot.slane %v1348_v1, 2  ;;  %4665 = vst [vmem:[#allocation112_spill] sm:$0xff] %v3490_v40  ;;  %v3505_v21 = vld [vmem:[#allocation2 + $0x10] sm:$0xff] }
 0x85a   :  { %v1361_v32 = vsel %vm1041_vm6, %v1359_v37, %v1360_v20  ;;  %v1358_v29 = vsel %vm1041_vm6, %v1356_v24, %v1357_v43 }
 0x85b   :  { %1368 = vrot.lane.b32.xlu1 %v1361_v32, %s2766_s24  ;;  %1366 = vrot.lane.b32.xlu0 %v1358_v29, %s2766_s24  ;;  %v1365_v39 = vsel %vm1041_vm6, %v1360_v20, %v1364_v46  ;;  %v1363_v34 = vsel %vm1041_vm6, %v1357_v43, %v1362_v33 }
 0x85c   :  { %v3492_v32 = vpop.permute.xlu0 %1320 }
 0x85d   :  { %4666 = vst [vmem:[#allocation113_spill] sm:$0xff] %v3492_v32 }
 0x85f   :  { %1372 = vrot.lane.b32.xlu1 %v1365_v39, %s2766_s24  ;;  %1370 = vrot.lane.b32.xlu0 %v1363_v34, %s2766_s24 }
 0x860   :  { %v3494_v29 = vpop.permute.xlu0 %1324 }
 0x861   :  { %4667 = vst [vmem:[#allocation114_spill] sm:$0xff] %v3494_v29 }
 0x863   :  { %1376 = vrot.lane.b32.xlu1 %v1364_v46, %s2766_s24  ;;  %1374 = vrot.lane.b32.xlu0 %v1362_v33, %s2766_s24 }
 0x867   :  { %1393 = vrot.lane.b32.xlu0 %v2611_v23, %s2763_s21 }
 0x8cd   :  { %v3496_v41 = vpop.permute.xlu0 %1366 }
 0x8ce   :  { %4668 = vst [vmem:[#allocation115_spill] sm:$0xff] %v3496_v41  ;;  %v2612_v41 = vld [vmem:[#allocation3 + $0x27] ss:$0 sm:$0xff] }
 0x8d1   :  { %v3498_v43 = vpop.permute.xlu0 %1370 }
 0x8d2   :  { %4669 = vst [vmem:[#allocation116_spill] sm:$0xff] %v3498_v43 }
 0x8d5   :  { %v3500_v31 = vpop.permute.xlu0 %1374 }
 0x8d6   :  { %4670 = vst [vmem:[#allocation117_spill] sm:$0xff] %v3500_v31 }
 0x8d9   :  { %v1394_v34 = vpop.permute.xlu0 %1393 }
 0x8da   :  { %v1397_v46 = vmul.f32 %v3434_v18, %v1394_v34  ;;  %v1399_v33 = vmul.f32 %v3437_v36, %v1394_v34  ;;  %v1396_v35 = vmul.f32 %v3471_v44, %v1394_v34  ;;  %v1398_v1 = vmul.f32 %v3505_v21, %v1394_v34 }
 0x8db   :  { %v1400_v37 = vmul.f32 %v3476_v62, %v1394_v34 }
 0x8dc   :  { %v1411_v20 = vrot.slane %v1397_v46, 2  ;;  %v1412_v24 = vrot.slane %v1399_v33, 2  ;;  %v1408_v39 = vrot.slane %v1396_v35, 2  ;;  %v1409_v23 = vrot.slane %v1398_v1, 2  ;;  %v2616_v46 = vld [vmem:[#allocation3 + $0x29] ss:$0 sm:$0xff] }
 0x8dd   :  { %v1414_v43 = vrot.slane %v1400_v37, 2  ;;  %v2615_v33 = vld [vmem:[#allocation3 + $0x10] ss:$0 sm:$0xff]  ;;  %v2618_v35 = vld [vmem:[#allocation3 + $0x2a] ss:$0 sm:$0xff] }
 0x8de   :  { %v1413_v32 = vsel %vm1041_vm6, %v1411_v20, %v1412_v24  ;;  %v1410_v31 = vsel %vm1041_vm6, %v1408_v39, %v1409_v23  ;;  %v2617_v1 = vld [vmem:[#allocation3 + $0x11] ss:$0 sm:$0xff]  ;;  %v2626_v37 = vld [vmem:[#allocation3 + $0x2e] ss:$0 sm:$0xff]  ;;  %v2625_v20 = vld [vmem:[#allocation3 + $0x15] ss:$0 sm:$0xff] }
 0x8df   :  { %1420 = vrot.lane.b32.xlu0 %v1413_v32, %s2767_s1  ;;  %1418 = vrot.lane.b32.xlu1 %v1410_v31, %s2767_s1  ;;  %v1415_v40 = vsel %vm1041_vm6, %v1409_v23, %v1414_v43  ;;  %v2620_v32 = vld [vmem:[#allocation3 + $0x2b] ss:$0 sm:$0xff]  ;;  %v2619_v31 = vld [vmem:[#allocation3 + $0x12] ss:$0 sm:$0xff]  ;;  %v2628_v39 = vld [vmem:[#allocation3 + $0x2f] ss:$0 sm:$0xff] }
 0x8e0   :  { %v2627_v23 = vld [vmem:[#allocation3 + $0x16] ss:$0 sm:$0xff] }
 0x8e3   :  { %1422 = vrot.lane.b32.xlu0 %v1415_v40, %s2767_s1  ;;  %1445 = vrot.lane.b32.xlu1 %v2612_v41, %s2763_s21  ;;  %v2622_v40 = vld [vmem:[#allocation3 + $0x2c] ss:$0 sm:$0xff]  ;;  %v2621_v41 = vld [vmem:[#allocation3 + $0x13] ss:$0 sm:$0xff] }
 0x8e7   :  { %1594 = vrot.lane.b32.xlu0 %v2616_v46, %s2761_s19  ;;  %1542 = vrot.lane.b32.xlu1 %v2615_v33, %s2761_s19  ;;  %v2630_v46 = vld [vmem:[#allocation3 + $0x30] ss:$0 sm:$0xff]  ;;  %v2629_v33 = vld [vmem:[#allocation3 + $0x17] ss:$0 sm:$0xff] }
 0x8eb   :  { %1698 = vrot.lane.b32.xlu0 %v2618_v35, %s2754_s14  ;;  %1646 = vrot.lane.b32.xlu1 %v2617_v1, %s2754_s14  ;;  %v1401_v35 = vmul.f32 %v3442_v57, %v1394_v34  ;;  %v2632_v1 = vld [vmem:[#allocation3 + $0x31] ss:$0 sm:$0xff]  ;;  %v3537_v34 = vpop.permute.xlu1 %1368 }
 0x8ec   :  { %4671 = vst [vmem:[#allocation118_spill] sm:$0xff] %v3537_v34 }
 0x8ef   :  { %1802 = vrot.lane.b32.xlu0 %v2620_v32, %s2762_s20  ;;  %1750 = vrot.lane.b32.xlu1 %v2619_v31, %s2762_s20  ;;  %v2631_v32 = vld [vmem:[#allocation3 + $0x18] ss:$0 sm:$0xff]  ;;  %v1416_v31 = vrot.slane %v1401_v35, 2 }
 0x8f3   :  { %1906 = vrot.lane.b32.xlu0 %v2622_v40, %s2763_s21  ;;  %1854 = vrot.lane.b32.xlu1 %v2621_v41, %s2763_s21  ;;  %v1417_v40 = vsel %vm1041_vm6, %v1412_v24, %v1416_v31  ;;  %v3539_v41 = vpop.permute.xlu1 %1372 }
 0x8f4   :  { %4672 = vst [vmem:[#allocation119_spill] sm:$0xff] %v3539_v41 }
 0x8f7   :  { %2055 = vrot.lane.b32.xlu0 %v2626_v37, %s2761_s19  ;;  %2003 = vrot.lane.b32.xlu1 %v2625_v20, %s2761_s19  ;;  %v3541_v37 = vpop.permute.xlu1 %1376 }
 0x8f8   :  { %4673 = vst [vmem:[#allocation120_spill] sm:$0xff] %v3541_v37 }
 0x8fb   :  { %2159 = vrot.lane.b32.xlu0 %v2628_v39, %s2754_s14  ;;  %2107 = vrot.lane.b32.xlu1 %v2627_v23, %s2754_s14 }
 0x8ff   :  { %2263 = vrot.lane.b32.xlu0 %v2630_v46, %s2762_s20  ;;  %2211 = vrot.lane.b32.xlu1 %v2629_v33, %s2762_s20 }
 0x903   :  { %2367 = vrot.lane.b32.xlu0 %v2632_v1, %s2763_s21  ;;  %2315 = vrot.lane.b32.xlu1 %v2631_v32, %s2763_s21 }
 0x907   :  { %1426 = vrot.lane.b32.xlu0 %v1414_v43, %s2767_s1  ;;  %1424 = vrot.lane.b32.xlu1 %v1417_v40, %s2767_s1 }
 0x90b   :  { %1428 = vrot.lane.b32.xlu1 %v1416_v31, %s2767_s1 }
 0x951   :  { %v3543_v20 = vpop.permute.xlu1 %1418  ;;  %v3553_v29 = vpop.permute.xlu0 %1420 }
 0x952   :  { %4674 = vst [vmem:[#allocation121_spill] sm:$0xff] %v3543_v20  ;;  %4675 = vst [vmem:[#allocation122_spill] sm:$0xff] %v3553_v29 }
 0x955   :  { %v1446_v39 = vpop.permute.xlu1 %1445 }
 0x956   :  { %v1449_v23 = vmul.f32 %v3434_v18, %v1446_v39  ;;  %v1451_v46 = vmul.f32 %v3437_v36, %v1446_v39  ;;  %v1448_v24 = vmul.f32 %v3471_v44, %v1446_v39  ;;  %v1450_v43 = vmul.f32 %v3505_v21, %v1446_v39 }
 0x957   :  { %v1453_v33 = vmul.f32 %v3442_v57, %v1446_v39  ;;  %v1452_v35 = vmul.f32 %v3476_v62, %v1446_v39 }
 0x958   :  { %v1463_v1 = vrot.slane %v1449_v23, 2  ;;  %v1464_v32 = vrot.slane %v1451_v46, 2  ;;  %v1460_v31 = vrot.slane %v1448_v24, 2  ;;  %v1461_v40 = vrot.slane %v1450_v43, 2 }
 0x959   :  { %v1468_v41 = vrot.slane %v1453_v33, 2  ;;  %v1466_v34 = vrot.slane %v1452_v35, 2  ;;  %v1543_v38 = vpop.permute.xlu1 %1542  ;;  %v3565_v35 = vpop.permute.xlu0 %1422 }
 0x95a   :  { %v1465_v37 = vsel %vm1041_vm6, %v1463_v1, %v1464_v32  ;;  %v1462_v20 = vsel %vm1041_vm6, %v1460_v31, %v1461_v40  ;;  %v1546_v5 = vmul.f32 %v3434_v18, %v1543_v38  ;;  %v1548_v39 = vmul.f32 %v3437_v36, %v1543_v38  ;;  %4676 = vst [vmem:[#allocation123_spill] sm:$0xff] %v3565_v35 }
 0x95b   :  { %1472 = vrot.lane.b32.xlu1 %v1465_v37, %s2767_s1  ;;  %1470 = vrot.lane.b32.xlu0 %v1462_v20, %s2767_s1  ;;  %v1469_v23 = vsel %vm1041_vm6, %v1464_v32, %v1468_v41  ;;  %v1467_v46 = vsel %vm1041_vm6, %v1461_v40, %v1466_v34  ;;  %v1545_v24 = vmul.f32 %v3471_v44, %v1543_v38 }
 0x95c   :  { %v1547_v43 = vmul.f32 %v3505_v21, %v1543_v38  ;;  %v1560_v33 = vrot.slane %v1546_v5, 3  ;;  %v1561_v37 = vrot.slane %v1548_v39, 3  ;;  %v1550_v31 = vmul.f32 %v3442_v57, %v1543_v38 }
 0x95d   :  { %v1557_v20 = vrot.slane %v1545_v24, 3  ;;  %v1549_v32 = vmul.f32 %v3476_v62, %v1543_v38  ;;  %v1595_v39 = vpop.permute.xlu0 %1594  ;;  %v1647_v12 = vpop.permute.xlu1 %1646 }
 0x95e   :  { %v1558_v1 = vrot.slane %v1547_v43, 3  ;;  %v1562_v40 = vsel %vm1502_vm7, %v1560_v33, %v1561_v37  ;;  %v1598_v24 = vmul.f32 %v3434_v18, %v1595_v39  ;;  %v1600_v38 = vmul.f32 %v3437_v36, %v1595_v39 }
 0x95f   :  { %1476 = vrot.lane.b32.xlu1 %v1469_v23, %s2767_s1  ;;  %1474 = vrot.lane.b32.xlu0 %v1467_v46, %s2767_s1  ;;  %v1565_v46 = vrot.slane %v1550_v31, 3  ;;  %v1563_v5 = vrot.slane %v1549_v32, 3  ;;  %v1597_v43 = vmul.f32 %v3471_v44, %v1595_v39  ;;  %v1599_v33 = vmul.f32 %v3505_v21, %v1595_v39 }
 0x960   :  { %v1559_v23 = vsel %vm1502_vm7, %v1557_v20, %v1558_v1  ;;  %v1612_v20 = vrot.slane %v1598_v24, 3  ;;  %v1613_v31 = vrot.slane %v1600_v38, 3  ;;  %v1601_v35 = vmul.f32 %v3476_v62, %v1595_v39 }
 0x961   :  { %v1609_v32 = vrot.slane %v1597_v43, 3  ;;  %v1650_v24 = vmul.f32 %v3434_v18, %v1647_v12  ;;  %v1652_v38 = vmul.f32 %v3437_v36, %v1647_v12 }
 0x963   :  { %1480 = vrot.lane.b32.xlu1 %v1468_v41, %s2767_s1  ;;  %1478 = vrot.lane.b32.xlu0 %v1466_v34, %s2767_s1  ;;  %v1566_v41 = vsel %vm1502_vm7, %v1561_v37, %v1565_v46  ;;  %v1564_v34 = vsel %vm1502_vm7, %v1558_v1, %v1563_v5  ;;  %v1614_v37 = vsel %vm1502_vm7, %v1612_v20, %v1613_v31  ;;  %v1665_v43 = vrot.slane %v1652_v38, 3 }
 0x967   :  { %1569 = vrot.lane.b32.xlu1 %v1562_v40, %s2764_s22  ;;  %1567 = vrot.lane.b32.xlu0 %v1559_v23, %s2764_s22  ;;  %v1610_v40 = vrot.slane %v1599_v33, 3  ;;  %v1602_v23 = vmul.f32 %v3442_v57, %v1595_v39 }
 0x969   :  { %v1611_v1 = vsel %vm1502_vm7, %v1609_v32, %v1610_v40  ;;  %v1617_v29 = vrot.slane %v1602_v23, 3  ;;  %v1654_v32 = vmul.f32 %v3442_v57, %v1647_v12  ;;  %v1653_v23 = vmul.f32 %v3476_v62, %v1647_v12 }
 0x96b   :  { %1573 = vrot.lane.b32.xlu1 %v1566_v41, %s2764_s22  ;;  %1571 = vrot.lane.b32.xlu0 %v1564_v34, %s2764_s22  ;;  %v1615_v41 = vrot.slane %v1601_v35, 3  ;;  %v1618_v39 = vsel %vm1502_vm7, %v1613_v31, %v1617_v29  ;;  %v1651_v34 = vmul.f32 %v3505_v21, %v1647_v12  ;;  %v1664_v35 = vrot.slane %v1650_v24, 3 }
 0x96d   :  { %v1662_v20 = vrot.slane %v1651_v34, 3  ;;  %v1666_v31 = vsel %vm1502_vm7, %v1664_v35, %v1665_v43 }
 0x96f   :  { %1577 = vrot.lane.b32.xlu1 %v1565_v46, %s2764_s22  ;;  %1575 = vrot.lane.b32.xlu0 %v1563_v5, %s2764_s22  ;;  %v1616_v46 = vsel %vm1502_vm7, %v1610_v40, %v1615_v41  ;;  %v1649_v5 = vmul.f32 %v3471_v44, %v1647_v12 }
 0x971   :  { %v1661_v33 = vrot.slane %v1649_v5, 3 }
 0x973   :  { %1621 = vrot.lane.b32.xlu1 %v1614_v37, %s2764_s22  ;;  %1619 = vrot.lane.b32.xlu0 %v1611_v1, %s2764_s22  ;;  %v1663_v40 = vsel %vm1502_vm7, %v1661_v33, %v1662_v20  ;;  %v1669_v37 = vrot.slane %v1654_v32, 3  ;;  %v1667_v1 = vrot.slane %v1653_v23, 3 }
 0x975   :  { %v1670_v12 = vsel %vm1502_vm7, %v1665_v43, %v1669_v37 }
 0x977   :  { %1625 = vrot.lane.b32.xlu1 %v1618_v39, %s2764_s22  ;;  %1623 = vrot.lane.b32.xlu0 %v1616_v46, %s2764_s22  ;;  %v1699_v39 = vpop.permute.xlu0 %1698 }
 0x978   :  { %v1702_v24 = vmul.f32 %v3434_v18, %v1699_v39  ;;  %v1704_v38 = vmul.f32 %v3437_v36, %v1699_v39  ;;  %v1703_v46 = vmul.f32 %v3505_v21, %v1699_v39  ;;  %v1706_v32 = vmul.f32 %v3442_v57, %v1699_v39 }
 0x979   :  { %v1705_v23 = vmul.f32 %v3476_v62, %v1699_v39 }
 0x97a   :  { %v1716_v5 = vrot.slane %v1702_v24, 3  ;;  %v1717_v34 = vrot.slane %v1704_v38, 3  ;;  %v1714_v33 = vrot.slane %v1703_v46, 3 }
 0x97b   :  { %1629 = vrot.lane.b32.xlu1 %v1617_v29, %s2764_s22  ;;  %1627 = vrot.lane.b32.xlu0 %v1615_v41, %s2764_s22  ;;  %v1668_v29 = vsel %vm1502_vm7, %v1662_v20, %v1667_v1  ;;  %v1701_v41 = vmul.f32 %v3471_v44, %v1699_v39 }
 0x97c   :  { %v1718_v43 = vsel %vm1502_vm7, %v1716_v5, %v1717_v34 }
 0x97d   :  { %v1713_v35 = vrot.slane %v1701_v41, 3 }
 0x97f   :  { %1673 = vrot.lane.b32.xlu1 %v1666_v31, %s2765_s23  ;;  %1671 = vrot.lane.b32.xlu0 %v1663_v40, %s2765_s23  ;;  %v1715_v20 = vsel %vm1502_vm7, %v1713_v35, %v1714_v33  ;;  %v1721_v31 = vrot.slane %v1706_v32, 3  ;;  %v1719_v40 = vrot.slane %v1705_v23, 3 }
 0x981   :  { %v1722_v39 = vsel %vm1502_vm7, %v1717_v34, %v1721_v31 }
 0x983   :  { %1677 = vrot.lane.b32.xlu1 %v1670_v12, %s2765_s23  ;;  %1675 = vrot.lane.b32.xlu0 %v1668_v29, %s2765_s23  ;;  %v1751_v12 = vpop.permute.xlu1 %1750 }
 0x984   :  { %v1754_v24 = vmul.f32 %v3434_v18, %v1751_v12  ;;  %v1756_v38 = vmul.f32 %v3437_v36, %v1751_v12  ;;  %v1755_v29 = vmul.f32 %v3505_v21, %v1751_v12  ;;  %v1758_v32 = vmul.f32 %v3442_v57, %v1751_v12 }
 0x985   :  { %v1757_v23 = vmul.f32 %v3476_v62, %v1751_v12 }
 0x986   :  { %v1768_v41 = vrot.slane %v1754_v24, 3  ;;  %v1769_v46 = vrot.slane %v1756_v38, 3  ;;  %v1766_v35 = vrot.slane %v1755_v29, 3 }
 0x987   :  { %1681 = vrot.lane.b32.xlu1 %v1669_v37, %s2765_s23  ;;  %1679 = vrot.lane.b32.xlu0 %v1667_v1, %s2765_s23  ;;  %v1720_v37 = vsel %vm1502_vm7, %v1714_v33, %v1719_v40  ;;  %v1753_v1 = vmul.f32 %v3471_v44, %v1751_v12 }
 0x988   :  { %v1770_v34 = vsel %vm1502_vm7, %v1768_v41, %v1769_v46 }
 0x989   :  { %v1765_v5 = vrot.slane %v1753_v1, 3 }
 0x98b   :  { %1725 = vrot.lane.b32.xlu1 %v1718_v43, %s2765_s23  ;;  %1723 = vrot.lane.b32.xlu0 %v1715_v20, %s2765_s23  ;;  %v1767_v33 = vsel %vm1502_vm7, %v1765_v5, %v1766_v35  ;;  %v1773_v43 = vrot.slane %v1758_v32, 3  ;;  %v1771_v20 = vrot.slane %v1757_v23, 3 }
 0x98d   :  { %v1774_v12 = vsel %vm1502_vm7, %v1769_v46, %v1773_v43 }
 0x98f   :  { %1729 = vrot.lane.b32.xlu1 %v1722_v39, %s2765_s23  ;;  %1727 = vrot.lane.b32.xlu0 %v1720_v37, %s2765_s23  ;;  %v1803_v39 = vpop.permute.xlu0 %1802 }
 0x990   :  { %v1806_v24 = vmul.f32 %v3434_v18, %v1803_v39  ;;  %v1808_v38 = vmul.f32 %v3437_v36, %v1803_v39  ;;  %v1807_v37 = vmul.f32 %v3505_v21, %v1803_v39  ;;  %v1810_v32 = vmul.f32 %v3442_v57, %v1803_v39 }
 0x991   :  { %v1809_v23 = vmul.f32 %v3476_v62, %v1803_v39 }
 0x992   :  { %v1820_v1 = vrot.slane %v1806_v24, 3  ;;  %v1821_v29 = vrot.slane %v1808_v38, 3  ;;  %v1818_v5 = vrot.slane %v1807_v37, 3 }
 0x993   :  { %1733 = vrot.lane.b32.xlu1 %v1721_v31, %s2765_s23  ;;  %1731 = vrot.lane.b32.xlu0 %v1719_v40, %s2765_s23  ;;  %v1772_v31 = vsel %vm1502_vm7, %v1766_v35, %v1771_v20  ;;  %v1805_v40 = vmul.f32 %v3471_v44, %v1803_v39 }
 0x994   :  { %v1822_v46 = vsel %vm1502_vm7, %v1820_v1, %v1821_v29 }
 0x995   :  { %v1817_v41 = vrot.slane %v1805_v40, 3 }
 0x997   :  { %1777 = vrot.lane.b32.xlu1 %v1770_v34, %s2766_s24  ;;  %1775 = vrot.lane.b32.xlu0 %v1767_v33, %s2766_s24  ;;  %v1819_v35 = vsel %vm1502_vm7, %v1817_v41, %v1818_v5  ;;  %v1825_v34 = vrot.slane %v1810_v32, 3  ;;  %v1823_v33 = vrot.slane %v1809_v23, 3 }
 0x999   :  { %v1826_v39 = vsel %vm1502_vm7, %v1821_v29, %v1825_v34 }
 0x99b   :  { %1781 = vrot.lane.b32.xlu1 %v1774_v12, %s2766_s24  ;;  %1779 = vrot.lane.b32.xlu0 %v1772_v31, %s2766_s24  ;;  %v1855_v12 = vpop.permute.xlu1 %1854 }
 0x99c   :  { %v1858_v24 = vmul.f32 %v3434_v18, %v1855_v12  ;;  %v1860_v38 = vmul.f32 %v3437_v36, %v1855_v12  ;;  %v1859_v31 = vmul.f32 %v3505_v21, %v1855_v12  ;;  %v1862_v32 = vmul.f32 %v3442_v57, %v1855_v12 }
 0x99d   :  { %v1861_v23 = vmul.f32 %v3476_v62, %v1855_v12 }
 0x99e   :  { %v1872_v40 = vrot.slane %v1858_v24, 3  ;;  %v1873_v37 = vrot.slane %v1860_v38, 3  ;;  %v1870_v41 = vrot.slane %v1859_v31, 3 }
 0x99f   :  { %1785 = vrot.lane.b32.xlu1 %v1773_v43, %s2766_s24  ;;  %1783 = vrot.lane.b32.xlu0 %v1771_v20, %s2766_s24  ;;  %v1824_v43 = vsel %vm1502_vm7, %v1818_v5, %v1823_v33  ;;  %v1857_v20 = vmul.f32 %v3471_v44, %v1855_v12  ;;  %v3665_v29 = vpop.permute.xlu1 %2003  ;;  %v1875_v24 = vrot.slane %v1861_v23, 3 }
 0x9a0   :  { %v1874_v5 = vsel %vm1502_vm7, %v1872_v40, %v1873_v37  ;;  %v2009_v28 = vmul.f32 %v3437_v36, %v3665_v29  ;;  %v2006_v30 = vmul.f32 %v3471_v44, %v3665_v29  ;;  %v2008_v27 = vmul.f32 %v3505_v21, %v3665_v29 }
 0x9a1   :  { %v1869_v1 = vrot.slane %v1857_v20, 3 }
 0x9a2   :  { %v2019_v13 = vrot.slane %v2008_v27, 4  ;;  %v3767_v27 = vmul.f32 %v3505_v21, %v2583_v47 }
 0x9a3   :  { %1829 = vrot.lane.b32.xlu1 %v1822_v46, %s2766_s24  ;;  %1827 = vrot.lane.b32.xlu0 %v1819_v35, %s2766_s24  ;;  %v1907_v46 = vpop.permute.xlu0 %1906  ;;  %v1871_v35 = vsel %vm1502_vm7, %v1869_v1, %v1870_v41  ;;  %v3677_v20 = vpop.permute.xlu1 %2107 }
 0x9a4   :  { %v1910_v38 = vmul.f32 %v3434_v18, %v1907_v46  ;;  %v1912_v12 = vmul.f32 %v3437_v36, %v1907_v46  ;;  %4677 = vst [vmem:[#allocation124_spill] sm:$0xff] %v3677_v20  ;;  %v1909_v31 = vmul.f32 %v3471_v44, %v1907_v46  ;;  %v1911_v40 = vmul.f32 %v3505_v21, %v1907_v46 }
 0x9a5   :  { %v1913_v48 = vmul.f32 %v3476_v62, %v1907_v46  ;;  %v2018_v20 = vrot.slane %v2006_v30, 4  ;;  %4685 = vst [vmem:[#allocation132_spill] sm:$0xff] %v3767_v27 }
 0x9a6   :  { %v1924_v1 = vrot.slane %v1910_v38, 3  ;;  %v1921_v23 = vrot.slane %v1909_v31, 3  ;;  %v2603_v38 = vld [vmem:[#allocation3 + $0xa] ss:$0 sm:$0xff] }
 0x9a7   :  { %1833 = vrot.lane.b32.xlu1 %v1826_v39, %s2766_s24  ;;  %1831 = vrot.lane.b32.xlu0 %v1824_v43, %s2766_s24  ;;  %v1877_v39 = vrot.slane %v1862_v32, 3  ;;  %v3675_v43 = vpop.permute.xlu0 %2055  ;;  %v1925_v32 = vrot.slane %v1912_v12, 3  ;;  %v1036_v16 = vmul.f32 %v3505_v21, %v2603_v38  ;;  %v3758_v26 = vmul.f32 %v3476_v62, %v2603_v38 }
 0x9a9   :  { %v1043_v27 = vrot.slane %v1036_v16, 2  ;;  %v263_v16 = vsel %vm262_vm9, %v3079_v49, %v2996_v56  ;;  %v2058_v56 = vmul.f32 %v3471_v44, %v3675_v43 }
 0x9ab   :  { %1837 = vrot.lane.b32.xlu1 %v1825_v34, %s2766_s24  ;;  %1835 = vrot.lane.b32.xlu0 %v1823_v33, %s2766_s24  ;;  %v1878_v34 = vsel %vm1502_vm7, %v1873_v37, %v1877_v39  ;;  %v1876_v33 = vsel %vm1502_vm7, %v1870_v41, %v1875_v24  ;;  %v3687_v17 = vpop.permute.xlu0 %2159  ;;  %v3689_v37 = vpop.permute.xlu1 %2211  ;;  %v1926_v41 = vsel %vm1502_vm7, %v1924_v1, %v1925_v32 }
 0x9ac   :  { %4678 = vst [vmem:[#allocation125_spill] sm:$0xff] %v3687_v17  ;;  %4679 = vst [vmem:[#allocation126_spill] sm:$0xff] %v3689_v37  ;;  %v2604_v37 = vld [vmem:[#allocation3 + $0x23] ss:$0 sm:$0xff]  ;;  %v3704_v17 = vld [vmem:[#allocation3 + $0xf] ss:$0 sm:$0xff] }
 0x9af   :  { %1881 = vrot.lane.b32.xlu1 %v1874_v5, %s2767_s1  ;;  %1879 = vrot.lane.b32.xlu0 %v1871_v35, %s2767_s1  ;;  %v1922_v5 = vrot.slane %v1911_v40, 3  ;;  %v1914_v35 = vmul.f32 %v3442_v57, %v1907_v46  ;;  %v1927_v40 = vrot.slane %v1913_v48, 3  ;;  %v3698_v46 = vmul.f32 %v3471_v44, %v2583_v47 }
 0x9b0   :  { %v3710_v48 = vmul.f32 %v3471_v44, %v2603_v38 }
 0x9b1   :  { %v1923_v12 = vsel %vm1502_vm7, %v1921_v23, %v1922_v5  ;;  %v1929_v31 = vrot.slane %v1914_v35, 3  ;;  %v3712_v35 = vpop.permute.xlu0 %2263  ;;  %v1928_v15 = vsel %vm1502_vm7, %v1922_v5, %v1927_v40  ;;  %v214_v5 = vmul.f32 %v3476_v62, %v2583_v47 }
 0x9b2   :  { %4680 = vst [vmem:[#allocation127_spill] sm:$0xff] %v3712_v35 }
 0x9b3   :  { %1885 = vrot.lane.b32.xlu1 %v1878_v34, %s2767_s1  ;;  %1883 = vrot.lane.b32.xlu0 %v1876_v33, %s2767_s1  ;;  %v2593_v34 = vld [vmem:[#allocation3 + $0x5] ss:$0 sm:$0xff]  ;;  %v2594_v33 = vld [vmem:[#allocation3 + $0x1e] ss:$0 sm:$0xff]  ;;  %v1930_v2 = vsel %vm1502_vm7, %v1925_v32, %v1929_v31  ;;  %v3734_v32 = vmul.f32 %v3471_v44, %v3704_v17 }
 0x9b4   :  { %v3702_v1 = vmul.f32 %v3471_v44, %v2594_v33  ;;  %v575_v35 = vmul.f32 %v3505_v21, %v2593_v34  ;;  %v3738_v25 = vmul.f32 %v3476_v62, %v2593_v34 }
 0x9b5   :  { %4682 = vst [vmem:[#allocation129_spill] sm:$0xff] %v3734_v32  ;;  %v3747_v32 = vmul.f32 %v3442_v57, %v3665_v29 }
 0x9b6   :  { %v603_v6 = vrot.slane %v3702_v1, 1  ;;  %v3754_v1 = vmul.f32 %v3476_v62, %v2594_v33 }
 0x9b7   :  { %1889 = vrot.lane.b32.xlu1 %v1877_v39, %s2767_s1  ;;  %1887 = vrot.lane.b32.xlu0 %v1875_v24, %s2767_s1  ;;  %v2584_v39 = vld [vmem:[#allocation3 + $0x19] ss:$0 sm:$0xff]  ;;  %v574_v24 = vmul.f32 %v3471_v44, %v2593_v34  ;;  %v582_v34 = vrot.slane %v575_v35, 1  ;;  %v3772_v35 = vmul.f32 %v3505_v21, %v2604_v37  ;;  %v2026_v47 = vrot.slane %v3747_v32, 4 }
 0x9b8   :  { %v3707_v23 = vmul.f32 %v3471_v44, %v2584_v39  ;;  %v3742_v11 = vmul.f32 %v3476_v62, %v2584_v39  ;;  %v3775_v38 = vmul.f32 %v3505_v21, %v2584_v39  ;;  %v4564_v39 = vrot.slane %v3758_v26, 2 }
 0x9b9   :  { %v581_v61 = vrot.slane %v574_v24, 1  ;;  %v3751_v24 = vmul.f32 %v3476_v62, %v3665_v29  ;;  %v265_v32 = vsel %vm262_vm9, %v3081_v50, %v3000_v59  ;;  %v2060_v59 = vmul.f32 %v3505_v21, %v3675_v43 }
 0x9bb   :  { %1933 = vrot.lane.b32.xlu1 %v1926_v41, %s2767_s1  ;;  %1931 = vrot.lane.b32.xlu0 %v1923_v12, %s2767_s1  ;;  %v3714_v41 = vpop.permute.xlu1 %2315  ;;  %v2007_v12 = vmul.f32 %v3434_v18, %v3665_v29  ;;  %v2024_v29 = vrot.slane %v3751_v24, 4 }
 0x9bc   :  { %4681 = vst [vmem:[#allocation128_spill] sm:$0xff] %v3714_v41  ;;  %v3728_v41 = vmul.f32 %v3471_v44, %v2604_v37 }
 0x9bd   :  { %v2021_v45 = vrot.slane %v2007_v12, 4 }
 0x9bf   :  { %1937 = vrot.lane.b32.xlu1 %v1930_v2, %s2767_s1  ;;  %1935 = vrot.lane.b32.xlu0 %v1928_v15, %s2767_s1  ;;  %v598_v2 = vmul.f32 %v3505_v21, %v2594_v33  ;;  %v2022_v15 = vrot.slane %v2009_v28, 4  ;;  %v3760_v28 = vpop.permute.xlu0 %2367  ;;  %v3762_v30 = vpop.permute.xlu1 %1424  ;;  %v1042_v33 = vrot.slane %v3710_v48, 2  ;;  %v3783_v48 = vsel %vm580_vm5, %v581_v61, %v582_v34 }
 0x9c0   :  { %4683 = vst [vmem:[#allocation130_spill] sm:$0xff] %v3760_v28  ;;  %4684 = vst [vmem:[#allocation131_spill] sm:$0xff] %v3762_v30  ;;  %v1064_v30 = vrot.slane %v3728_v41, 2  ;;  %v606_v28 = vrot.slane %v3754_v1, 1  ;;  %v3796_v61 = vmul.f32 %v3476_v62, %v2604_v37  ;;  %v305_v41 = vsel %vm262_vm9, %v3020_v7, %v3034_v14 }
 0x9c1   :  { %v604_v12 = vrot.slane %v598_v2, 1  ;;  %v2027_v37 = vsel %vm1963_vm8, %v2022_v15, %v2026_v47  ;;  %v3853_v7 = vmul.f32 %v3442_v57, %v3675_v43  ;;  %v4687_v14 = vrot.slane %v3772_v35, 2 }
 0x9c3   :  { %1941 = vrot.lane.b32.xlu1 %v1929_v31, %s2767_s1  ;;  %1939 = vrot.lane.b32.xlu0 %v1927_v40, %s2767_s1  ;;  %v2023_v31 = vsel %vm1963_vm8, %v2021_v45, %v2022_v15  ;;  %v2020_v40 = vsel %vm1963_vm8, %v2018_v20, %v2019_v13  ;;  %v4686_v45 = vrot.slane %v3738_v25, 1  ;;  %v3804_v2 = vpop.permute.xlu0 %1426  ;;  %v3806_v24 = vpop.permute.xlu1 %1428  ;;  %v3821_v49 = vsel %vm580_vm5, %v603_v6, %v604_v12 }
 0x9c4   :  { %v3826_v50 = vsel %vm580_vm5, %v604_v12, %v606_v28  ;;  %v271_v15 = vadd.f32 %v265_v32, %v214_v5  ;;  %v348_v6 = vsel %vm347_vm10, %v3083_v51, %v3002_v60  ;;  %v307_v12 = vsel %vm262_vm9, %v3022_v8, %v3044_v19 }
 0x9c5   :  { %v3792_v20 = vsel %vm580_vm5, %v582_v34, %v4686_v45  ;;  %v2059_v34 = vmul.f32 %v3434_v18, %v3675_v43  ;;  %v3829_v45 = vsel %vm1041_vm6, %v1042_v33, %v1043_v27  ;;  %v350_v33 = vsel %vm347_vm10, %v3085_v52, %v3006_v63 }
 0x9c6   :  { %v2070_v60 = vrot.slane %v2058_v56, 4  ;;  %v2071_v51 = vrot.slane %v2060_v59, 4  ;;  %v3857_v63 = vmul.f32 %v3476_v62, %v3675_v43  ;;  %v3862_v8 = vsel %vm1041_vm6, %v1043_v27, %v4564_v39  ;;  %v4748_v39 = vld [vmem:[#allocation61_spill] sm:$0xff] }
 0x9c7   :  { %2030 = vrot.lane.b32.xlu1 %v2023_v31, %s2764_s22  ;;  %2028 = vrot.lane.b32.xlu0 %v2020_v40, %s2764_s22  ;;  %v3812_v31 = vmul.f32 %v3437_v36, %v3675_v43  ;;  %v2025_v40 = vsel %vm1963_vm8, %v2019_v13, %v2024_v29  ;;  %v269_v13 = vadd.f32 %v263_v16, %v3698_v46  ;;  %v2073_v5 = vrot.slane %v2059_v34, 4 }
 0x9c8   :  { %v3867_v19 = vsel %vm1041_vm6, %v1064_v30, %v4687_v14  ;;  %v3873_v52 = vmul.f32 %v3505_v21, %v3704_v17  ;;  %v311_v32 = vadd.f32 %v305_v41, %v3707_v23  ;;  %v356_v34 = vadd.f32 %v350_v33, %v271_v15  ;;  %v4690_v33 = vld [vmem:[#allocation18_spill] sm:$0xff] }
 0x9c9   :  { %v2074_v16 = vrot.slane %v3812_v31, 4  ;;  %v354_v43 = vadd.f32 %v348_v6, %v269_v13  ;;  %v433_v27 = vsel %vm432_vm11, %v3087_v53, %v3008_v0  ;;  %v3879_v31 = vld [vmem:[#allocation3 + $0x28] ss:$0 sm:$0xff]  ;;  %v313_v30 = vadd.f32 %v307_v12, %v3742_v11  ;;  %v4689_v6 = vld [vmem:[#allocation20_spill] sm:$0xff] }
 0x9ca   :  { %v392_v23 = vsel %vm347_vm10, %v3026_v10, %v3064_v42  ;;  %v2072_v11 = vsel %vm1963_vm8, %v2070_v60, %v2071_v51  ;;  %v2078_v53 = vrot.slane %v3853_v7, 4  ;;  %v3907_v10 = vmul.f32 %v3471_v44, %v3879_v31  ;;  %v4688_v13 = vld [vmem:[#allocation30_spill] sm:$0xff]  ;;  %v4691_v60 = vld [vmem:[#allocation124_spill] sm:$0xff] }
 0x9cb   :  { %2034 = vrot.lane.b32.xlu1 %v2027_v37, %s2764_s22  ;;  %2032 = vrot.lane.b32.xlu0 %v2025_v40, %s2764_s22  ;;  %v2075_v0 = vsel %vm1963_vm8, %v2073_v5, %v2074_v16  ;;  %v398_v56 = vadd.f32 %v392_v23, %v313_v30  ;;  %v518_v59 = vsel %vm517_vm12, %v3091_v55, %v3014_v4  ;;  %v4695_v30 = vld [vmem:[#allocation29_spill] sm:$0xff]  ;;  %v4698_v23 = vld [vmem:[#allocation31_spill] sm:$0xff] }
 0x9cc   :  { %v264_v15 = vsel %vm262_vm9, %v4688_v13, %v2998_v58  ;;  %v2111_v7 = vmul.f32 %v3434_v18, %v4691_v60  ;;  %v2079_v4 = vsel %vm1963_vm8, %v2074_v16, %v2078_v53  ;;  %v2110_v58 = vmul.f32 %v3471_v44, %v4691_v60  ;;  %v4694_v18 = vld [vmem:[#allocation15_spill] sm:$0xff]  ;;  %v4696_v16 = vld [vmem:[#allocation132_spill] sm:$0xff]  ;;  %v4701_v13 = vld [vmem:[#allocation13_spill] sm:$0xff] }
 0x9cd   :  { %v3846_v37 = vpop.permute.xlu0 %1470  ;;  %v3848_v46 = vpop.permute.xlu1 %1472  ;;  %v2112_v14 = vmul.f32 %v3505_v21, %v4691_v60 }
 0x9cf   :  { %2038 = vrot.lane.b32.xlu1 %v2026_v47, %s2764_s22  ;;  %2036 = vrot.lane.b32.xlu0 %v2024_v29, %s2764_s22  ;;  %v390_v29 = vsel %vm347_vm10, %v3024_v9, %v3048_v22  ;;  %v435_v47 = vsel %vm432_vm11, %v3089_v54, %v3012_v3  ;;  %v2076_v9 = vrot.slane %v3857_v63, 4  ;;  %v439_v22 = vadd.f32 %v433_v27, %v354_v43 }
 0x9d0   :  { %v3903_v3 = vmul.f32 %v3476_v62, %v3704_v17  ;;  %v396_v42 = vadd.f32 %v390_v29, %v311_v32  ;;  %v441_v54 = vadd.f32 %v435_v47, %v356_v34  ;;  %v306_v17 = vsel %vm262_vm9, %v4690_v33, %v4689_v6  ;;  %v4692_v32 = vld [vmem:[#allocation26_spill] sm:$0xff]  ;;  %v4693_v34 = vld [vmem:[#allocation16_spill] sm:$0xff] }
 0x9d1   :  { %v3891_v41 = vpop.permute.xlu0 %1474  ;;  %v3893_v40 = vpop.permute.xlu1 %1476  ;;  %v3926_v63 = vmul.f32 %v3437_v36, %v4691_v60  ;;  %v2077_v55 = vsel %vm1963_vm8, %v2071_v51, %v2076_v9  ;;  %v524_v43 = vadd.f32 %v518_v59, %v439_v22  ;;  %v475_v27 = vsel %vm432_vm11, %v4693_v34, %v4692_v32  ;;  %v4697_v47 = vld [vmem:[#allocation12_spill] sm:$0xff]  ;;  %v4700_v22 = vld [vmem:[#allocation19_spill] sm:$0xff] }
 0x9d2   :  { %v520_v36 = vsel %vm517_vm12, %v4695_v30, %v4694_v18  ;;  %v270_v51 = vadd.f32 %v264_v15, %v4696_v16  ;;  %v312_v29 = vadd.f32 %v306_v17, %v3775_v38  ;;  %v4702_v6 = vld [vmem:[#allocation32_spill] sm:$0xff]  ;;  %v4703_v32 = vld [vmem:[#allocation27_spill] sm:$0xff]  ;;  %v2125_v38 = vrot.slane %v2111_v7, 4 }
 0x9d3   :  { %2082 = vrot.lane.b32.xlu1 %v2075_v0, %s2764_s22  ;;  %2080 = vrot.lane.b32.xlu0 %v2072_v11, %s2764_s22  ;;  %v349_v0 = vsel %vm347_vm10, %v4698_v23, %v4697_v47  ;;  %v4699_v11 = vld [vmem:[#allocation25_spill] sm:$0xff]  ;;  %v434_v33 = vsel %vm432_vm11, %v4702_v6, %v4701_v13  ;;  %v2126_v17 = vrot.slane %v3926_v63, 4  ;;  %v2122_v18 = vrot.slane %v2110_v58, 4  ;;  %v4707_v63 = vld [vmem:[#allocation28_spill] sm:$0xff] }
 0x9d4   :  { %v391_v59 = vsel %vm347_vm10, %v4700_v22, %v4699_v11  ;;  %v2123_v30 = vrot.slane %v2112_v14, 4  ;;  %v3963_v16 = vmul.f32 %v3442_v57, %v4691_v60  ;;  %v3967_v47 = vmul.f32 %v3476_v62, %v4691_v60  ;;  %v4708_v58 = vld [vmem:[#allocation17_spill] sm:$0xff]  ;;  %v4709_v57 = vld [vmem:[#allocation14_spill] sm:$0xff] }
 0x9d5   :  { %v3918_v12 = vpop.permute.xlu0 %1478  ;;  %v3920_v5 = vpop.permute.xlu1 %1480  ;;  %v481_v23 = vadd.f32 %v475_v27, %v396_v42  ;;  %v355_v11 = vadd.f32 %v349_v0, %v270_v51  ;;  %v397_v22 = vadd.f32 %v391_v59, %v312_v29  ;;  %v4563_v13 = vrot.slane %v3796_v61, 2  ;;  %v4710_v6 = vld [vmem:[#allocation33_spill] sm:$0xff]  ;;  %v4711_v60 = vld [vmem:[#allocation34_spill] sm:$0xff]  ;;  %v4713_v29 = vld [vmem:[#allocation35_spill] sm:$0xff] }
 0x9d6   :  { %v526_v7 = vadd.f32 %v520_v36, %v441_v54  ;;  %v477_v14 = vsel %vm432_vm11, %v4708_v58, %v4707_v63  ;;  %v4714_v0 = vld [vmem:[#allocation23_spill] sm:$0xff]  ;;  %v4716_v54 = vld [vmem:[#allocation24_spill] sm:$0xff]  ;;  %v2127_v58 = vsel %vm1963_vm8, %v2125_v38, %v2126_v17 }
 0x9d7   :  { %2086 = vrot.lane.b32.xlu1 %v2079_v4, %s2764_s22  ;;  %2084 = vrot.lane.b32.xlu0 %v2077_v55, %s2764_s22  ;;  %v4704_v4 = vld [vmem:[#allocation21_spill] sm:$0xff]  ;;  %v440_v27 = vadd.f32 %v434_v33, %v355_v11  ;;  %v2128_v33 = vrot.slane %v3967_v47, 4  ;;  %v589_v47 = vadd.f32 %v3783_v48, %v524_v43 }
 0x9d8   :  { %v476_v55 = vsel %vm432_vm11, %v4704_v4, %v4703_v32  ;;  %v519_v32 = vsel %vm517_vm12, %v4710_v6, %v4709_v57  ;;  %v4712_v4 = vld [vmem:[#allocation22_spill] sm:$0xff]  ;;  %v2124_v57 = vsel %vm1963_vm8, %v2122_v18, %v2123_v30  ;;  %v2130_v6 = vrot.slane %v3963_v16, 4 }
 0x9d9   :  { %v3956_v34 = vpop.permute.xlu0 %1567  ;;  %v3958_v15 = vpop.permute.xlu1 %1569  ;;  %v560_v42 = vsel %vm517_vm12, %v4712_v4, %v4711_v60  ;;  %v482_v51 = vadd.f32 %v476_v55, %v397_v22  ;;  %v483_v55 = vadd.f32 %v477_v14, %v398_v56  ;;  %v525_v11 = vadd.f32 %v519_v32, %v440_v27  ;;  %v4017_v32 = vld [vmem:[#allocation2 + $0x8] sm:$0xff]  ;;  %v4021_v27 = vld [vmem:[#allocation2 + $0x18] sm:$0xff] }
 0x9da   :  { %4705 = vst [vmem:[#allocation30_spill] sm:$0xff] %v3956_v34  ;;  %4706 = vst [vmem:[#allocation20_spill] sm:$0xff] %v3958_v15  ;;  %v566_v22 = vadd.f32 %v560_v42, %v481_v23  ;;  %v4719_v4 = vrot.slane %v3772_v35, 2  ;;  %v4006_v18 = vmul.f32 %v3505_v21, %v3879_v31  ;;  %v4010_v56 = vmul.f32 %v3476_v62, %v3879_v31  ;;  %v4720_v35 = vld [vmem:[#allocation125_spill] sm:$0xff]  ;;  %v4765_v34 = vld [vmem:[#allocation74_spill] sm:$0xff] }
 0x9db   :  { %2090 = vrot.lane.b32.xlu1 %v2078_v53, %s2764_s22  ;;  %2088 = vrot.lane.b32.xlu0 %v2076_v9, %s2764_s22  ;;  %v561_v53 = vsel %vm517_vm12, %v4714_v0, %v4713_v29  ;;  %v4715_v9 = vld [vmem:[#allocation36_spill] sm:$0xff]  ;;  %v2163_v42 = vmul.f32 %v4017_v32, %v4720_v35  ;;  %v2131_v31 = vsel %vm1963_vm8, %v2126_v17, %v2130_v6 }
 0x9dc   :  { %v562_v36 = vsel %vm517_vm12, %v4716_v54, %v4715_v9  ;;  %v567_v60 = vadd.f32 %v561_v53, %v482_v51  ;;  %v4002_v38 = vsel %vm1041_vm6, %v4719_v4, %v4563_v13  ;;  %v2165_v51 = vmul.f32 %v4021_v27, %v4720_v35  ;;  %v4722_v17 = vld [vmem:[#allocation40_spill] sm:$0xff]  ;;  %v4746_v13 = vld [vmem:[#allocation57_spill] sm:$0xff] }
 0x9dd   :  { %v3987_v59 = vpop.permute.xlu0 %1571  ;;  %v3989_v63 = vpop.permute.xlu1 %1573  ;;  %v568_v16 = vadd.f32 %v562_v36, %v483_v55  ;;  %v2129_v29 = vsel %vm1963_vm8, %v2123_v30, %v2128_v33  ;;  %v2162_v48 = vmul.f32 %v3471_v44, %v4720_v35  ;;  %v2164_v43 = vmul.f32 %v3505_v21, %v4720_v35  ;;  %v4723_v36 = vld [vmem:[#allocation37_spill] sm:$0xff]  ;;  %v4725_v44 = vld [vmem:[#allocation38_spill] sm:$0xff]  ;;  %v4727_v55 = vld [vmem:[#allocation39_spill] sm:$0xff] }
 0x9de   :  { %4717 = vst [vmem:[#allocation18_spill] sm:$0xff] %v3987_v59  ;;  %4718 = vst [vmem:[#allocation124_spill] sm:$0xff] %v3989_v63  ;;  %v590_v0 = vadd.f32 %v3792_v20, %v525_v11  ;;  %v4721_v53 = vrot.slane %v3738_v25, 1  ;;  %v611_v54 = vadd.f32 %v3821_v49, %v566_v22  ;;  %v657_v30 = vsel %vm262_vm9, %v4723_v36, %v4722_v17  ;;  %v4726_v21 = vld [vmem:[#allocation42_spill] sm:$0xff]  ;;  %v4729_v49 = vld [vmem:[#allocation43_spill] sm:$0xff] }
 0x9df   :  { %2134 = vrot.lane.b32.xlu1 %v2127_v58, %s2765_s23  ;;  %2132 = vrot.lane.b32.xlu0 %v2124_v57, %s2765_s23  ;;  %v4724_v58 = vld [vmem:[#allocation41_spill] sm:$0xff]  ;;  %v659_v20 = vsel %vm262_vm9, %v4727_v55, %v4726_v21  ;;  %v612_v25 = vadd.f32 %v3826_v50, %v567_v60  ;;  %v613_v22 = vadd.f32 %v606_v28, %v568_v16  ;;  %v2178_v36 = vrot.slane %v2165_v51, 4  ;;  %v4731_v21 = vld [vmem:[#allocation44_spill] sm:$0xff] }
 0x9e0   :  { %v591_v9 = vadd.f32 %v4721_v53, %v526_v7  ;;  %v658_v57 = vsel %vm262_vm9, %v4725_v44, %v4724_v58  ;;  %v4728_v7 = vld [vmem:[#allocation46_spill] sm:$0xff]  ;;  %v4056_v53 = vld [vmem:[#allocation2 + $0x28] sm:$0x1f]  ;;  %v2174_v50 = vrot.slane %v2162_v48, 4  ;;  %v2175_v60 = vrot.slane %v2164_v43, 4  ;;  %v4730_v44 = vld [vmem:[#allocation47_spill] sm:$0xff] }
 0x9e1   :  { %v4013_v23 = vpop.permute.xlu0 %1575  ;;  %v4015_v14 = vpop.permute.xlu1 %1577  ;;  %v709_v11 = vsel %vm262_vm9, %v4729_v49, %v4728_v7  ;;  %v4060_v17 = vmul.f32 %v4056_v53, %v4720_v35  ;;  %v4064_v58 = vmul.f32 %v3476_v62, %v4720_v35  ;;  %v663_v1 = vadd.f32 %v657_v30, %v589_v47  ;;  %v4732_v7 = vld [vmem:[#allocation48_spill] sm:$0xff]  ;;  %v4733_v51 = vld [vmem:[#allocation45_spill] sm:$0xff]  ;;  %v4737_v35 = vld [vmem:[#allocation50_spill] sm:$0xff] }
 0x9e2   :  { %v664_v28 = vadd.f32 %v658_v57, %v590_v0  ;;  %v665_v16 = vadd.f32 %v659_v20, %v591_v9  ;;  %v710_v55 = vsel %vm262_vm9, %v4731_v21, %v4730_v44  ;;  %v711_v48 = vsel %vm262_vm9, %v4733_v51, %v4732_v7  ;;  %v4734_v43 = vld [vmem:[#allocation52_spill] sm:$0xff]  ;;  %v4735_v49 = vld [vmem:[#allocation49_spill] sm:$0xff]  ;;  %v4739_v9 = vld [vmem:[#allocation51_spill] sm:$0xff] }
 0x9e3   :  { %2138 = vrot.lane.b32.xlu1 %v2131_v31, %s2765_s23  ;;  %2136 = vrot.lane.b32.xlu0 %v2129_v29, %s2765_s23  ;;  %v2177_v29 = vrot.slane %v2163_v42, 4  ;;  %v715_v42 = vadd.f32 %v709_v11, %v611_v54  ;;  %v761_v62 = vsel %vm347_vm10, %v4735_v49, %v4734_v43  ;;  %v4736_v47 = vld [vmem:[#allocation53_spill] sm:$0xff]  ;;  %v4740_v54 = vld [vmem:[#allocation58_spill] sm:$0xff]  ;;  %v4741_v30 = vld [vmem:[#allocation55_spill] sm:$0xff]  ;;  %v2176_v43 = vsel %vm1963_vm8, %v2174_v50, %v2175_v60 }
 0x9e4   :  { %v762_v0 = vsel %vm347_vm10, %v4737_v35, %v4736_v47  ;;  %v813_v57 = vsel %vm347_vm10, %v4741_v30, %v4740_v54  ;;  %v4742_v20 = vld [vmem:[#allocation59_spill] sm:$0xff]  ;;  %v4743_v11 = vld [vmem:[#allocation56_spill] sm:$0xff]  ;;  %v2182_v49 = vrot.slane %v4060_v17, 4  ;;  %v2180_v47 = vrot.slane %v4064_v58, 4  ;;  %v4764_v63 = vld [vmem:[#allocation77_spill] sm:$0xff] }
 0x9e5   :  { %v4052_v4 = vpop.permute.xlu0 %1619  ;;  %v4054_v31 = vpop.permute.xlu1 %1621  ;;  %v814_v44 = vsel %vm347_vm10, %v4743_v11, %v4742_v20  ;;  %v2179_v51 = vsel %vm1963_vm8, %v2177_v29, %v2178_v36  ;;  %v716_v35 = vadd.f32 %v710_v55, %v612_v25  ;;  %v768_v30 = vadd.f32 %v762_v0, %v664_v28  ;;  %v4745_v11 = vld [vmem:[#allocation60_spill] sm:$0xff]  ;;  %v4751_v55 = vld [vmem:[#allocation126_spill] sm:$0xff]  ;;  %v4757_v54 = vld [vmem:[#allocation67_spill] sm:$0xff] }
 0x9e6   :  { %v815_v29 = vsel %vm347_vm10, %v4746_v13, %v4745_v11  ;;  %v4747_v50 = vld [vmem:[#allocation64_spill] sm:$0xff]  ;;  %v819_v58 = vadd.f32 %v813_v57, %v715_v42  ;;  %v4114_v28 = vmul.f32 %v4021_v27, %v4751_v55  ;;  %v2181_v13 = vsel %vm1963_vm8, %v2175_v60, %v2180_v47  ;;  %v4122_v42 = vld [vmem:[#allocation2 + $0x10] sm:$0xff]  ;;  %v4754_v60 = vld [vmem:[#allocation66_spill] sm:$0xff] }
 0x9e7   :  { %2142 = vrot.lane.b32.xlu1 %v2130_v6, %s2765_s23  ;;  %2140 = vrot.lane.b32.xlu0 %v2128_v33, %s2765_s23  ;;  %v4738_v6 = vld [vmem:[#allocation54_spill] sm:$0xff]  ;;  %v865_v17 = vsel %vm432_vm11, %v4748_v39, %v4747_v50  ;;  %v820_v25 = vadd.f32 %v814_v44, %v716_v35  ;;  %v2216_v0 = vmul.f32 %v4122_v42, %v4751_v55  ;;  %v4752_v44 = vld [vmem:[#allocation65_spill] sm:$0xff]  ;;  %v4755_v35 = vld [vmem:[#allocation63_spill] sm:$0xff] }
 0x9e8   :  { %v763_v33 = vsel %vm347_vm10, %v4739_v9, %v4738_v6  ;;  %v717_v6 = vadd.f32 %v711_v48, %v613_v22  ;;  %v767_v9 = vadd.f32 %v761_v62, %v663_v1  ;;  %v2215_v48 = vmul.f32 %v4017_v32, %v4751_v55  ;;  %v4118_v62 = vld [vmem:[#allocation2] sm:$0xff]  ;;  %v4756_v50 = vld [vmem:[#allocation70_spill] sm:$0xff] }
 0x9e9   :  { %v4089_v21 = vpop.permute.xlu0 %1623  ;;  %v4091_v7 = vpop.permute.xlu1 %1625  ;;  %v769_v20 = vadd.f32 %v763_v33, %v665_v16  ;;  %v2183_v16 = vsel %vm1963_vm8, %v2178_v36, %v2182_v49  ;;  %v2214_v39 = vmul.f32 %v4118_v62, %v4751_v55  ;;  %v1526_v36 = vrot.slane %v4006_v18, 3 }
 0x9ea   :  { %4744 = vst [vmem:[#allocation26_spill] sm:$0xff] %v4089_v21  ;;  %v821_v33 = vadd.f32 %v815_v29, %v717_v6  ;;  %v871_v57 = vadd.f32 %v865_v17, %v767_v9  ;;  %v867_v11 = vsel %vm432_vm11, %v4755_v35, %v4754_v60  ;;  %v917_v59 = vsel %vm432_vm11, %v4757_v54, %v4756_v50  ;;  %v4758_v6 = vld [vmem:[#allocation71_spill] sm:$0xff]  ;;  %v4759_v9 = vld [vmem:[#allocation68_spill] sm:$0xff] }
 0x9eb   :  { %2186 = vrot.lane.b32.xlu1 %v2179_v51, %s2765_s23  ;;  %2184 = vrot.lane.b32.xlu0 %v2176_v43, %s2765_s23  ;;  %v4753_v51 = vld [vmem:[#allocation62_spill] sm:$0xff]  ;;  %v918_v29 = vsel %vm432_vm11, %v4759_v9, %v4758_v6  ;;  %v4760_v17 = vld [vmem:[#allocation72_spill] sm:$0xff]  ;;  %v970_v60 = vsel %vm517_vm12, %v4765_v34, %v4764_v63  ;;  %v2229_v54 = vrot.slane %v2215_v48, 4  ;;  %v2230_v50 = vrot.slane %v4114_v28, 4 }
 0x9ec   :  { %v866_v43 = vsel %vm432_vm11, %v4753_v51, %v4752_v44  ;;  %v4761_v44 = vld [vmem:[#allocation69_spill] sm:$0xff]  ;;  %v4762_v51 = vld [vmem:[#allocation76_spill] sm:$0xff]  ;;  %v2226_v6 = vrot.slane %v2214_v39, 4  ;;  %v2227_v9 = vrot.slane %v2216_v0, 4  ;;  %v873_v63 = vadd.f32 %v867_v11, %v769_v20  ;;  %v4768_v28 = vld [vmem:[#allocation78_spill] sm:$0xff] }
 0x9ed   :  { %v4106_v22 = vpop.permute.xlu0 %1627  ;;  %v4108_v1 = vpop.permute.xlu1 %1629  ;;  %v919_v18 = vsel %vm432_vm11, %v4761_v44, %v4760_v17  ;;  %v4157_v17 = vmul.f32 %v4056_v53, %v4751_v55  ;;  %v4159_v44 = vld [vmem:[#allocation2 + $0x20] sm:$0x1f]  ;;  %v872_v34 = vadd.f32 %v866_v43, %v768_v30  ;;  %v4773_v21 = vld [vmem:[#allocation80_spill] sm:$0xff] }
 0x9ee   :  { %4749 = vst [vmem:[#allocation16_spill] sm:$0xff] %v4106_v22  ;;  %4750 = vst [vmem:[#allocation15_spill] sm:$0xff] %v4108_v1  ;;  %v4769_v39 = vld [vmem:[#allocation75_spill] sm:$0xff]  ;;  %v925_v20 = vadd.f32 %v919_v18, %v821_v33  ;;  %v4774_v43 = vld [vmem:[#allocation84_spill] sm:$0xff] }
 0x9ef   :  { %2190 = vrot.lane.b32.xlu1 %v2183_v16, %s2765_s23  ;;  %2188 = vrot.lane.b32.xlu0 %v2181_v13, %s2765_s23  ;;  %v4763_v16 = vld [vmem:[#allocation73_spill] sm:$0xff]  ;;  %v971_v0 = vsel %vm517_vm12, %v4769_v39, %v4768_v28  ;;  %v4771_v22 = vld [vmem:[#allocation79_spill] sm:$0xff]  ;;  %v2228_v28 = vsel %vm1963_vm8, %v2226_v6, %v2227_v9  ;;  %v4778_v39 = vrot.slane %v3758_v26, 2 }
 0x9f0   :  { %v969_v13 = vsel %vm517_vm12, %v4763_v16, %v4762_v51  ;;  %v4163_v51 = vmul.f32 %v4159_v44, %v4751_v55  ;;  %v923_v16 = vadd.f32 %v917_v59, %v819_v58  ;;  %v4772_v55 = vld [vmem:[#allocation83_spill] sm:$0xff]  ;;  %v924_v59 = vadd.f32 %v918_v29, %v820_v25 }
 0x9f1   :  { %v4150_v35 = vpop.permute.xlu0 %1671  ;;  %v4152_v15 = vpop.permute.xlu1 %1673  ;;  %v975_v48 = vadd.f32 %v969_v13, %v871_v57  ;;  %v1022_v30 = vsel %vm517_vm12, %v4773_v21, %v4772_v55  ;;  %v976_v58 = vadd.f32 %v970_v60, %v872_v34  ;;  %v2231_v13 = vsel %vm1963_vm8, %v2229_v54, %v2230_v50  ;;  %v4777_v34 = vld [vmem:[#allocation127_spill] sm:$0xff] }
 0x9f2   :  { %4766 = vst [vmem:[#allocation29_spill] sm:$0xff] %v4150_v35  ;;  %4767 = vst [vmem:[#allocation132_spill] sm:$0xff] %v4152_v15  ;;  %v1528_v35 = vrot.slane %v4010_v56, 3  ;;  %v4770_v15 = vld [vmem:[#allocation82_spill] sm:$0xff]  ;;  %v977_v21 = vadd.f32 %v971_v0, %v873_v63  ;;  %v1028_v33 = vadd.f32 %v1022_v30, %v924_v59  ;;  %v4776_v60 = vrot.slane %v3907_v10, 3  ;;  %v4779_v59 = vld [vmem:[#allocation88_spill] sm:$0xff] }
 0x9f3   :  { %2194 = vrot.lane.b32.xlu1 %v2182_v49, %s2765_s23  ;;  %2192 = vrot.lane.b32.xlu0 %v2180_v47, %s2765_s23  ;;  %v1021_v1 = vsel %vm517_vm12, %v4771_v22, %v4770_v15  ;;  %v4775_v49 = vld [vmem:[#allocation81_spill] sm:$0xff]  ;;  %v2234_v15 = vrot.slane %v4157_v17, 4  ;;  %v2232_v22 = vrot.slane %v4163_v51, 4  ;;  %v1050_v18 = vadd.f32 %v3829_v45, %v975_v48 }
 0x9f4   :  { %v1023_v47 = vsel %vm517_vm12, %v4775_v49, %v4774_v43  ;;  %v1027_v25 = vadd.f32 %v1021_v1, %v923_v16  ;;  %v4194_v54 = vsel %vm1502_vm7, %v4776_v60, %v1526_v36  ;;  %v4199_v6 = vsel %vm1502_vm7, %v1526_v36, %v1528_v35  ;;  %v4783_v49 = vld [vmem:[#allocation90_spill] sm:$0xff] }
 0x9f5   :  { %v4180_v57 = vpop.permute.xlu0 %1675  ;;  %v4182_v11 = vpop.permute.xlu1 %1677  ;;  %v1029_v29 = vadd.f32 %v1023_v47, %v925_v20  ;;  %v1051_v1 = vadd.f32 %v3862_v8, %v976_v58  ;;  %v2267_v63 = vmul.f32 %v4017_v32, %v4777_v34  ;;  %v2269_v45 = vmul.f32 %v4021_v27, %v4777_v34  ;;  %v4780_v20 = vld [vmem:[#allocation85_spill] sm:$0xff]  ;;  %v4784_v47 = vld [vmem:[#allocation87_spill] sm:$0xff] }
 0x9f6   :  { %v2266_v10 = vmul.f32 %v4118_v62, %v4777_v34  ;;  %v2235_v48 = vsel %vm1963_vm8, %v2230_v50, %v2234_v15  ;;  %v2233_v36 = vsel %vm1963_vm8, %v2227_v9, %v2232_v22  ;;  %v2268_v8 = vmul.f32 %v4122_v42, %v4777_v34  ;;  %v4781_v58 = vld [vmem:[#allocation89_spill] sm:$0xff]  ;;  %v4782_v9 = vld [vmem:[#allocation86_spill] sm:$0xff] }
 0x9f7   :  { %2238 = vrot.lane.b32.xlu1 %v2231_v13, %s2766_s24  ;;  %2236 = vrot.lane.b32.xlu0 %v2228_v28, %s2766_s24  ;;  %v1052_v0 = vadd.f32 %v4778_v39, %v977_v21  ;;  %v1072_v55 = vadd.f32 %v3867_v19, %v1027_v25  ;;  %v1073_v30 = vadd.f32 %v4002_v38, %v1028_v33  ;;  %v4785_v19 = vrot.slane %v3796_v61, 2  ;;  %v4786_v38 = vld [vmem:[#allocation94_spill] sm:$0xff]  ;;  %v4787_v28 = vld [vmem:[#allocation91_spill] sm:$0xff] }
 0x9f8   :  { %v1118_v50 = vsel %vm262_vm9, %v4780_v20, %v4779_v59  ;;  %v1119_v43 = vsel %vm262_vm9, %v4782_v9, %v4781_v58  ;;  %v1120_v26 = vsel %vm262_vm9, %v4784_v47, %v4783_v49  ;;  %v1170_v21 = vsel %vm262_vm9, %v4787_v28, %v4786_v38  ;;  %v4790_v58 = vld [vmem:[#allocation96_spill] sm:$0xff]  ;;  %v4791_v9 = vld [vmem:[#allocation93_spill] sm:$0xff] }
 0x9f9   :  { %v1680_v17 = vpop.permute.xlu0 %1679  ;;  %v1682_v51 = vpop.permute.xlu1 %1681  ;;  %v1074_v13 = vadd.f32 %v4785_v19, %v1029_v29  ;;  %v2281_v60 = vrot.slane %v2267_v63, 4  ;;  %v4240_v39 = vmul.f32 %v4056_v53, %v4777_v34  ;;  %v4244_v61 = vmul.f32 %v4159_v44, %v4777_v34  ;;  %v4792_v47 = vld [vmem:[#allocation100_spill] sm:$0xff]  ;;  %v4793_v19 = vld [vmem:[#allocation97_spill] sm:$0xff] }
 0x9fa   :  { %v4209_v16 = vsel %vm347_vm10, %v1680_v17, %v1682_v51  ;;  %v2282_v17 = vrot.slane %v2269_v45, 4  ;;  %v2278_v51 = vrot.slane %v2266_v10, 4  ;;  %v1124_v29 = vadd.f32 %v1118_v50, %v1050_v18  ;;  %v4788_v45 = vld [vmem:[#allocation95_spill] sm:$0xff]  ;;  %v4789_v10 = vld [vmem:[#allocation92_spill] sm:$0xff]  ;;  %v4794_v18 = vld [vmem:[#allocation101_spill] sm:$0xff] }
 0x9fb   :  { %2242 = vrot.lane.b32.xlu1 %v2235_v48, %s2766_s24  ;;  %2240 = vrot.lane.b32.xlu0 %v2233_v36, %s2766_s24  ;;  %v2279_v36 = vrot.slane %v2268_v8, 4  ;;  %v1125_v59 = vadd.f32 %v1119_v43, %v1051_v1  ;;  %v1126_v20 = vadd.f32 %v1120_v26, %v1052_v0  ;;  %v1176_v63 = vadd.f32 %v1170_v21, %v1072_v55  ;;  %v4795_v1 = vld [vmem:[#allocation98_spill] sm:$0xff]  ;;  %v4797_v50 = vld [vmem:[#allocation99_spill] sm:$0xff] }
 0x9fc   :  { %v1171_v8 = vsel %vm262_vm9, %v4789_v10, %v4788_v45  ;;  %v1172_v49 = vsel %vm262_vm9, %v4791_v9, %v4790_v58  ;;  %v1222_v34 = vsel %vm347_vm10, %v4793_v19, %v4792_v47  ;;  %v1223_v0 = vsel %vm347_vm10, %v4795_v1, %v4794_v18  ;;  %v4798_v55 = vld [vmem:[#allocation106_spill] sm:$0xff]  ;;  %v4799_v43 = vld [vmem:[#allocation103_spill] sm:$0xff] }
 0x9fd   :  { %v1724_v25 = vpop.permute.xlu0 %1723  ;;  %v1726_v33 = vpop.permute.xlu1 %1725  ;;  %v1274_v26 = vsel %vm347_vm10, %v4799_v43, %v4798_v55  ;;  %v2283_v21 = vsel %vm1963_vm8, %v2281_v60, %v2282_v17  ;;  %v2286_v45 = vrot.slane %v4240_v39, 4  ;;  %v2284_v10 = vrot.slane %v4244_v61, 4  ;;  %v4800_v1 = vld [vmem:[#allocation114_spill] sm:$0xff] }
 0x9fe   :  { %v4236_v48 = vsel %vm347_vm10, %v1724_v25, %v1726_v33  ;;  %v2280_v33 = vsel %vm1963_vm8, %v2278_v51, %v2279_v36  ;;  %v1177_v58 = vadd.f32 %v1171_v8, %v1073_v30  ;;  %v1178_v9 = vadd.f32 %v1172_v49, %v1074_v13  ;;  %v4802_v13 = vld [vmem:[#allocation128_spill] sm:$0xff] }
 0x9ff   :  { %2246 = vrot.lane.b32.xlu1 %v2234_v15, %s2766_s24  ;;  %2244 = vrot.lane.b32.xlu0 %v2232_v22, %s2766_s24  ;;  %v4796_v15 = vld [vmem:[#allocation102_spill] sm:$0xff]  ;;  %v1228_v47 = vadd.f32 %v1222_v34, %v1124_v29  ;;  %v4275_v19 = vadd.f32 %v1223_v0, %v1125_v59  ;;  %v1280_v60 = vadd.f32 %v1274_v26, %v1176_v63  ;;  %v4804_v49 = vld [vmem:[#allocation104_spill] sm:$0xff] }
 0xa00   :  { %v1224_v22 = vsel %vm347_vm10, %v4797_v50, %v4796_v15  ;;  %v4801_v15 = vld [vmem:[#allocation111_spill] sm:$0xff]  ;;  %v1432_v51 = vsel %vm517_vm12, %v3804_v2, %v3806_v24  ;;  %v2319_v61 = vmul.f32 %v4017_v32, %v4802_v13  ;;  %v2321_v29 = vmul.f32 %v4021_v27, %v4802_v13  ;;  %v4805_v0 = vld [vmem:[#allocation108_spill] sm:$0xff] }
 0xa01   :  { %v1728_v38 = vpop.permute.xlu0 %1727  ;;  %v1730_v28 = vpop.permute.xlu1 %1729  ;;  %v1230_v18 = vadd.f32 %v1224_v22, %v1126_v20  ;;  %v1328_v50 = vsel %vm432_vm11, %v4801_v15, %v4800_v1  ;;  %v2318_v59 = vmul.f32 %v4118_v62, %v4802_v13  ;;  %v2287_v63 = vsel %vm1963_vm8, %v2282_v17, %v2286_v45  ;;  %v4803_v24 = vld [vmem:[#allocation107_spill] sm:$0xff]  ;;  %v4806_v22 = vld [vmem:[#allocation105_spill] sm:$0xff]  ;;  %v4807_v26 = vld [vmem:[#allocation112_spill] sm:$0xff] }
 0xa02   :  { %v4268_v25 = vsel %vm347_vm10, %v1728_v38, %v1730_v28  ;;  %v2285_v8 = vsel %vm1963_vm8, %v2279_v36, %v2284_v10  ;;  %v2320_v2 = vmul.f32 %v4122_v42, %v4802_v13  ;;  %v1275_v34 = vsel %vm347_vm10, %v4804_v49, %v4803_v24  ;;  %v4808_v17 = vld [vmem:[#allocation109_spill] sm:$0xff]  ;;  %v4809_v38 = vld [vmem:[#allocation118_spill] sm:$0xff]  ;;  %v4810_v28 = vld [vmem:[#allocation115_spill] sm:$0xff] }
 0xa03   :  { %2290 = vrot.lane.b32.xlu1 %v2283_v21, %s2766_s24  ;;  %2288 = vrot.lane.b32.xlu0 %v2280_v33, %s2766_s24  ;;  %v1276_v55 = vsel %vm347_vm10, %v4806_v22, %v4805_v0  ;;  %v1334_v43 = vadd.f32 %v1328_v50, %v1230_v18  ;;  %v1326_v36 = vsel %vm432_vm11, %v4808_v17, %v4807_v26  ;;  %v4811_v33 = vld [vmem:[#allocation119_spill] sm:$0xff]  ;;  %v4812_v1 = vld [vmem:[#allocation116_spill] sm:$0xff]  ;;  %v2330_v22 = vrot.slane %v2318_v59, 4 }
 0xa04   :  { %v1378_v21 = vsel %vm432_vm11, %v4810_v28, %v4809_v38  ;;  %v1379_v15 = vsel %vm432_vm11, %v4812_v1, %v4811_v33  ;;  %v4319_v24 = vmul.f32 %v4159_v44, %v4802_v13  ;;  %v1482_v49 = vsel %vm517_vm12, %v3846_v37, %v3848_v46  ;;  %v4818_v33 = vld [vmem:[#allocation121_spill] sm:$0xff] }
 0xa05   :  { %v1732_v39 = vpop.permute.xlu0 %1731  ;;  %v1734_v30 = vpop.permute.xlu1 %1733  ;;  %v1438_v18 = vadd.f32 %v1432_v51, %v1334_v43  ;;  %v2331_v26 = vrot.slane %v2320_v2, 4  ;;  %v1281_v17 = vadd.f32 %v1275_v34, %v1177_v58  ;;  %v1282_v38 = vadd.f32 %v1276_v55, %v1178_v9  ;;  %v4815_v34 = vld [vmem:[#allocation120_spill] sm:$0xff]  ;;  %v4816_v55 = vld [vmem:[#allocation117_spill] sm:$0xff] }
 0xa06   :  { %v4290_v20 = vsel %vm347_vm10, %v1732_v39, %v1734_v30  ;;  %v4315_v39 = vmul.f32 %v4056_v53, %v4802_v13  ;;  %v1384_v51 = vadd.f32 %v1378_v21, %v1280_v60  ;;  %v1506_v43 = vrot.slane %v3903_v3, 3  ;;  %v4817_v21 = vld [vmem:[#allocation122_spill] sm:$0xff] }
 0xa07   :  { %2294 = vrot.lane.b32.xlu1 %v2287_v63, %s2766_s24  ;;  %2292 = vrot.lane.b32.xlu0 %v2285_v8, %s2766_s24  ;;  %v2333_v63 = vrot.slane %v2319_v61, 4  ;;  %v2334_v8 = vrot.slane %v2321_v29, 4  ;;  %v1332_v13 = vadd.f32 %v1326_v36, %v1228_v47  ;;  %v4813_v61 = vld [vmem:[#allocation113_spill] sm:$0xff]  ;;  %v4814_v29 = vld [vmem:[#allocation110_spill] sm:$0xff]  ;;  %v1581_v37 = vsel %vm262_vm9, %v4013_v23, %v4015_v14 }
 0xa08   :  { %v1327_v28 = vsel %vm432_vm11, %v4814_v29, %v4813_v61  ;;  %v2338_v46 = vrot.slane %v4315_v39, 4  ;;  %v1385_v58 = vadd.f32 %v1379_v15, %v1281_v17  ;;  %v1488_v9 = vadd.f32 %v1482_v49, %v1384_v51  ;;  %v4819_v15 = vld [vmem:[#allocation129_spill] sm:$0xff] }
 0xa09   :  { %v1776_v50 = vpop.permute.xlu0 %1775  ;;  %v1778_v30 = vpop.permute.xlu1 %1777  ;;  %v1513_v60 = vadd.f32 %v1506_v43, %v1438_v18  ;;  %v1483_v47 = vsel %vm517_vm12, %v3891_v41, %v3893_v40  ;;  %v2332_v23 = vsel %vm1963_vm8, %v2330_v22, %v2331_v26  ;;  %v2336_v14 = vrot.slane %v4319_v24, 4 }
 0xa0a   :  { %v4325_v0 = vsel %vm432_vm11, %v1776_v50, %v1778_v30  ;;  %v1380_v36 = vsel %vm432_vm11, %v4816_v55, %v4815_v34  ;;  %v1430_v1 = vsel %vm517_vm12, %v4818_v33, %v4817_v21  ;;  %v1503_v39 = vrot.slane %v4819_v15, 3  ;;  %v4820_v50 = vld [vmem:[#allocation130_spill] sm:$0xff]  ;;  %v4825_v15 = vld [vmem:[#allocation16_spill] sm:$0xff] }
 0xa0b   :  { %2298 = vrot.lane.b32.xlu1 %v2286_v45, %s2766_s24  ;;  %2296 = vrot.lane.b32.xlu0 %v2284_v10, %s2766_s24  ;;  %v2335_v10 = vsel %vm1963_vm8, %v2333_v63, %v2334_v8  ;;  %v1587_v18 = vadd.f32 %v1581_v37, %v1513_v60  ;;  %v1631_v41 = vsel %vm262_vm9, %v4052_v4, %v4054_v31 }
 0xa0c   :  { %v2339_v40 = vsel %vm1963_vm8, %v2334_v8, %v2338_v46  ;;  %v2370_v30 = vmul.f32 %v4118_v62, %v4820_v50  ;;  %v4365_v63 = vmul.f32 %v4122_v42, %v4820_v50  ;;  %v1489_v24 = vadd.f32 %v1483_v47, %v1385_v58 }
 0xa0d   :  { %v1780_v59 = vpop.permute.xlu0 %1779  ;;  %v1782_v45 = vpop.permute.xlu1 %1781  ;;  %v1533_v49 = vadd.f32 %v4194_v54, %v1488_v9  ;;  %v1691_v22 = vadd.f32 %v4209_v16, %v1587_v18  ;;  %v2371_v61 = vmul.f32 %v4017_v32, %v4820_v50  ;;  %v1484_v4 = vsel %vm517_vm12, %v3918_v12, %v3920_v5  ;;  %v4821_v12 = vld [vmem:[#allocation26_spill] sm:$0xff] }
 0xa0e   :  { %v4344_v2 = vsel %vm432_vm11, %v1780_v59, %v1782_v45  ;;  %v2337_v8 = vsel %vm1963_vm8, %v2331_v26, %v2336_v14  ;;  %v2373_v29 = vmul.f32 %v4021_v27, %v4820_v50  ;;  %v1386_v37 = vadd.f32 %v1380_v36, %v1282_v38  ;;  %v4823_v36 = vld [vmem:[#allocation123_spill] sm:$0xff] }
 0xa0f   :  { %2342 = vrot.lane.b32.xlu1 %v2335_v10, %s2767_s1  ;;  %2340 = vrot.lane.b32.xlu0 %v2332_v23, %s2767_s1  ;;  %v1504_v54 = vrot.slane %v3873_v52, 3  ;;  %v1637_v16 = vadd.f32 %v1631_v41, %v1533_v49  ;;  %v1436_v32 = vadd.f32 %v1430_v1, %v1332_v13  ;;  %v1632_v5 = vsel %vm262_vm9, %v4821_v12, %v4091_v7  ;;  %v4824_v1 = vld [vmem:[#allocation15_spill] sm:$0xff] }
 0xa10   :  { %v2382_v9 = vrot.slane %v2370_v30, 4  ;;  %v2383_v26 = vrot.slane %v4365_v63, 4  ;;  %v1490_v60 = vadd.f32 %v1484_v4, %v1386_v37  ;;  %v1534_v27 = vadd.f32 %v4199_v6, %v1489_v24  ;;  %v4831_v37 = vld [vmem:[#allocation18_spill] sm:$0xff] }
 0xa11   :  { %v1784_v17 = vpop.permute.xlu0 %1783  ;;  %v1786_v51 = vpop.permute.xlu1 %1785  ;;  %v1741_v52 = vadd.f32 %v4236_v48, %v1637_v16  ;;  %v2374_v45 = vmul.f32 %v4159_v44, %v4820_v50  ;;  %v2385_v13 = vrot.slane %v2371_v61, 4  ;;  %v2386_v47 = vrot.slane %v2373_v29, 4  ;;  %v4822_v48 = vld [vmem:[#allocation131_spill] sm:$0xff]  ;;  %v4830_v29 = vld [vmem:[#allocation124_spill] sm:$0xff] }
 0xa12   :  { %v1789_v31 = vsel %vm432_vm11, %v1784_v17, %v1786_v51  ;;  %v2375_v7 = vmul.f32 %v4056_v53, %v4820_v50  ;;  %v1505_v23 = vsel %vm1502_vm7, %v1503_v39, %v1504_v54  ;;  %v1638_v34 = vadd.f32 %v1632_v5, %v1534_v27 }
 0xa13   :  { %v4379_v58 = vadd.f32 %v1789_v31, %v1691_v22  ;;  %2346 = vrot.lane.b32.xlu1 %v2339_v40, %s2767_s1  ;;  %2344 = vrot.lane.b32.xlu0 %v2337_v8, %s2767_s1  ;;  %v1333_v6 = vadd.f32 %v1327_v28, %v4275_v19  ;;  %v1431_v21 = vsel %vm517_vm12, %v4823_v36, %v4822_v48  ;;  %v2388_v40 = vrot.slane %v2374_v45, 4  ;;  %v4826_v19 = vld [vmem:[#allocation20_spill] sm:$0xff]  ;;  %v4827_v28 = vld [vmem:[#allocation30_spill] sm:$0xff]  ;;  %v2623_v48 = vld [vmem:[#allocation3 + $0x14] ss:$0 sm:$0xff] }
 0xa14   :  { %v1511_v33 = vadd.f32 %v1505_v23, %v1436_v32  ;;  %v1633_v18 = vsel %vm262_vm9, %v4825_v15, %v4824_v1  ;;  %v1535_v53 = vadd.f32 %v1528_v35, %v1490_v60  ;;  %v1742_v39 = vadd.f32 %v4268_v25, %v1638_v34  ;;  %v4828_v35 = vld [vmem:[#allocation132_spill] sm:$0xff]  ;;  %v4829_v25 = vld [vmem:[#allocation29_spill] sm:$0xff] }
 0xa15   :  { %v1828_v38 = vpop.permute.xlu0 %1827  ;;  %v1830_v59 = vpop.permute.xlu1 %1829  ;;  %v1579_v50 = vsel %vm262_vm9, %v4827_v28, %v4826_v19  ;;  %v2387_v63 = vsel %vm1963_vm8, %v2385_v13, %v2386_v47  ;;  %v2390_v24 = vrot.slane %v2375_v7, 4  ;;  %v1437_v49 = vadd.f32 %v1431_v21, %v1333_v6 }
 0xa16   :  { %v1839_v10 = vsel %vm432_vm11, %v1828_v38, %v1830_v59  ;;  %v1639_v22 = vadd.f32 %v1633_v18, %v1535_v53  ;;  %v1683_v17 = vsel %vm347_vm10, %v4829_v25, %v4828_v35  ;;  %v1585_v51 = vadd.f32 %v1579_v50, %v1511_v33 }
 0xa17   :  { %v1845_v55 = vadd.f32 %v1839_v10, %v1741_v52  ;;  %2348 = vrot.lane.b32.xlu0 %v2336_v14, %s2767_s1  ;;  %2350 = vrot.lane.b32.xlu1 %v2338_v46, %s2767_s1  ;;  %v2384_v46 = vsel %vm1963_vm8, %v2382_v9, %v2383_v26  ;;  %v1507_v61 = vsel %vm1502_vm7, %v1504_v54, %v1506_v43 }
 0xa18   :  { %v1743_v4 = vadd.f32 %v4290_v20, %v1639_v22  ;;  %v1580_v16 = vsel %vm262_vm9, %v4831_v37, %v4830_v29  ;;  %v2389_v12 = vsel %vm1963_vm8, %v2383_v26, %v2388_v40  ;;  %v2391_v5 = vsel %vm1963_vm8, %v2386_v47, %v2390_v24 }
 0xa19   :  { %v1832_v41 = vpop.permute.xlu0 %1831  ;;  %v1834_v14 = vpop.permute.xlu1 %1833  ;;  %v1512_v9 = vadd.f32 %v1507_v61, %v1437_v49  ;;  %v1689_v60 = vadd.f32 %v1683_v17, %v1585_v51  ;;  %v1684_v3 = vsel %vm347_vm10, %v4180_v57, %v4182_v11  ;;  %v1957_v33 = vmul.f32 %v4118_v62, %v2623_v48 }
 0xa1a   :  { %v1840_v30 = vsel %vm432_vm11, %v1832_v41, %v1834_v14  ;;  %v1959_v14 = vmul.f32 %v4159_v44, %v2623_v48 }
 0xa1b   :  { %v1846_v56 = vadd.f32 %v1840_v30, %v1742_v39  ;;  %2392 = vrot.lane.b32.xlu0 %v2384_v46, %s2767_s1  ;;  %2394 = vrot.lane.b32.xlu1 %v2387_v63, %s2767_s1  ;;  %v1586_v20 = vadd.f32 %v1580_v16, %v1512_v9  ;;  %v1793_v43 = vadd.f32 %v4325_v0, %v1689_v60  ;;  %v1964_v39 = vrot.slane %v1957_v33, 4 }
 0xa1c   :  { %v1967_v28 = vrot.slane %v1959_v14, 4 }
 0xa1d   :  { %v1836_v31 = vpop.permute.xlu0 %1835  ;;  %v1838_v8 = vpop.permute.xlu1 %1837  ;;  %v1690_v38 = vadd.f32 %v1684_v3, %v1586_v20 }
 0xa1e   :  { %v1841_v32 = vsel %vm432_vm11, %v1836_v31, %v1838_v8 }
 0xa1f   :  { %v1847_v27 = vadd.f32 %v1841_v32, %v1743_v4  ;;  %2396 = vrot.lane.b32.xlu0 %v2389_v12, %s2767_s1  ;;  %2398 = vrot.lane.b32.xlu1 %v2391_v5, %s2767_s1  ;;  %v1794_v45 = vadd.f32 %v4344_v2, %v1690_v38  ;;  %v1958_v2 = vmul.f32 %v4122_v42, %v2623_v48 }
 0xa21   :  { %v1880_v54 = vpop.permute.xlu0 %1879  ;;  %v1882_v52 = vpop.permute.xlu1 %1881  ;;  %v1965_v41 = vrot.slane %v1958_v2, 4 }
 0xa22   :  { %v1891_v26 = vsel %vm517_vm12, %v1880_v54, %v1882_v52 }
 0xa23   :  { %v1897_v59 = vadd.f32 %v1891_v26, %v1793_v43  ;;  %2400 = vrot.lane.b32.xlu0 %v2388_v40, %s2767_s1  ;;  %2402 = vrot.lane.b32.xlu1 %v2390_v24, %s2767_s1  ;;  %v2624_v24 = vld [vmem:[#allocation3 + $0x2d] ss:$0 sm:$0xff] }
 0xa24   :  { %v1980_v35 = vmul.f32 %v4118_v62, %v2624_v24  ;;  %v1981_v25 = vmul.f32 %v4122_v42, %v2624_v24  ;;  %v1982_v37 = vmul.f32 %v4159_v44, %v2624_v24 }
 0xa25   :  { %v1884_v10 = vpop.permute.xlu0 %1883  ;;  %v1886_v13 = vpop.permute.xlu1 %1885 }
 0xa26   :  { %v1892_v47 = vsel %vm517_vm12, %v1884_v10, %v1886_v13  ;;  %v1986_v8 = vrot.slane %v1980_v35, 4  ;;  %v1987_v29 = vrot.slane %v1981_v25, 4  ;;  %v1989_v60 = vrot.slane %v1982_v37, 4 }
 0xa27   :  { %v1898_v57 = vadd.f32 %v1892_v47, %v1794_v45 }
 0xa28   :  { %v1988_v62 = vsel %vm1963_vm8, %v1986_v8, %v1987_v29  ;;  %v1990_v54 = vsel %vm1963_vm8, %v1987_v29, %v1989_v60 }
 0xa29   :  { %v1888_v11 = vpop.permute.xlu0 %1887  ;;  %v1890_v7 = vpop.permute.xlu1 %1889 }
 0xa2a   :  { %v1893_v0 = vsel %vm517_vm12, %v1888_v11, %v1890_v7 }
 0xa2b   :  { %v1899_v23 = vadd.f32 %v1893_v0, %v4379_v58 }
 0xa2d   :  { %v1932_v34 = vpop.permute.xlu0 %1931  ;;  %v1934_v6 = vpop.permute.xlu1 %1933  ;;  %v1974_v32 = vadd.f32 %v1967_v28, %v1899_v23 }
 0xa2e   :  { %v1943_v36 = vsel %vm517_vm12, %v1932_v34, %v1934_v6 }
 0xa2f   :  { %v1949_v21 = vadd.f32 %v1943_v36, %v1845_v55  ;;  %v1966_v55 = vsel %vm1963_vm8, %v1964_v39, %v1965_v41 }
 0xa30   :  { %v1972_v63 = vadd.f32 %v1966_v55, %v1897_v59 }
 0xa31   :  { %v1936_v1 = vpop.permute.xlu0 %1935  ;;  %v1938_v15 = vpop.permute.xlu1 %1937  ;;  %v1994_v3 = vadd.f32 %v1988_v62, %v1949_v21 }
 0xa32   :  { %v1944_v18 = vsel %vm517_vm12, %v1936_v1, %v1938_v15 }
 0xa33   :  { %v1950_v53 = vadd.f32 %v1944_v18, %v1846_v56  ;;  %v1968_v56 = vsel %vm1963_vm8, %v1965_v41, %v1967_v28 }
 0xa34   :  { %v1973_v51 = vadd.f32 %v1968_v56, %v1898_v57 }
 0xa35   :  { %v1940_v58 = vpop.permute.xlu0 %1939  ;;  %v1942_v46 = vpop.permute.xlu1 %1941  ;;  %v1995_v44 = vadd.f32 %v1990_v54, %v1950_v53 }
 0xa36   :  { %v1945_v40 = vsel %vm517_vm12, %v1940_v58, %v1942_v46 }
 0xa37   :  { %v1951_v19 = vadd.f32 %v1945_v40, %v1847_v27 }
 0xa39   :  { %v2029_v50 = vpop.permute.xlu0 %2028  ;;  %v2031_v30 = vpop.permute.xlu1 %2030  ;;  %v1996_v10 = vadd.f32 %v1989_v60, %v1951_v19 }
 0xa3a   :  { %v2040_v49 = vsel %vm262_vm9, %v2029_v50, %v2031_v30 }
 0xa3b   :  { %v2046_v22 = vadd.f32 %v2040_v49, %v1972_v63 }
 0xa3d   :  { %v2033_v17 = vpop.permute.xlu0 %2032  ;;  %v2035_v61 = vpop.permute.xlu1 %2034 }
 0xa3e   :  { %v2041_v4 = vsel %vm262_vm9, %v2033_v17, %v2035_v61 }
 0xa3f   :  { %v2047_v31 = vadd.f32 %v2041_v4, %v1973_v51 }
 0xa41   :  { %v2037_v16 = vpop.permute.xlu0 %2036  ;;  %v2039_v12 = vpop.permute.xlu1 %2038 }
 0xa42   :  { %v2042_v5 = vsel %vm262_vm9, %v2037_v16, %v2039_v12 }
 0xa43   :  { %v2048_v9 = vadd.f32 %v2042_v5, %v1974_v32 }
 0xa45   :  { %v2081_v42 = vpop.permute.xlu0 %2080  ;;  %v2083_v27 = vpop.permute.xlu1 %2082 }
 0xa46   :  { %v2092_v20 = vsel %vm262_vm9, %v2081_v42, %v2083_v27 }
 0xa47   :  { %v4457_v43 = vadd.f32 %v2092_v20, %v1994_v3 }
 0xa49   :  { %v2085_v52 = vpop.permute.xlu0 %2084  ;;  %v2087_v26 = vpop.permute.xlu1 %2086 }
 0xa4a   :  { %v2093_v38 = vsel %vm262_vm9, %v2085_v52, %v2087_v26 }
 0xa4b   :  { %v4461_v59 = vadd.f32 %v2093_v38, %v1995_v44 }
 0xa4d   :  { %v2089_v45 = vpop.permute.xlu0 %2088  ;;  %v2091_v13 = vpop.permute.xlu1 %2090 }
 0xa4e   :  { %v2094_v47 = vsel %vm262_vm9, %v2089_v45, %v2091_v13 }
 0xa4f   :  { %v4464_v57 = vadd.f32 %v2094_v47, %v1996_v10 }
 0xa51   :  { %v2133_v11 = vpop.permute.xlu0 %2132  ;;  %v2135_v7 = vpop.permute.xlu1 %2134 }
 0xa52   :  { %v2144_v55 = vsel %vm347_vm10, %v2133_v11, %v2135_v7 }
 0xa53   :  { %v2150_v63 = vadd.f32 %v2144_v55, %v2046_v22 }
 0xa55   :  { %v2137_v0 = vpop.permute.xlu0 %2136  ;;  %v2139_v23 = vpop.permute.xlu1 %2138 }
 0xa56   :  { %v2145_v24 = vsel %vm347_vm10, %v2137_v0, %v2139_v23 }
 0xa57   :  { %v2151_v51 = vadd.f32 %v2145_v24, %v2047_v31 }
 0xa59   :  { %v2141_v34 = vpop.permute.xlu0 %2140  ;;  %v2143_v6 = vpop.permute.xlu1 %2142 }
 0xa5a   :  { %v2146_v4 = vsel %vm347_vm10, %v2141_v34, %v2143_v6 }
 0xa5b   :  { %v2152_v32 = vadd.f32 %v2146_v4, %v2048_v9 }
 0xa5d   :  { %v2185_v48 = vpop.permute.xlu0 %2184  ;;  %v2187_v36 = vpop.permute.xlu1 %2186 }
 0xa5e   :  { %v2196_v5 = vsel %vm347_vm10, %v2185_v48, %v2187_v36 }
 0xa5f   :  { %v2202_v3 = vadd.f32 %v2196_v5, %v4457_v43 }
 0xa61   :  { %v2189_v21 = vpop.permute.xlu0 %2188  ;;  %v2191_v33 = vpop.permute.xlu1 %2190 }
 0xa62   :  { %v2197_v54 = vsel %vm347_vm10, %v2189_v21, %v2191_v33 }
 0xa63   :  { %v2203_v45 = vadd.f32 %v2197_v54, %v4461_v59 }
 0xa65   :  { %v2193_v2 = vpop.permute.xlu0 %2192  ;;  %v2195_v1 = vpop.permute.xlu1 %2194 }
 0xa66   :  { %v2198_v13 = vsel %vm347_vm10, %v2193_v2, %v2195_v1 }
 0xa67   :  { %v2204_v23 = vadd.f32 %v2198_v13, %v4464_v57 }
 0xa69   :  { %v2237_v15 = vpop.permute.xlu0 %2236  ;;  %v2239_v18 = vpop.permute.xlu1 %2238 }
 0xa6a   :  { %v2248_v30 = vsel %vm432_vm11, %v2237_v15, %v2239_v18 }
 0xa6b   :  { %v2254_v49 = vadd.f32 %v2248_v30, %v2150_v63 }
 0xa6d   :  { %v2241_v53 = vpop.permute.xlu0 %2240  ;;  %v2243_v39 = vpop.permute.xlu1 %2242 }
 0xa6e   :  { %v2249_v25 = vsel %vm432_vm11, %v2241_v53, %v2243_v39  ;;  %v2441_v39 = vstv %s2440_s25 }
 0xa6f   :  { %v2255_v8 = vadd.f32 %v2249_v25, %v2151_v51 }
 0xa71   :  { %v2245_v41 = vpop.permute.xlu0 %2244  ;;  %v2247_v14 = vpop.permute.xlu1 %2246 }
 0xa72   :  { %v2250_v22 = vsel %vm432_vm11, %v2245_v41, %v2247_v14 }
 0xa73   :  { %v2256_v62 = vadd.f32 %v2250_v22, %v2152_v32 }
 0xa75   :  { %v2289_v58 = vpop.permute.xlu0 %2288  ;;  %v2291_v46 = vpop.permute.xlu1 %2290 }
 0xa76   :  { %v2300_v42 = vsel %vm432_vm11, %v2289_v58, %v2291_v46 }
 0xa77   :  { %v2306_v52 = vadd.f32 %v2300_v42, %v2202_v3 }
 0xa79   :  { %v2293_v40 = vpop.permute.xlu0 %2292  ;;  %v2295_v19 = vpop.permute.xlu1 %2294 }
 0xa7a   :  { %v2301_v26 = vsel %vm432_vm11, %v2293_v40, %v2295_v19 }
 0xa7b   :  { %v2307_v47 = vadd.f32 %v2301_v26, %v2203_v45 }
 0xa7d   :  { %v2297_v28 = vpop.permute.xlu0 %2296  ;;  %v2299_v50 = vpop.permute.xlu1 %2298 }
 0xa7e   :  { %v2302_v7 = vsel %vm432_vm11, %v2297_v28, %v2299_v50 }
 0xa7f   :  { %v2308_v6 = vadd.f32 %v2302_v7, %v2204_v23 }
 0xa81   :  { %v2341_v56 = vpop.permute.xlu0 %2340  ;;  %v2343_v35 = vpop.permute.xlu1 %2342 }
 0xa82   :  { %v2352_v17 = vsel %vm517_vm12, %v2341_v56, %v2343_v35  ;;  %v2490_v35 = vstv %s2633_s26 }
 0xa83   :  { %v2358_v61 = vadd.f32 %v2352_v17, %v2254_v49 }
 0xa85   :  { %v2345_v29 = vpop.permute.xlu0 %2344  ;;  %v2347_v37 = vpop.permute.xlu1 %2346  ;;  %2416 = vrot.lane.b32.xlu0 %v2358_v61, %s2760_s18 }
 0xa86   :  { %v2353_v16 = vsel %vm517_vm12, %v2345_v29, %v2347_v37 }
 0xa87   :  { %v2359_v12 = vadd.f32 %v2353_v16, %v2255_v8 }
 0xa89   :  { %v2349_v60 = vpop.permute.xlu0 %2348  ;;  %2418 = vrot.lane.b32.xlu1 %v2359_v12, %s2760_s18  ;;  %v2351_v31 = vpop.permute.xlu1 %2350 }
 0xa8a   :  { %v2354_v27 = vsel %vm517_vm12, %v2349_v60, %v2351_v31 }
 0xa8b   :  { %v2360_v20 = vadd.f32 %v2354_v27, %v2256_v62 }
 0xa8d   :  { %v2393_v44 = vpop.permute.xlu0 %2392  ;;  %v2395_v9 = vpop.permute.xlu1 %2394  ;;  %2420 = vrot.lane.b32.xlu0 %v2360_v20, %s2760_s18 }
 0xa8e   :  { %v2404_v38 = vsel %vm517_vm12, %v2393_v44, %v2395_v9 }
 0xa8f   :  { %v2410_v10 = vadd.f32 %v2404_v38, %v2306_v52 }
 0xa91   :  { %v2397_v11 = vpop.permute.xlu0 %2396  ;;  %v2399_v43 = vpop.permute.xlu1 %2398  ;;  %2465 = vrot.lane.b32.xlu1 %v2410_v10, %s2760_s18 }
 0xa92   :  { %v2405_v0 = vsel %vm517_vm12, %v2397_v11, %v2399_v43 }
 0xa93   :  { %v2411_v34 = vadd.f32 %v2405_v0, %v2307_v47 }
 0xa95   :  { %v2401_v48 = vpop.permute.xlu0 %2400  ;;  %v2403_v36 = vpop.permute.xlu1 %2402  ;;  %2467 = vrot.lane.b32.xlu0 %v2411_v34, %s2760_s18 }
 0xa96   :  { %v2406_v59 = vsel %vm517_vm12, %v2401_v48, %v2403_v36 }
 0xa97   :  { %v2412_v21 = vadd.f32 %v2406_v59, %v2308_v6 }
 0xa99   :  { %2469 = vrot.lane.b32.xlu1 %v2412_v21, %s2760_s18  ;;  %2428 = vrot.lane.b32.xlu0 %v2358_v61, %s2759_s17 }
 0xa9d   :  { %2430 = vrot.lane.b32.xlu1 %v2359_v12, %s2759_s17  ;;  %2432 = vrot.lane.b32.xlu0 %v2360_v20, %s2759_s17 }
 0xaa1   :  { %2477 = vrot.lane.b32.xlu1 %v2410_v10, %s2759_s17  ;;  %2479 = vrot.lane.b32.xlu0 %v2411_v34, %s2759_s17 }
 0xaa5   :  { %2481 = vrot.lane.b32.xlu1 %v2412_v21, %s2759_s17 }
 0xaf7   :  { %v2417_v57 = vpop.permute.xlu0 %2416 }
 0xaf8   :  { %v2425_v18 = vadd.f32 %v2417_v57, %v2358_v61 }
 0xafb   :  { %v2419_v33 = vpop.permute.xlu1 %2418 }
 0xafc   :  { %v2426_v58 = vadd.f32 %v2419_v33, %v2359_v12 }
 0xaff   :  { %v2421_v2 = vpop.permute.xlu0 %2420 }
 0xb00   :  { %v2427_v46 = vadd.f32 %v2421_v2, %v2360_v20 }
 0xb03   :  { %v2466_v1 = vpop.permute.xlu1 %2465 }
 0xb04   :  { %v2474_v63 = vadd.f32 %v2466_v1, %v2410_v10 }
 0xb07   :  { %v2468_v15 = vpop.permute.xlu0 %2467 }
 0xb08   :  { %v2475_v24 = vadd.f32 %v2468_v15, %v2411_v34 }
 0xb0b   :  { %v2470_v53 = vpop.permute.xlu1 %2469  ;;  %v2429_v41 = vpop.permute.xlu0 %2428 }
 0xb0c   :  { %v2437_v14 = vadd.f32 %v2429_v41, %v2425_v18  ;;  %v2476_v29 = vadd.f32 %v2470_v53, %v2412_v21 }
 0xb0e   :  { %v2442_v40 = vadd.f32 %v2441_v39, %v2437_v14 }
 0xb0f   :  { %v2431_v19 = vpop.permute.xlu1 %2430  ;;  %v2433_v55 = vpop.permute.xlu0 %2432 }
 0xb10   :  { %v2445_v28 = vmul.f32 0.5, %v2442_v40  ;;  %v2438_v50 = vadd.f32 %v2431_v19, %v2426_v58  ;;  %v2439_v30 = vadd.f32 %v2433_v55, %v2427_v46 }
 0xb12   :  { %2663 = vtanh.f32 %v2445_v28  ;;  %v2443_v49 = vadd.f32 %v2441_v39, %v2438_v50  ;;  %v2444_v56 = vadd.f32 %v2441_v39, %v2439_v30 }
 0xb13   :  { %v2478_v25 = vpop.permute.xlu1 %2477  ;;  %v2480_v17 = vpop.permute.xlu0 %2479 }
 0xb14   :  { %v2446_v51 = vmul.f32 0.5, %v2443_v49  ;;  %v2447_v61 = vmul.f32 0.5, %v2444_v56  ;;  %v2486_v4 = vadd.f32 %v2478_v25, %v2474_v63  ;;  %v2487_v8 = vadd.f32 %v2480_v17, %v2475_v24 }
 0xb16   :  { %2665 = vtanh.f32 %v2446_v51  ;;  %v2491_v37 = vadd.f32 %v2490_v35, %v2486_v4  ;;  %v2492_v22 = vadd.f32 %v2490_v35, %v2487_v8 }
 0xb17   :  { %2667 = vtanh.f32 %v2447_v61  ;;  %v2482_v16 = vpop.permute.xlu1 %2481 }
 0xb18   :  { %v2494_v32 = vmul.f32 0.5, %v2491_v37  ;;  %v2495_v12 = vmul.f32 0.5, %v2492_v22  ;;  %v2488_v5 = vadd.f32 %v2482_v16, %v2476_v29 }
 0xb1a   :  { %2669 = vtanh.f32 %v2494_v32  ;;  %v2493_v62 = vadd.f32 %v2490_v35, %v2488_v5 }
 0xb1b   :  { %2671 = vtanh.f32 %v2495_v12 }
 0xb1c   :  { %v2664_v60 = vpop.eup %2663  ;;  %v2496_v31 = vmul.f32 0.5, %v2493_v62 }
 0xb1d   :  { %v2451_v42 = vadd.f32 1.0, %v2664_v60 }
 0xb1e   :  { %2673 = vtanh.f32 %v2496_v31 }
 0xb1f   :  { %v2454_v27 = vmul.f32 0.5, %v2451_v42 }
 0xb20   :  { %v2666_v3 = vpop.eup %2665 }
 0xb21   :  { %v2668_v20 = vpop.eup %2667  ;;  %2458 = vst.msk [vmem:[%s4556_s3] sm:$0xff] %vm2457_vm13, %v2454_v27  ;;  %v2452_v54 = vadd.f32 1.0, %v2666_v3  ;;  %2530 = vrot.lane.b32.xlu0 %v2454_v27, %s2758_s16 }
 0xb22   :  { %v2453_v52 = vadd.f32 1.0, %v2668_v20 }
 0xb23   :  { %v2455_v44 = vmul.f32 0.5, %v2452_v54 }
 0xb24   :  { %v2670_v9 = vpop.eup %2669  ;;  %v2456_v26 = vmul.f32 0.5, %v2453_v52 }
 0xb25   :  { %v2672_v38 = vpop.eup %2671  ;;  %2459 = vst.msk [vmem:[%s4556_s3 + $0x8] sm:$0xff] %vm2457_vm13, %v2455_v44  ;;  %v2500_v45 = vadd.f32 1.0, %v2670_v9  ;;  %2532 = vrot.lane.b32.xlu1 %v2455_v44, %s2758_s16 }
 0xb26   :  { %v2501_v10 = vadd.f32 1.0, %v2672_v38  ;;  %2534 = vrot.lane.b32.xlu0 %v2456_v26, %s2758_s16  ;;  %2461 = vst.msk [vmem:[%s4556_s3 + $0x10] sm:$0x1] %vm2460_vm14, %v2456_v26 }
 0xb27   :  { %v2503_v13 = vmul.f32 0.5, %v2500_v45 }
 0xb28   :  { %v2674_v47 = vpop.eup %2673  ;;  %v2504_v11 = vmul.f32 0.5, %v2501_v10 }
 0xb29   :  { %2634 = vst.msk [vmem:[%s4556_s3 + $0x18] sm:$0xff] %vm2457_vm13, %v2503_v13  ;;  %v2502_v43 = vadd.f32 1.0, %v2674_v47  ;;  %2563 = vrot.lane.b32.xlu1 %v2503_v13, %s2758_s16 }
 0xb2a   :  { %2635 = vst.msk [vmem:[%s4556_s3 + $0x20] sm:$0xff] %vm2457_vm13, %v2504_v11  ;;  %2565 = vrot.lane.b32.xlu0 %v2504_v11, %s2758_s16 }
 0xb2b   :  { %v2505_v7 = vmul.f32 0.5, %v2502_v43 }
 0xb2d   :  { %2567 = vrot.lane.b32.xlu1 %v2505_v7, %s2758_s16  ;;  %2636 = vst.msk [vmem:[%s4556_s3 + $0x28] sm:$0x1] %vm2460_vm14, %v2505_v7 }
 0xb93   :  { %v2531_v0 = vpop.permute.xlu0 %2530 }
 0xb94   :  { %2637 = vst.msk [vmem:[%s4556_s3 + $0x30] sm:$0xff] %vm2457_vm13, %v2531_v0 }
 0xb97   :  { %v2533_v23 = vpop.permute.xlu1 %2532 }
 0xb98   :  { %2638 = vst.msk [vmem:[%s4556_s3 + $0x38] sm:$0xff] %vm2457_vm13, %v2533_v23  ;;  %v2535_v34 = vpop.permute.xlu0 %2534 }
 0xb99   :  { %2639 = vst.msk [vmem:[%s4556_s3 + $0x40] sm:$0x1] %vm2460_vm14, %v2535_v34 }
 0xb9b   :  { %v2564_v6 = vpop.permute.xlu1 %2563 }
 0xb9c   :  { %2641 = vst.msk [vmem:[%s4556_s3 + $0x48] sm:$0xff] %vm2457_vm13, %v2564_v6  ;;  %v2566_v48 = vpop.permute.xlu0 %2565 }
 0xb9d   :  { %2642 = vst.msk [vmem:[%s4556_s3 + $0x50] sm:$0xff] %vm2457_vm13, %v2566_v48 }
 0xb9f   :  { %v2568_v36 = vpop.permute.xlu1 %2567 }
 0xba0   :  { %2643 = vst.msk [vmem:[%s4556_s3 + $0x58] sm:$0x1] %vm2460_vm14, %v2568_v36 }
 0xba1   :  { %2580 = vsyncpa [#allocation4], 1 }
 0xba2   :  { %2581 = vsyncpa [#allocation8], 1 }
 0xba3   :  { %2582 = vsyncpa [#allocation5], 1 }

</bundles_post_ra>
